<compile_context>
chip_gen: v6e
topology: v6e:2x2x1
jax: 0.10.0
libtpu: 0.0.40
codegen_flags: <defaults>
</compile_context>

<pallas_src>
import functools

import jax
import jax.numpy as jnp
from jax.experimental import pallas as pl
from jax.experimental.pallas import tpu as pltpu


# ------------------------------ fused Pallas kernel ------------------------------

def _sepconv_kernel(x_ref, dww_ref, dwb_ref, pww_ref, pwb_ref, o_ref, *,
                    K, stride, Ho, Wo, eps):
    """Fused depthwise conv + InstanceNorm + pointwise 1x1 conv for one image.

    x_ref   : (1, Cin, Hp, Wp)   zero-padded input, channels-first (NCHW slice)
    dww_ref : (Cin, K*K)         depthwise weights (one row of taps per channel)
    dwb_ref : (Cin, 1)           depthwise bias
    pww_ref : (Cout, Cin)        pointwise 1x1 weights (channels-first layout)
    pwb_ref : (Cout, 1)          pointwise bias
    o_ref   : (1, Cout, Ho*Wo)   lane-dense NCHW output (spatial flattened on lanes)
    """
    x = x_ref[0].astype(jnp.float32)                       # (Cin, Hp, Wp)
    cin = x.shape[0]

    # --- depthwise KxK conv: in-kernel tap loop (no im2col), f32 accumulate ---
    acc = jnp.zeros((cin, Ho, Wo), jnp.float32)
    for kh in range(K):
        for kw in range(K):
            if stride == 1:
                tap = x[:, kh:kh + Ho, kw:kw + Wo]
            else:
                tap = jax.lax.slice(
                    x, (0, kh, kw),
                    (cin, kh + stride * (Ho - 1) + 1, kw + stride * (Wo - 1) + 1),
                    (1, stride, stride))
            w_tap = dww_ref[:, kh * K + kw:kh * K + kw + 1]          # (Cin, 1)
            acc = acc + tap * w_tap[:, :, None]                      # bcast (Cin,1,1)

    y = acc.reshape(cin, Ho * Wo) + dwb_ref[...]                     # (Cin, Ho*Wo)

    # --- InstanceNorm2d(affine=False, eps): per-channel stats over spatial ---
    mean = jnp.mean(y, axis=1, keepdims=True)
    var = jnp.mean(jnp.square(y - mean), axis=1, keepdims=True)      # biased, as PyTorch
    yn = (y - mean) * jax.lax.rsqrt(var + eps)

    # --- pointwise 1x1 conv as a channels-first GEMM -> lane-dense output ---
    out = jnp.dot(pww_ref[...], yn, preferred_element_type=jnp.float32)
    o_ref[0] = (out + pwb_ref[...]).astype(o_ref.dtype)


# ------------------------------ wrapper ------------------------------

def separable_conv2d(x, dw_w, dw_b, pw_w, pw_b, *, kernel_size, stride=1,
                     padding=0, eps=1e-5):
    """SeparableConv2d forward (PyTorch semantics, scale_factor=1).

    x    : (N, Cin, H, W)      NCHW input (PyTorch layout)
    dw_w : (Cin, 1, K, K)      depthwise Conv2d weight (groups=Cin)
    dw_b : (Cin,)              depthwise bias
    pw_w : (Cout, Cin, 1, 1)   pointwise Conv2d weight
    pw_b : (Cout,)             pointwise bias
    returns (N, Cout, Ho, Wo)  NCHW
    """
    # TODO(synk): scale_factor > 1 (channel-multiplier depthwise) not implemented;
    # the module default (scale_factor=1) is what is used here.
    N, Cin, H, W = x.shape
    K = int(kernel_size)
    Cout = pw_w.shape[0]

    if padding > 0:
        x = jnp.pad(x, ((0, 0), (0, 0), (padding, padding), (padding, padding)))
    Hp, Wp = H + 2 * padding, W + 2 * padding
    Ho = (Hp - K) // stride + 1
    Wo = (Wp - K) // stride + 1

    dww = dw_w.reshape(Cin, K * K).astype(jnp.float32)
    dwb = dw_b.reshape(Cin, 1).astype(jnp.float32)
    pww = pw_w.reshape(Cout, Cin).astype(jnp.float32)
    pwb = pw_b.reshape(Cout, 1).astype(jnp.float32)

    kernel = functools.partial(_sepconv_kernel, K=K, stride=stride,
                               Ho=Ho, Wo=Wo, eps=eps)

    out = pl.pallas_call(
        kernel,
        out_shape=jax.ShapeDtypeStruct((N, Cout, Ho * Wo), jnp.float32),
        grid=(N,),
        in_specs=[
            pl.BlockSpec((1, Cin, Hp, Wp), lambda n: (n, 0, 0, 0)),
            pl.BlockSpec((Cin, K * K), lambda n: (0, 0)),
            pl.BlockSpec((Cin, 1), lambda n: (0, 0)),
            pl.BlockSpec((Cout, Cin), lambda n: (0, 0)),
            pl.BlockSpec((Cout, 1), lambda n: (0, 0)),
        ],
        out_specs=pl.BlockSpec((1, Cout, Ho * Wo), lambda n: (n, 0, 0)),
        compiler_params=pltpu.CompilerParams(
            dimension_semantics=("parallel",)),
    )(x.astype(jnp.float32), dww, dwb, pww, pwb)

    return out.reshape(N, Cout, Ho, Wo)


# ------------------------------ pure-JAX reference ------------------------------

def separable_conv2d_ref(x, dw_w, dw_b, pw_w, pw_b, *, kernel_size, stride=1,
                         padding=0, eps=1e-5):
    del kernel_size
    Cin = x.shape[1]
    y = jax.lax.conv_general_dilated(
        x, dw_w, window_strides=(stride, stride),
        padding=((padding, padding), (padding, padding)),
        dimension_numbers=("NCHW", "OIHW", "NCHW"),
        feature_group_count=Cin,
        precision=jax.lax.Precision.HIGHEST)
    y = y + dw_b[None, :, None, None]
    mean = jnp.mean(y, axis=(2, 3), keepdims=True)
    var = jnp.mean(jnp.square(y - mean), axis=(2, 3), keepdims=True)
    y = (y - mean) * jax.lax.rsqrt(var + eps)
    z = jax.lax.conv_general_dilated(
        y, pw_w, window_strides=(1, 1), padding="VALID",
        dimension_numbers=("NCHW", "OIHW", "NCHW"),
        precision=jax.lax.Precision.HIGHEST)
    return z + pw_b[None, :, None, None]


# ------------------------------ demo ------------------------------

if __name__ == "__main__":
    key = jax.random.PRNGKey(0)
    k1, k2, k3, k4, k5 = jax.random.split(key, 5)

    # small config consistent with the module: SeparableConv2d(16 -> 32, k=3, pad=1)
    N, Cin, Cout, H, W = 2, 16, 32, 16, 16
    K, stride, padding = 3, 1, 1

    x = jax.random.normal(k1, (N, Cin, H, W), jnp.float32)
    dw_w = jax.random.normal(k2, (Cin, 1, K, K), jnp.float32) * 0.2
    dw_b = jax.random.normal(k3, (Cin,), jnp.float32) * 0.1
    pw_w = jax.random.normal(k4, (Cout, Cin, 1, 1), jnp.float32) * 0.2
    pw_b = jax.random.normal(k5, (Cout,), jnp.float32) * 0.1

    fwd = jax.jit(functools.partial(separable_conv2d, kernel_size=K,
                                    stride=stride, padding=padding))
    out = jax.block_until_ready(fwd(x, dw_w, dw_b, pw_w, pw_b))

    assert out.shape == (N, Cout, H, W), out.shape
    assert bool(jnp.all(jnp.isfinite(out)))

    ref = separable_conv2d_ref(x, dw_w, dw_b, pw_w, pw_b, kernel_size=K,
                               stride=stride, padding=padding)
    max_err = float(jnp.max(jnp.abs(out - ref)))
    assert max_err < 5e-2, f"max abs error vs reference: {max_err}"

    print("KERNEL_OK")
</pallas_src>

<mosaic_0001>
module attributes {stable_mosaic.version = 11 : i64} {
  func.func @_sepconv_kernel(%arg0: i32, %arg1: memref<1x16x18x18xf32, #tpu.memory_space<vmem>>, %arg2: memref<16x9xf32, #tpu.memory_space<vmem>>, %arg3: memref<16x1xf32, #tpu.memory_space<vmem>>, %arg4: memref<32x16xf32, #tpu.memory_space<vmem>>, %arg5: memref<32x1xf32, #tpu.memory_space<vmem>>, %arg6: memref<1x32x256xf32, #tpu.memory_space<vmem>>) attributes {dimension_semantics = [#tpu.dimension_semantics<parallel>], iteration_bounds = array<i64: 2>, scalar_prefetch = 0 : i64, scratch_operands = 0 : i64, tpu.core_type = #tpu.core_type<tc>, window_params = [{transform_indices = @transform_0, window_bounds = array<i64: 1, 16, 18, 18>}, {pipeline_mode = #tpu.pipeline_mode<synchronous>, transform_indices = @transform_1, window_bounds = array<i64: 16, 9>}, {pipeline_mode = #tpu.pipeline_mode<synchronous>, transform_indices = @transform_2, window_bounds = array<i64: 16, 1>}, {pipeline_mode = #tpu.pipeline_mode<synchronous>, transform_indices = @transform_3, window_bounds = array<i64: 32, 16>}, {pipeline_mode = #tpu.pipeline_mode<synchronous>, transform_indices = @transform_4, window_bounds = array<i64: 32, 1>}, {transform_indices = @transform_5, window_bounds = array<i64: 1, 32, 256>}]} {
    %c0 = arith.constant 0 : index
    %c0_0 = arith.constant 0 : index
    %c0_1 = arith.constant 0 : index
    %c0_2 = arith.constant 0 : index
    %0 = vector.load %arg1[%c0, %c0_0, %c0_1, %c0_2] : memref<1x16x18x18xf32, #tpu.memory_space<vmem>>, vector<1x16x18x18xf32>
    %1 = vector.shape_cast %0 : vector<1x16x18x18xf32> to vector<16x18x18xf32>
    %cst = arith.constant 0.000000e+00 : f32
    %2 = vector.broadcast %cst : f32 to vector<16x16x16xf32>
    %3 = vector.extract_strided_slice %1 {offsets = [0, 0, 0], sizes = [16, 16, 16], strides = [1, 1, 1]} : vector<16x18x18xf32> to vector<16x16x16xf32>
    %c0_3 = arith.constant 0 : index
    %c0_4 = arith.constant 0 : index
    %4 = vector.load %arg2[%c0_3, %c0_4] : memref<16x9xf32, #tpu.memory_space<vmem>>, vector<16x1xf32>
    %5 = vector.shape_cast %4 : vector<16x1xf32> to vector<16x1x1xf32>
    %6 = vector.broadcast %5 : vector<16x1x1xf32> to vector<16x16x16xf32>
    %7 = arith.mulf %3, %6 : vector<16x16x16xf32>
    %8 = arith.addf %2, %7 : vector<16x16x16xf32>
    %9 = vector.extract_strided_slice %1 {offsets = [0, 0, 1], sizes = [16, 16, 16], strides = [1, 1, 1]} : vector<16x18x18xf32> to vector<16x16x16xf32>
    %c0_5 = arith.constant 0 : index
    %c1 = arith.constant 1 : index
    %10 = vector.load %arg2[%c0_5, %c1] : memref<16x9xf32, #tpu.memory_space<vmem>>, vector<16x1xf32>
    %11 = vector.shape_cast %10 : vector<16x1xf32> to vector<16x1x1xf32>
    %12 = vector.broadcast %11 : vector<16x1x1xf32> to vector<16x16x16xf32>
    %13 = arith.mulf %9, %12 : vector<16x16x16xf32>
    %14 = arith.addf %8, %13 : vector<16x16x16xf32>
    %15 = vector.extract_strided_slice %1 {offsets = [0, 0, 2], sizes = [16, 16, 16], strides = [1, 1, 1]} : vector<16x18x18xf32> to vector<16x16x16xf32>
    %c0_6 = arith.constant 0 : index
    %c2 = arith.constant 2 : index
    %16 = vector.load %arg2[%c0_6, %c2] : memref<16x9xf32, #tpu.memory_space<vmem>>, vector<16x1xf32>
    %17 = vector.shape_cast %16 : vector<16x1xf32> to vector<16x1x1xf32>
    %18 = vector.broadcast %17 : vector<16x1x1xf32> to vector<16x16x16xf32>
    %19 = arith.mulf %15, %18 : vector<16x16x16xf32>
    %20 = arith.addf %14, %19 : vector<16x16x16xf32>
    %21 = vector.extract_strided_slice %1 {offsets = [0, 1, 0], sizes = [16, 16, 16], strides = [1, 1, 1]} : vector<16x18x18xf32> to vector<16x16x16xf32>
    %c0_7 = arith.constant 0 : index
    %c3 = arith.constant 3 : index
    %22 = vector.load %arg2[%c0_7, %c3] : memref<16x9xf32, #tpu.memory_space<vmem>>, vector<16x1xf32>
    %23 = vector.shape_cast %22 : vector<16x1xf32> to vector<16x1x1xf32>
    %24 = vector.broadcast %23 : vector<16x1x1xf32> to vector<16x16x16xf32>
    %25 = arith.mulf %21, %24 : vector<16x16x16xf32>
    %26 = arith.addf %20, %25 : vector<16x16x16xf32>
    %27 = vector.extract_strided_slice %1 {offsets = [0, 1, 1], sizes = [16, 16, 16], strides = [1, 1, 1]} : vector<16x18x18xf32> to vector<16x16x16xf32>
    %c0_8 = arith.constant 0 : index
    %c4 = arith.constant 4 : index
    %28 = vector.load %arg2[%c0_8, %c4] : memref<16x9xf32, #tpu.memory_space<vmem>>, vector<16x1xf32>
    %29 = vector.shape_cast %28 : vector<16x1xf32> to vector<16x1x1xf32>
    %30 = vector.broadcast %29 : vector<16x1x1xf32> to vector<16x16x16xf32>
    %31 = arith.mulf %27, %30 : vector<16x16x16xf32>
    %32 = arith.addf %26, %31 : vector<16x16x16xf32>
    %33 = vector.extract_strided_slice %1 {offsets = [0, 1, 2], sizes = [16, 16, 16], strides = [1, 1, 1]} : vector<16x18x18xf32> to vector<16x16x16xf32>
    %c0_9 = arith.constant 0 : index
    %c5 = arith.constant 5 : index
    %34 = vector.load %arg2[%c0_9, %c5] : memref<16x9xf32, #tpu.memory_space<vmem>>, vector<16x1xf32>
    %35 = vector.shape_cast %34 : vector<16x1xf32> to vector<16x1x1xf32>
    %36 = vector.broadcast %35 : vector<16x1x1xf32> to vector<16x16x16xf32>
    %37 = arith.mulf %33, %36 : vector<16x16x16xf32>
    %38 = arith.addf %32, %37 : vector<16x16x16xf32>
    %39 = vector.extract_strided_slice %1 {offsets = [0, 2, 0], sizes = [16, 16, 16], strides = [1, 1, 1]} : vector<16x18x18xf32> to vector<16x16x16xf32>
    %c0_10 = arith.constant 0 : index
    %c6 = arith.constant 6 : index
    %40 = vector.load %arg2[%c0_10, %c6] : memref<16x9xf32, #tpu.memory_space<vmem>>, vector<16x1xf32>
    %41 = vector.shape_cast %40 : vector<16x1xf32> to vector<16x1x1xf32>
    %42 = vector.broadcast %41 : vector<16x1x1xf32> to vector<16x16x16xf32>
    %43 = arith.mulf %39, %42 : vector<16x16x16xf32>
    %44 = arith.addf %38, %43 : vector<16x16x16xf32>
    %45 = vector.extract_strided_slice %1 {offsets = [0, 2, 1], sizes = [16, 16, 16], strides = [1, 1, 1]} : vector<16x18x18xf32> to vector<16x16x16xf32>
    %c0_11 = arith.constant 0 : index
    %c7 = arith.constant 7 : index
    %46 = vector.load %arg2[%c0_11, %c7] : memref<16x9xf32, #tpu.memory_space<vmem>>, vector<16x1xf32>
    %47 = vector.shape_cast %46 : vector<16x1xf32> to vector<16x1x1xf32>
    %48 = vector.broadcast %47 : vector<16x1x1xf32> to vector<16x16x16xf32>
    %49 = arith.mulf %45, %48 : vector<16x16x16xf32>
    %50 = arith.addf %44, %49 : vector<16x16x16xf32>
    %51 = vector.extract_strided_slice %1 {offsets = [0, 2, 2], sizes = [16, 16, 16], strides = [1, 1, 1]} : vector<16x18x18xf32> to vector<16x16x16xf32>
    %c0_12 = arith.constant 0 : index
    %c8 = arith.constant 8 : index
    %52 = vector.load %arg2[%c0_12, %c8] : memref<16x9xf32, #tpu.memory_space<vmem>>, vector<16x1xf32>
    %53 = vector.shape_cast %52 : vector<16x1xf32> to vector<16x1x1xf32>
    %54 = vector.broadcast %53 : vector<16x1x1xf32> to vector<16x16x16xf32>
    %55 = arith.mulf %51, %54 : vector<16x16x16xf32>
    %56 = arith.addf %50, %55 : vector<16x16x16xf32>
    %57 = vector.shape_cast %56 : vector<16x16x16xf32> to vector<16x256xf32>
    %c0_13 = arith.constant 0 : index
    %c0_14 = arith.constant 0 : index
    %58 = vector.load %arg3[%c0_13, %c0_14] : memref<16x1xf32, #tpu.memory_space<vmem>>, vector<16x1xf32>
    %59 = vector.broadcast %58 : vector<16x1xf32> to vector<16x256xf32>
    %60 = arith.addf %57, %59 : vector<16x256xf32>
    %cst_15 = arith.constant dense<0.000000e+00> : vector<16xf32>
    %61 = vector.multi_reduction <add>, %60, %cst_15 [1] : vector<16x256xf32> to vector<16xf32>
    %62 = vector.shape_cast %61 : vector<16xf32> to vector<16x1xf32>
    %cst_16 = arith.constant 2.560000e+02 : f32
    %63 = vector.broadcast %cst_16 : f32 to vector<16x1xf32>
    %64 = arith.divf %62, %63 : vector<16x1xf32>
    %65 = vector.broadcast %64 : vector<16x1xf32> to vector<16x256xf32>
    %66 = arith.subf %60, %65 : vector<16x256xf32>
    %67 = arith.mulf %66, %66 : vector<16x256xf32>
    %cst_17 = arith.constant dense<0.000000e+00> : vector<16xf32>
    %68 = vector.multi_reduction <add>, %67, %cst_17 [1] : vector<16x256xf32> to vector<16xf32>
    %69 = vector.shape_cast %68 : vector<16xf32> to vector<16x1xf32>
    %cst_18 = arith.constant 2.560000e+02 : f32
    %70 = vector.broadcast %cst_18 : f32 to vector<16x1xf32>
    %71 = arith.divf %69, %70 : vector<16x1xf32>
    %72 = vector.broadcast %64 : vector<16x1xf32> to vector<16x256xf32>
    %73 = arith.subf %60, %72 : vector<16x256xf32>
    %cst_19 = arith.constant 9.99999974E-6 : f32
    %74 = vector.broadcast %cst_19 : f32 to vector<16x1xf32>
    %75 = arith.addf %71, %74 : vector<16x1xf32>
    %76 = math.rsqrt %75 : vector<16x1xf32>
    %77 = vector.broadcast %76 : vector<16x1xf32> to vector<16x256xf32>
    %78 = arith.mulf %73, %77 : vector<16x256xf32>
    %c0_20 = arith.constant 0 : index
    %c0_21 = arith.constant 0 : index
    %79 = vector.load %arg4[%c0_20, %c0_21] : memref<32x16xf32, #tpu.memory_space<vmem>>, vector<32x16xf32>
    %cst_22 = arith.constant dense<0.000000e+00> : vector<32x256xf32>
    %80 = tpu.matmul %79, %78, %cst_22 {dimension_numbers = #tpu.dot_dimension_numbers<[1], [0], [0], [1], [0, 0, 1, 1], [], []>} : vector<32x16xf32>, vector<16x256xf32>, vector<32x256xf32> -> vector<32x256xf32>
    %c0_23 = arith.constant 0 : index
    %c0_24 = arith.constant 0 : index
    %81 = vector.load %arg5[%c0_23, %c0_24] : memref<32x1xf32, #tpu.memory_space<vmem>>, vector<32x1xf32>
    %82 = vector.broadcast %81 : vector<32x1xf32> to vector<32x256xf32>
    %83 = arith.addf %80, %82 : vector<32x256xf32>
    %c0_25 = arith.constant 0 : index
    %c0_26 = arith.constant 0 : index
    %c0_27 = arith.constant 0 : index
    %84 = vector.load %arg6[%c0_25, %c0_26, %c0_27] : memref<1x32x256xf32, #tpu.memory_space<vmem>>, vector<1x32x256xf32>
    %85 = vector.shape_cast %84 : vector<1x32x256xf32> to vector<32x256xf32>
    %86 = vector.shape_cast %83 : vector<32x256xf32> to vector<1x32x256xf32>
    tpu.vector_store %arg6[%c0_25, %c0_26, %c0_27], %86 {strides = array<i32>} : memref<1x32x256xf32, #tpu.memory_space<vmem>>, vector<1x32x256xf32>,
    return
  }
  func.func @transform_0(%arg0: i32) -> (i32, i32, i32, i32) {
    %c0_i32 = arith.constant 0 : i32
    %c0_i32_0 = arith.constant 0 : i32
    %c0_i32_1 = arith.constant 0 : i32
    %c0_i32_2 = arith.constant 0 : i32
    return %arg0, %c0_i32, %c0_i32_0, %c0_i32_1 : i32, i32, i32, i32
  }
  func.func @transform_1(%arg0: i32) -> (i32, i32) {
    %c0_i32 = arith.constant 0 : i32
    %c0_i32_0 = arith.constant 0 : i32
    %c0_i32_1 = arith.constant 0 : i32
    return %c0_i32, %c0_i32_0 : i32, i32
  }
  func.func @transform_2(%arg0: i32) -> (i32, i32) {
    %c0_i32 = arith.constant 0 : i32
    %c0_i32_0 = arith.constant 0 : i32
    %c0_i32_1 = arith.constant 0 : i32
    return %c0_i32, %c0_i32_0 : i32, i32
  }
  func.func @transform_3(%arg0: i32) -> (i32, i32) {
    %c0_i32 = arith.constant 0 : i32
    %c0_i32_0 = arith.constant 0 : i32
    %c0_i32_1 = arith.constant 0 : i32
    return %c0_i32, %c0_i32_0 : i32, i32
  }
  func.func @transform_4(%arg0: i32) -> (i32, i32) {
    %c0_i32 = arith.constant 0 : i32
    %c0_i32_0 = arith.constant 0 : i32
    %c0_i32_1 = arith.constant 0 : i32
    return %c0_i32, %c0_i32_0 : i32, i32
  }
  func.func @transform_5(%arg0: i32) -> (i32, i32, i32) {
    %c0_i32 = arith.constant 0 : i32
    %c0_i32_0 = arith.constant 0 : i32
    %c0_i32_1 = arith.constant 0 : i32
    return %arg0, %c0_i32, %c0_i32_0 : i32, i32, i32
  }
}

</mosaic_0001>

<bundles_post_ra>
// kernel: separable_conv2d.1
= control target key start
LH: loop header
LB: loop body
LE: loop exit
PB: predicated region body
PF: predicated region fallthrough
CT: control target
= control target key end

     0   :  { %s5648_s18 = smov 0   ;;  %s9346_s0 = inlined_call_operand.vmem [shape: f32[2,16,18,18], index: 0, kind: input, shape index: {}]   ;;  %s9347_s1 = inlined_call_operand.vmem [shape: f32[16,9], index: 1, kind: input, shape index: {}]   ;;  %s9348_s2 = inlined_call_operand.vmem [shape: f32[16,1], index: 2, kind: input, shape index: {}]   ;;  %s9349_s3 = inlined_call_operand.vmem [shape: f32[32,16], index: 3, kind: input, shape index: {}]   ;;  %s9350_s4 = inlined_call_operand.vmem [shape: f32[32,1], index: 4, kind: input, shape index: {}]   ;;  %s9351_s5 = inlined_call_operand.vmem [shape: f32[2,32,256], index: 5, kind: output, shape index: {}]  }
   0x1 LB: > { %s5421_s19 = sadd.s32 4294967295, %s5594_s18   ;;  %p5425_p0 = scmp.ge.s32.totalorder %s5594_s18, 1  ;;  %s5594_s18 = sphi %s5648_s18, %s15_s18  }
   0x2   : > { %p187_p1 = scmp.lt.s32.totalorder %s5594_s18, 3 }
   0x4   : > { %p188_p2 = pnand %p5425_p0, %p187_p1 }
   0x6   : > { %191 = sbr.rel (%p188_p2) target bundleno = 1823 (0x71f), region = 40 }
   0xb   : > { %v281_v0 = vlaneseq  ;;  %v9352_v1 = vmov 0   ;;  %v5597_v2 = vmov 1966171168   ;;  %v5598_v4 = vmov 1   ;;  %v273_v5 = vld [vmem:[%s9347_s1] sm:$0xff]  ;;  %v274_v9 = vld [vmem:[%s9347_s1 + $0x8] sm:$0xff] }
   0xc   : > { %5471 = vset.pattern.permute.xlu1 %v9352_v1  ;;  %v279_v3 = vunpack.c.l.s4 %v5597_v2  ;;  %5472 = vset.pattern.permute.xlu0 %v5598_v4  ;;  %v277_v8 = vcombine.high %v273_v5, %v273_v5  ;;  %v326_v28 = vcombine.high %v274_v9, %v274_v9  ;;  %v5599_v42 = vmov 2   ;;  %p215_p3 = scmp.lt.s32.totalorder %s5421_s19, 1  ;;  %s5600_s28 = smov 127  }
   0xd   : > { %v5660_v6 = vshrl.u32 %v281_v0, 7  ;;  %s5601_s29 = smov 126   ;;  %vm1737_vm0 = vcmask 1046528   ;;  %vm3276_vm1 = vcmask 1045504   ;;  %s5610_s13 = smov 16   ;;  %vm5145_vm2 = vcmask 130048  }
   0xe   : > { %v280_v7 = vunpack.c.0.s8 %v279_v3  ;;  %s10313_s19 = smov (!%p215_p3, %s5421_s19), 1  ;;  %s5611_s14 = smov 32   ;;  %vm5148_vm3 = vcmask 261120   ;;  %vm5151_vm4 = vcmask 392192   ;;  %vm5154_vm5 = vcmask 523264  }
   0xf   : > { %9517 = vst [vmem:[#allocation2_spill] sm:$0xff] %v5660_v6  ;;  %v5673_v15 = vsub.s32 0, %v5660_v6  ;;  %s5440_s24 = smul.u32 384, %s10313_s19  ;;  %s5612_s15 = smov 48   ;;  %vm5157_vm6 = vcmask 654336   ;;  %vm5160_vm7 = vcmask 785408  }
  0x10   : > { %v5666_v10 = vsub.s32 %v280_v7, %v5660_v6  ;;  %s5613_s16 = smov 64   ;;  %s5614_s21 = smov 80   ;;  %vm5163_vm8 = vcmask 916480  }
  0x11   : > { %s5772_s27 = scalar_lea.vmem %s9346_s0, %s5440_s24  ;;  %s5615_s24 = smov 96  }
  0x12   : > { %v284_v11 = vrot.slane %v273_v5, %v5666_v10  ;;  %v291_v12 = vrot.slane %v277_v8, %v5666_v10  ;;  %v333_v13 = vrot.slane %v274_v9, %v5666_v10  ;;  %v340_v31 = vrot.slane %v326_v28, %v5666_v10  ;;  %v5775_v54 = vld [vmem:[%s5772_s27] sm:$0xff]  ;;  %v5778_v55 = vld [vmem:[%s5772_s27 + $0x8] sm:$0xff]  ;;  %s5616_s25 = smov 112   ;;  %s5435_s17 = sshll.u32 %s10313_s19, 6 }
  0x13   : > { %v5801_v7 = vld [vmem:[%s5772_s27 + $0x60] sm:$0xff]  ;;  %v5804_v8 = vld [vmem:[%s5772_s27 + $0x68] sm:$0xff]  ;;  %s224_s22 = scalar_lea.vmem %s9351_s5, %s5435_s17 }
  0x14   : > { %v300_v14 = vrot.slane %v284_v11, %v5666_v10  ;;  %v292_v16 = vcombine.high %v284_v11, %v284_v11  ;;  %v293_v17 = vcombine.high %v291_v12, %v291_v12  ;;  %v341_v20 = vcombine.high %v333_v13, %v333_v13  ;;  %v5941_v6 = vld [vmem:[%s5772_s27 + $0x168] sm:$0xff] }
  0x15   : > { %v342_v34 = vcombine.high %v340_v31, %v340_v31  ;;  %v1023_v41 = vrot.slane %v291_v12, %v5666_v10  ;;  %v643_v46 = vrot.slane %v333_v13, %v5666_v10  ;;  %v650_v50 = vrot.slane %v340_v31, %v5666_v10 }
  0x16   : > { %v322_v18 = vcombine.high %v300_v14, %v300_v14  ;;  %v321_v19 = vrot.slane %v293_v17, %v5666_v10  ;;  %v314_v21 = vrot.slane %v292_v16, %v5666_v10  ;;  %v5678_v22 = vrot.slane %v300_v14, %v5673_v15  ;;  %v5811_v14 = vld [vmem:[%s5772_s27 + $0xc0] sm:$0xff]  ;;  %v5814_v16 = vld [vmem:[%s5772_s27 + $0xc8] sm:$0xff] }
  0x17   : > { %v363_v25 = vrot.slane %v341_v20, %v5666_v10  ;;  %v370_v36 = vrot.slane %v342_v34, %v5666_v10  ;;  %v5729_v43 = vrot.slane %v1023_v41, %v5673_v15  ;;  %v1039_v44 = vcombine.high %v1023_v41, %v1023_v41  ;;  %v5832_v34 = vld [vmem:[%s5772_s27 + $0x20] sm:$0xff] }
  0x18   : > { %v5681_v23 = vrot.slane %v322_v18, %v5673_v15  ;;  %734 = vperm.xlu0 %5472, %v5678_v22   ;;  %v5686_v24 = vrot.slane %v321_v19, %v5673_v15  ;;  %v324_v26 = vcombine.high %v314_v21, %v314_v21  ;;  %v325_v30 = vcombine.high %v321_v19, %v321_v19 }
  0x19   : > { %v5692_v27 = vrot.slane %v363_v25, %v5673_v15  ;;  %v373_v33 = vcombine.high %v363_v25, %v363_v25  ;;  %v5714_v37 = vrot.slane %v370_v36, %v5673_v15  ;;  %v374_v38 = vcombine.high %v370_v36, %v370_v36  ;;  %v5821_v25 = vld [vmem:[%s5772_s27 + $0x120] sm:$0xff] }
  0x1a   : > { %448 = vperm.xlu1 %5471, %v5681_v23   ;;  %v5695_v29 = vrot.slane %v324_v26, %v5673_v15  ;;  %v5701_v32 = vrot.slane %v325_v30, %v5673_v15  ;;  %v5724_v40 = vrot.slane %v314_v21, %v5673_v15  ;;  %v5734_v45 = vrot.slane %v1039_v44, %v5673_v15  ;;  %v5824_v26 = vld [vmem:[%s5772_s27 + $0x128] sm:$0xff]  ;;  %v5844_v44 = vld [vmem:[%s5772_s27 + $0x38] sm:$0xff] }
  0x1b   : > { %v5708_v35 = vrot.slane %v373_v33, %v5673_v15  ;;  %v5719_v39 = vrot.slane %v374_v38, %v5673_v15  ;;  %v5742_v47 = vrot.slane %v643_v46, %v5673_v15  ;;  %v665_v48 = vcombine.high %v643_v46, %v643_v46  ;;  %v5829_v33 = vld [vmem:[%s5772_s27 + $0x18] sm:$0xff] }
  0x1c   : > { %754 = vperm.xlu0 %5472, %v5686_v24   ;;  %v5751_v51 = vrot.slane %v650_v50, %v5673_v15  ;;  %v666_v52 = vcombine.high %v650_v50, %v650_v50 }
  0x1d   : > { %9518 = vst [vmem:[#allocation3_spill] sm:$0xff] %v5742_v47  ;;  %v5746_v49 = vrot.slane %v665_v48, %v5673_v15 }
  0x1e   : > { %460 = vperm.xlu1 %5471, %v5686_v24   ;;  %9520 = vst [vmem:[#allocation5_spill] sm:$0xff] %v5751_v51  ;;  %v5755_v53 = vrot.slane %v666_v52, %v5673_v15  ;;  %v5851_v52 = vld [vmem:[%s5772_s27 + $0x78] sm:$0xff] }
  0x1f   : > { %9519 = vst [vmem:[#allocation4_spill] sm:$0xff] %v5746_v49 }
  0x20   : > { %746 = vperm.xlu0 %5472, %v5695_v29   ;;  %9521 = vst [vmem:[#allocation6_spill] sm:$0xff] %v5755_v53 }
  0x22   : > { %476 = vperm.xlu1 %5471, %v5692_v27  }
  0x24   : > { %762 = vperm.xlu0 %5472, %v5701_v32  }
  0x26   : > { %452 = vperm.xlu1 %5471, %v5695_v29  }
  0x28   : > { %770 = vperm.xlu0 %5472, %v5692_v27  }
  0x2a   : > { %468 = vperm.xlu1 %5471, %v5701_v32  }
  0x2c   : > { %778 = vperm.xlu0 %5472, %v5708_v35  }
  0x2e   : > { %484 = vperm.xlu1 %5471, %v5708_v35  }
  0x30   : > { %786 = vperm.xlu0 %5472, %v5714_v37  }
  0x32   : > { %492 = vperm.xlu1 %5471, %v5714_v37  }
  0x34   : > { %794 = vperm.xlu0 %5472, %v5719_v39  }
  0x36   : > { %500 = vperm.xlu1 %5471, %v5719_v39  }
  0x38   : > { %5475 = vset.pattern.permute.xlu0 %v5599_v42 }
  0x39   : > { %1160 = vperm.xlu0 %5475, %v5724_v40  }
  0x3a   : > { %5473 = vset.pattern.permute.xlu1 %v5598_v4 }
  0x3b   : > { %738 = vperm.xlu1 %5473, %v5724_v40  }
  0x3d   : > { %1172 = vperm.xlu0 %5475, %v5729_v43  }
  0x3f   : > { %742 = vperm.xlu1 %5473, %v5681_v23  }
  0x41   : > { %1180 = vperm.xlu0 %5475, %v5734_v45  }
  0x43   : > { %750 = vperm.xlu1 %5473, %v5729_v43  }
  0x47   : > { %758 = vperm.xlu1 %5473, %v5734_v45  }
  0x4b   : > { %766 = vperm.xlu1 %5473, %v5742_v47  }
  0x4f   : > { %774 = vperm.xlu1 %5473, %v5746_v49  }
  0x53   : > { %782 = vperm.xlu1 %5473, %v5751_v51  }
  0x57   : > { %790 = vperm.xlu1 %5473, %v5755_v53  }
  0x5b   : > { %5474 = vset.pattern.permute.xlu1 %v5599_v42  ;;  %v5841_v42 = vld [vmem:[%s5772_s27 + $0x30] sm:$0xff] }
  0x5c   : > { %1156 = vperm.xlu1 %5474, %v5678_v22  }
  0x60   : > { %1164 = vperm.xlu1 %5474, %v5681_v23  }
  0x64   : > { %1168 = vperm.xlu1 %5474, %v5695_v29  }
  0x68   : > { %1176 = vperm.xlu1 %5474, %v5686_v24  }
  0x93   : > { %v735_v56 = vpop.permute.xlu0 %734 }
  0x94   : > { %v797_v58 = vmul.f32 %v735_v56, %v5775_v54  ;;  %v798_v59 = vmul.f32 %v735_v56, %v5778_v55  ;;  %v5854_v56 = vld [vmem:[%s5772_s27 + $0x80] sm:$0xff] }
  0x95   : > { %v5780_v57 = vpop.permute.xlu1 %448 }
  0x96   : > { %9522 = vst [vmem:[#allocation7_spill] sm:$0xff] %v5780_v57  ;;  %863 = vrot.lane.b32.xlu0 %v798_v59, %s5600_s28  ;;  %861 = vrot.lane.b32.xlu1 %v797_v58, %s5600_s28 }
  0x97   : > { %v755_v21 = vpop.permute.xlu0 %754 }
  0x98   : > { %v807_v58 = vmul.f32 %v755_v21, %v5851_v52  ;;  %v808_v59 = vmul.f32 %v755_v21, %v5854_v56 }
  0x99   : > { %v5786_v60 = vpop.permute.xlu1 %460 }
  0x9a   : > { %9523 = vst [vmem:[#allocation8_spill] sm:$0xff] %v5786_v60 }
  0x9b   : > { %v747_v36 = vpop.permute.xlu0 %746 }
  0x9d   : > { %v5788_v61 = vpop.permute.xlu1 %476 }
  0x9e   : > { %9524 = vst [vmem:[#allocation9_spill] sm:$0xff] %v5788_v61 }
  0x9f   : > { %v763_v50 = vpop.permute.xlu0 %762 }
  0xa1   : > { %v5790_v62 = vpop.permute.xlu1 %452 }
  0xa2   : > { %9525 = vst [vmem:[#allocation10_spill] sm:$0xff] %v5790_v62 }
  0xa5   : > { %v5792_v63 = vpop.permute.xlu1 %468 }
  0xa6   : > { %9526 = vst [vmem:[#allocation11_spill] sm:$0xff] %v5792_v63 }
  0xa9   : > { %v5794_v0 = vpop.permute.xlu1 %484 }
  0xaa   : > { %9527 = vst [vmem:[#allocation12_spill] sm:$0xff] %v5794_v0 }
  0xad   : > { %v5796_v2 = vpop.permute.xlu1 %492 }
  0xae   : > { %9528 = vst [vmem:[#allocation13_spill] sm:$0xff] %v5796_v2 }
  0xb1   : > { %v5798_v3 = vpop.permute.xlu1 %500 }
  0xb2   : > { %9529 = vst [vmem:[#allocation14_spill] sm:$0xff] %v5798_v3  ;;  %v5960_v3 = vld [vmem:[%s5772_s27 + $0x170] sm:$0xff] }
  0xb6   : > { %v739_v4 = vpop.permute.xlu1 %738 }
  0xb7   : > { %v799_v38 = vmul.f32 %v739_v4, %v5829_v33  ;;  %v800_v41 = vmul.f32 %v739_v4, %v5832_v34  ;;  %v5859_v4 = vld [vmem:[%s5772_s27 + $0x90] sm:$0xff] }
  0xba   : > { %v743_v5 = vpop.permute.xlu1 %742 }
  0xbb   : > { %v801_v46 = vmul.f32 %v743_v5, %v5841_v42  ;;  %v802_v48 = vmul.f32 %v743_v5, %v5844_v44  ;;  %v5862_v5 = vld [vmem:[%s5772_s27 + $0x98] sm:$0xff] }
  0xbe   : > { %v751_v9 = vpop.permute.xlu1 %750 }
  0xbf   : > { %v805_v11 = vmul.f32 %v751_v9, %v5801_v7  ;;  %v806_v12 = vmul.f32 %v751_v9, %v5804_v8  ;;  %v771_v9 = vpop.permute.xlu0 %770 }
  0xc1   : > { %879 = vrot.lane.b32.xlu0 %v806_v12, %s5600_s28  ;;  %877 = vrot.lane.b32.xlu1 %v805_v11, %s5600_s28 }
  0xc2   : > { %v759_v13 = vpop.permute.xlu1 %758 }
  0xc3   : > { %v809_v11 = vmul.f32 %v759_v13, %v5859_v4  ;;  %v810_v12 = vmul.f32 %v759_v13, %v5862_v5  ;;  %v5882_v13 = vld [vmem:[%s5772_s27 + $0xf8] sm:$0xff] }
  0xc6   : > { %v767_v17 = vpop.permute.xlu1 %766 }
  0xc7   : > { %v813_v18 = vmul.f32 %v767_v17, %v5811_v14  ;;  %v814_v19 = vmul.f32 %v767_v17, %v5814_v16  ;;  %v5871_v17 = vld [vmem:[%s5772_s27 + $0xd8] sm:$0xff] }
  0xc9   : > { %895 = vrot.lane.b32.xlu0 %v814_v19, %s5600_s28  ;;  %893 = vrot.lane.b32.xlu1 %v813_v18, %s5600_s28  ;;  %v5874_v18 = vld [vmem:[%s5772_s27 + $0xe0] sm:$0xff]  ;;  %v815_v19 = vmul.f32 %v771_v9, %v5871_v17 }
  0xca   : > { %v775_v20 = vpop.permute.xlu1 %774  ;;  %v816_v21 = vmul.f32 %v771_v9, %v5874_v18 }
  0xce   : > { %v783_v28 = vpop.permute.xlu1 %782 }
  0xcf   : > { %v821_v30 = vmul.f32 %v783_v28, %v5821_v25  ;;  %v822_v31 = vmul.f32 %v783_v28, %v5824_v26  ;;  %v779_v28 = vpop.permute.xlu0 %778 }
  0xd1   : > { %911 = vrot.lane.b32.xlu0 %v822_v31, %s5600_s28  ;;  %909 = vrot.lane.b32.xlu1 %v821_v30, %s5600_s28  ;;  %v5879_v30 = vld [vmem:[%s5772_s27 + $0xf0] sm:$0xff] }
  0xd2   : > { %v817_v31 = vmul.f32 %v775_v20, %v5879_v30  ;;  %v791_v9 = vpop.permute.xlu1 %790 }
  0xd5   : > { %867 = vrot.lane.b32.xlu0 %v800_v41, %s5600_s28  ;;  %865 = vrot.lane.b32.xlu1 %v799_v38, %s5600_s28  ;;  %v818_v38 = vmul.f32 %v775_v20, %v5882_v13  ;;  %v5891_v41 = vld [vmem:[%s5772_s27 + $0x138] sm:$0xff] }
  0xd6   : > { %v5902_v20 = vld [vmem:[%s5772_s27 + $0x158] sm:$0xff] }
  0xd9   : > { %871 = vrot.lane.b32.xlu0 %v802_v48, %s5600_s28  ;;  %869 = vrot.lane.b32.xlu1 %v801_v46, %s5600_s28  ;;  %v5894_v46 = vld [vmem:[%s5772_s27 + $0x140] sm:$0xff]  ;;  %v787_v48 = vpop.permute.xlu0 %786 }
  0xdd   : > { %883 = vrot.lane.b32.xlu0 %v808_v59, %s5600_s28  ;;  %881 = vrot.lane.b32.xlu1 %v807_v58, %s5600_s28  ;;  %v823_v58 = vmul.f32 %v787_v48, %v5891_v41  ;;  %v824_v59 = vmul.f32 %v787_v48, %v5894_v46  ;;  %v795_v1 = vpop.permute.xlu0 %794 }
  0xde   : > { %v828_v2 = vmul.f32 %v795_v1, %v5960_v3 }
  0xe1   : > { %887 = vrot.lane.b32.xlu0 %v810_v12, %s5600_s28  ;;  %885 = vrot.lane.b32.xlu1 %v809_v11, %s5600_s28  ;;  %v5899_v11 = vld [vmem:[%s5772_s27 + $0x150] sm:$0xff] }
  0xe2   : > { %v825_v12 = vmul.f32 %v791_v9, %v5899_v11 }
  0xe5   : > { %899 = vrot.lane.b32.xlu0 %v816_v21, %s5600_s28  ;;  %897 = vrot.lane.b32.xlu1 %v815_v19, %s5600_s28  ;;  %v826_v19 = vmul.f32 %v791_v9, %v5902_v20  ;;  %v5911_v21 = vld [vmem:[%s5772_s27 + $0x48] sm:$0xff] }
  0xe9   : > { %903 = vrot.lane.b32.xlu0 %v818_v38, %s5600_s28  ;;  %901 = vrot.lane.b32.xlu1 %v817_v31, %s5600_s28  ;;  %v5914_v31 = vld [vmem:[%s5772_s27 + $0x50] sm:$0xff]  ;;  %v803_v38 = vmul.f32 %v747_v36, %v5911_v21 }
  0xea   : > { %v804_v48 = vmul.f32 %v747_v36, %v5914_v31  ;;  %v5934_v36 = vld [vmem:[%s5772_s27 + $0x110] sm:$0xff] }
  0xed   : > { %915 = vrot.lane.b32.xlu0 %v824_v59, %s5600_s28  ;;  %913 = vrot.lane.b32.xlu1 %v823_v58, %s5600_s28  ;;  %v5921_v58 = vld [vmem:[%s5772_s27 + $0xa8] sm:$0xff]  ;;  %v5924_v59 = vld [vmem:[%s5772_s27 + $0xb0] sm:$0xff] }
  0xee   : > { %v811_v9 = vmul.f32 %v763_v50, %v5921_v58 }
  0xf1   : > { %919 = vrot.lane.b32.xlu0 %v826_v19, %s5600_s28  ;;  %917 = vrot.lane.b32.xlu1 %v825_v12, %s5600_s28  ;;  %v812_v12 = vmul.f32 %v763_v50, %v5924_v59  ;;  %v5931_v19 = vld [vmem:[%s5772_s27 + $0x108] sm:$0xff]  ;;  %v827_v50 = vmul.f32 %v795_v1, %v5941_v6 }
  0xf5   : > { %875 = vrot.lane.b32.xlu0 %v804_v48, %s5600_s28  ;;  %873 = vrot.lane.b32.xlu1 %v803_v38, %s5600_s28  ;;  %v819_v48 = vmul.f32 %v779_v28, %v5931_v19  ;;  %v820_v38 = vmul.f32 %v779_v28, %v5934_v36  ;;  %v1157_v28 = vpop.permute.xlu1 %1156 }
  0xf9   : > { %891 = vrot.lane.b32.xlu0 %v812_v12, %s5600_s28  ;;  %889 = vrot.lane.b32.xlu1 %v811_v9, %s5600_s28  ;;  %v1219_v9 = vmul.f32 %v1157_v28, %v5775_v54  ;;  %v1161_v12 = vpop.permute.xlu0 %1160 }
  0xfa   : > { %v1222_v0 = vmul.f32 %v1161_v12, %v5832_v34 }
  0xfd   : > { %907 = vrot.lane.b32.xlu0 %v820_v38, %s5600_s28  ;;  %905 = vrot.lane.b32.xlu1 %v819_v48, %s5600_s28  ;;  %v1221_v48 = vmul.f32 %v1161_v12, %v5829_v33  ;;  %v1165_v38 = vpop.permute.xlu1 %1164 }
  0xfe   : > { %v1224_v62 = vmul.f32 %v1165_v38, %v5844_v44 }
 0x101   : > { %1188 = vperm.xlu0 %5475, %v5742_v47   ;;  %921 = vrot.lane.b32.xlu1 %v827_v50, %s5600_s28  ;;  %v1220_v50 = vmul.f32 %v1157_v28, %v5778_v55  ;;  %v1169_v63 = vpop.permute.xlu1 %1168 }
 0x102   : > { %v1225_v28 = vmul.f32 %v1169_v63, %v5911_v21  ;;  %v1226_v12 = vmul.f32 %v1169_v63, %v5914_v31 }
 0x105   : > { %1196 = vperm.xlu0 %5475, %v5746_v49   ;;  %1184 = vperm.xlu1 %5474, %v5701_v32  }
 0x109   : > { %1204 = vperm.xlu0 %5475, %v5751_v51   ;;  %1192 = vperm.xlu1 %5474, %v5692_v27  }
 0x10d   : > { %1212 = vperm.xlu0 %5475, %v5755_v53   ;;  %1200 = vperm.xlu1 %5474, %v5708_v35  }
 0x111   : > { %1283 = vrot.lane.b32.xlu0 %v1219_v9, %s5601_s29  ;;  %1208 = vperm.xlu1 %5474, %v5714_v37   ;;  %v1223_v9 = vmul.f32 %v1165_v38, %v5841_v42 }
 0x115   : > { %1287 = vrot.lane.b32.xlu0 %v1221_v48, %s5601_s29  ;;  %1216 = vperm.xlu1 %5474, %v5719_v39   ;;  %v1173_v48 = vpop.permute.xlu0 %1172 }
 0x116   : > { %v1227_v1 = vmul.f32 %v1173_v48, %v5801_v7 }
 0x119   : > { %923 = vrot.lane.b32.xlu0 %v828_v2, %s5600_s28  ;;  %1285 = vrot.lane.b32.xlu1 %v1220_v50, %s5601_s29  ;;  %v1177_v2 = vpop.permute.xlu1 %1176  ;;  %v1228_v50 = vmul.f32 %v1173_v48, %v5804_v8 }
 0x11a   : > { %v1229_v38 = vmul.f32 %v1177_v2, %v5851_v52  ;;  %v1230_v63 = vmul.f32 %v1177_v2, %v5854_v56 }
 0x11d   : > { %1289 = vrot.lane.b32.xlu1 %v1222_v0, %s5601_s29  ;;  %1291 = vrot.lane.b32.xlu0 %v1223_v9, %s5601_s29  ;;  %v5602_v0 = vmov 3   ;;  %v1181_v9 = vpop.permute.xlu0 %1180  ;;  %v5989_v48 = vpop.permute.xlu1 %861 }
 0x11e   : > { %5476 = vset.pattern.permute.xlu0 %v5602_v0  ;;  %5477 = vset.pattern.permute.xlu1 %v5602_v0  ;;  %v1231_v61 = vmul.f32 %v1181_v9, %v5859_v4  ;;  %9531 = vst [vmem:[#allocation16_spill] sm:$0xff] %v5989_v48 }
 0x121   : > { %1293 = vrot.lane.b32.xlu1 %v1224_v62, %s5601_s29  ;;  %1295 = vrot.lane.b32.xlu0 %v1225_v28, %s5601_s29  ;;  %v1232_v62 = vmul.f32 %v1181_v9, %v5862_v5  ;;  %v5987_v28 = vpop.permute.xlu0 %863 }
 0x122   : > { %9530 = vst [vmem:[#allocation15_spill] sm:$0xff] %v5987_v28 }
 0x125   : > { %1297 = vrot.lane.b32.xlu1 %v1226_v12, %s5601_s29  ;;  %1299 = vrot.lane.b32.xlu0 %v1227_v1, %s5601_s29 }
 0x129   : > { %1301 = vrot.lane.b32.xlu1 %v1228_v50, %s5601_s29  ;;  %1303 = vrot.lane.b32.xlu0 %v1229_v38, %s5601_s29 }
 0x12d   : > { %1305 = vrot.lane.b32.xlu1 %v1230_v63, %s5601_s29  ;;  %1307 = vrot.lane.b32.xlu0 %v1231_v61, %s5601_s29 }
 0x131   : > { %1309 = vrot.lane.b32.xlu1 %v1232_v62, %s5601_s29 }
 0x133   : > { %v5991_v1 = vpop.permute.xlu0 %879  ;;  %v5993_v12 = vpop.permute.xlu1 %877 }
 0x134   : > { %9532 = vst [vmem:[#allocation17_spill] sm:$0xff] %v5991_v1  ;;  %9533 = vst [vmem:[#allocation18_spill] sm:$0xff] %v5993_v12 }
 0x13b   : > { %v5995_v2 = vpop.permute.xlu0 %895  ;;  %v5997_v50 = vpop.permute.xlu1 %893 }
 0x13c   : > { %9534 = vst [vmem:[#allocation19_spill] sm:$0xff] %v5995_v2  ;;  %9535 = vst [vmem:[#allocation20_spill] sm:$0xff] %v5997_v50 }
 0x143   : > { %v5999_v38 = vpop.permute.xlu0 %911  ;;  %v6001_v0 = vpop.permute.xlu1 %909 }
 0x144   : > { %9536 = vst [vmem:[#allocation21_spill] sm:$0xff] %v5999_v38  ;;  %9537 = vst [vmem:[#allocation22_spill] sm:$0xff] %v6001_v0 }
 0x147   : > { %v6003_v9 = vpop.permute.xlu0 %867  ;;  %v6005_v61 = vpop.permute.xlu1 %865 }
 0x148   : > { %9538 = vst [vmem:[#allocation23_spill] sm:$0xff] %v6003_v9  ;;  %9539 = vst [vmem:[#allocation24_spill] sm:$0xff] %v6005_v61 }
 0x14b   : > { %v6007_v63 = vpop.permute.xlu0 %871  ;;  %v6009_v62 = vpop.permute.xlu1 %869 }
 0x14c   : > { %9540 = vst [vmem:[#allocation25_spill] sm:$0xff] %v6007_v63  ;;  %9541 = vst [vmem:[#allocation26_spill] sm:$0xff] %v6009_v62 }
 0x14f   : > { %v6011_v28 = vpop.permute.xlu0 %883  ;;  %v6013_v1 = vpop.permute.xlu1 %881 }
 0x150   : > { %9542 = vst [vmem:[#allocation27_spill] sm:$0xff] %v6011_v28  ;;  %9543 = vst [vmem:[#allocation28_spill] sm:$0xff] %v6013_v1 }
 0x153   : > { %v6015_v12 = vpop.permute.xlu1 %885  ;;  %v6017_v2 = vpop.permute.xlu0 %887 }
 0x154   : > { %9544 = vst [vmem:[#allocation29_spill] sm:$0xff] %v6015_v12  ;;  %9545 = vst [vmem:[#allocation30_spill] sm:$0xff] %v6017_v2 }
 0x157   : > { %v6019_v50 = vpop.permute.xlu1 %897  ;;  %v6021_v38 = vpop.permute.xlu0 %899 }
 0x158   : > { %9546 = vst [vmem:[#allocation31_spill] sm:$0xff] %v6019_v50  ;;  %9547 = vst [vmem:[#allocation32_spill] sm:$0xff] %v6021_v38 }
 0x15b   : > { %v6023_v0 = vpop.permute.xlu1 %901  ;;  %v6027_v61 = vpop.permute.xlu0 %903 }
 0x15c   : > { %9548 = vst [vmem:[#allocation33_spill] sm:$0xff] %v6023_v0  ;;  %9550 = vst [vmem:[#allocation35_spill] sm:$0xff] %v6027_v61 }
 0x15f   : > { %v6025_v9 = vpop.permute.xlu1 %913  ;;  %v6031_v62 = vpop.permute.xlu0 %915 }
 0x160   : > { %9549 = vst [vmem:[#allocation34_spill] sm:$0xff] %v6025_v9  ;;  %9552 = vst [vmem:[#allocation37_spill] sm:$0xff] %v6031_v62 }
 0x163   : > { %v6029_v48 = vpop.permute.xlu1 %917  ;;  %v6035_v1 = vpop.permute.xlu0 %919 }
 0x164   : > { %9551 = vst [vmem:[#allocation36_spill] sm:$0xff] %v6029_v48  ;;  %9554 = vst [vmem:[#allocation39_spill] sm:$0xff] %v6035_v1 }
 0x167   : > { %v6033_v28 = vpop.permute.xlu1 %873  ;;  %v6039_v2 = vpop.permute.xlu0 %875 }
 0x168   : > { %9553 = vst [vmem:[#allocation38_spill] sm:$0xff] %v6033_v28  ;;  %9556 = vst [vmem:[#allocation41_spill] sm:$0xff] %v6039_v2 }
 0x16b   : > { %v6037_v12 = vpop.permute.xlu1 %889  ;;  %v6043_v38 = vpop.permute.xlu0 %891 }
 0x16c   : > { %9555 = vst [vmem:[#allocation40_spill] sm:$0xff] %v6037_v12  ;;  %9558 = vst [vmem:[#allocation43_spill] sm:$0xff] %v6043_v38 }
 0x16f   : > { %v6041_v50 = vpop.permute.xlu1 %905  ;;  %v6047_v9 = vpop.permute.xlu0 %907 }
 0x170   : > { %9557 = vst [vmem:[#allocation42_spill] sm:$0xff] %v6041_v50  ;;  %9560 = vst [vmem:[#allocation45_spill] sm:$0xff] %v6047_v9 }
 0x173   : > { %v6045_v0 = vpop.permute.xlu1 %921 }
 0x174   : > { %9559 = vst [vmem:[#allocation44_spill] sm:$0xff] %v6045_v0 }
 0x17c   : > { %v1189_v28 = vpop.permute.xlu0 %1188 }
 0x17d   : > { %v1235_v1 = vmul.f32 %v1189_v28, %v5811_v14  ;;  %v1236_v50 = vmul.f32 %v1189_v28, %v5814_v16 }
 0x180   : > { %v1185_v61 = vpop.permute.xlu1 %1184  ;;  %v1197_v38 = vpop.permute.xlu0 %1196 }
 0x181   : > { %v1233_v48 = vmul.f32 %v1185_v61, %v5921_v58  ;;  %v1234_v62 = vmul.f32 %v1185_v61, %v5924_v59  ;;  %v1240_v61 = vmul.f32 %v1197_v38, %v5882_v13 }
 0x183   : > { %1313 = vrot.lane.b32.xlu1 %v1234_v62, %s5601_s29  ;;  %1311 = vrot.lane.b32.xlu0 %v1233_v48, %s5601_s29  ;;  %v1239_v48 = vmul.f32 %v1197_v38, %v5879_v30 }
 0x184   : > { %v1193_v12 = vpop.permute.xlu1 %1192 }
 0x185   : > { %v1237_v0 = vmul.f32 %v1193_v12, %v5871_v17  ;;  %v1238_v9 = vmul.f32 %v1193_v12, %v5874_v18 }
 0x187   : > { %1317 = vrot.lane.b32.xlu1 %v1236_v50, %s5601_s29  ;;  %1315 = vrot.lane.b32.xlu0 %v1235_v1, %s5601_s29  ;;  %v1205_v50 = vpop.permute.xlu0 %1204 }
 0x188   : > { %v1201_v62 = vpop.permute.xlu1 %1200  ;;  %v1243_v12 = vmul.f32 %v1205_v50, %v5821_v25 }
 0x189   : > { %v1241_v28 = vmul.f32 %v1201_v62, %v5931_v19  ;;  %v1242_v1 = vmul.f32 %v1201_v62, %v5934_v36 }
 0x18b   : > { %1321 = vrot.lane.b32.xlu1 %v1238_v9, %s5601_s29  ;;  %1319 = vrot.lane.b32.xlu0 %v1237_v0, %s5601_s29  ;;  %v1244_v0 = vmul.f32 %v1205_v50, %v5824_v26 }
 0x18c   : > { %v1209_v9 = vpop.permute.xlu1 %1208 }
 0x18d   : > { %v1245_v38 = vmul.f32 %v1209_v9, %v5891_v41 }
 0x18f   : > { %1325 = vrot.lane.b32.xlu1 %v1240_v61, %s5601_s29  ;;  %1323 = vrot.lane.b32.xlu0 %v1239_v48, %s5601_s29  ;;  %v1246_v48 = vmul.f32 %v1209_v9, %v5894_v46  ;;  %v1213_v61 = vpop.permute.xlu0 %1212 }
 0x190   : > { %v1247_v62 = vmul.f32 %v1213_v61, %v5899_v11  ;;  %v1248_v25 = vmul.f32 %v1213_v61, %v5902_v20 }
 0x193   : > { %1329 = vrot.lane.b32.xlu1 %v1242_v1, %s5601_s29  ;;  %1327 = vrot.lane.b32.xlu0 %v1241_v28, %s5601_s29  ;;  %v1217_v28 = vpop.permute.xlu1 %1216  ;;  %v5603_v1 = vmov 4  }
 0x194   : > { %v1249_v26 = vmul.f32 %v1217_v28, %v5941_v6  ;;  %v1250_v41 = vmul.f32 %v1217_v28, %v5960_v3  ;;  %v1882_v6 = vld [vmem:[%s9347_s1] sm:$0xff] }
 0x197   : > { %1333 = vrot.lane.b32.xlu1 %v1244_v0, %s5601_s29  ;;  %1331 = vrot.lane.b32.xlu0 %v1243_v12, %s5601_s29 }
 0x19b   : > { %1337 = vrot.lane.b32.xlu1 %v1246_v48, %s5601_s29  ;;  %1335 = vrot.lane.b32.xlu0 %v1245_v38, %s5601_s29  ;;  %v6127_v48 = vpop.permute.xlu0 %1283 }
 0x19c   : > { %9561 = vst [vmem:[#allocation46_spill] sm:$0xff] %v6127_v48 }
 0x19f   : > { %1341 = vrot.lane.b32.xlu1 %v1248_v25, %s5601_s29  ;;  %1339 = vrot.lane.b32.xlu0 %v1247_v62, %s5601_s29 }
 0x1a3   : > { %1345 = vrot.lane.b32.xlu1 %v1250_v41, %s5601_s29  ;;  %1343 = vrot.lane.b32.xlu0 %v1249_v26, %s5601_s29  ;;  %v6139_v41 = vpop.permute.xlu0 %1287 }
 0x1a4   : > { %9562 = vst [vmem:[#allocation47_spill] sm:$0xff] %v6139_v41 }
 0x1a7   : > { %1582 = vperm.xlu1 %5477, %v5724_v40   ;;  %1578 = vperm.xlu0 %5476, %v5678_v22  }
 0x1ab   : > { %1586 = vperm.xlu1 %5477, %v5681_v23   ;;  %1590 = vperm.xlu0 %5476, %v5695_v29   ;;  %v1893_v23 = vrot.slane %v1882_v6, %v5666_v10  ;;  %v1886_v29 = vcombine.high %v1882_v6, %v1882_v6  ;;  %v6141_v6 = vpop.permute.xlu1 %1285 }
 0x1ac   : > { %9563 = vst [vmem:[#allocation48_spill] sm:$0xff] %v6141_v6 }
 0x1ad   : > { %v1909_v3 = vrot.slane %v1893_v23, %v5666_v10 }
 0x1af   : > { %1594 = vperm.xlu1 %5477, %v5729_v43   ;;  %1598 = vperm.xlu0 %5476, %v5686_v24   ;;  %v1901_v24 = vcombine.high %v1893_v23, %v1893_v23 }
 0x1b1   : > { %v1923_v46 = vrot.slane %v1901_v24, %v5666_v10 }
 0x1b3   : > { %1602 = vperm.xlu1 %5477, %v5734_v45   ;;  %1606 = vperm.xlu0 %5476, %v5701_v32   ;;  %v1900_v32 = vrot.slane %v1886_v29, %v5666_v10  ;;  %v6113_v20 = vrot.slane %v1923_v46, %v5673_v15  ;;  %v1933_v0 = vcombine.high %v1923_v46, %v1923_v46 }
 0x1b5   : > { %v1916_v11 = vrot.slane %v1900_v32, %v5666_v10  ;;  %v1902_v12 = vcombine.high %v1900_v32, %v1900_v32  ;;  %v6133_v25 = vrot.slane %v1933_v0, %v5673_v15  ;;  %v6164_v0 = vpop.permute.xlu1 %1289 }
 0x1b6   : > { %9565 = vst [vmem:[#allocation50_spill] sm:$0xff] %v6164_v0 }
 0x1b7   : > { %1610 = vperm.xlu1 %5477, %v5742_v47   ;;  %1614 = vperm.xlu0 %5476, %v5692_v27   ;;  %v1931_v27 = vcombine.high %v1909_v3, %v1909_v3  ;;  %v1932_v9 = vcombine.high %v1916_v11, %v1916_v11  ;;  %v1930_v61 = vrot.slane %v1902_v12, %v5666_v10  ;;  %v6162_v12 = vpop.permute.xlu0 %923  ;;  %v6294_v47 = vld [vmem:[%s5772_s27 + $0x40] sm:$0x3] }
 0x1b8   : > { %9564 = vst [vmem:[#allocation49_spill] sm:$0xff] %v6162_v12 }
 0x1b9   : > { %v6119_v50 = vrot.slane %v1931_v27, %v5673_v15  ;;  %v6136_v28 = vrot.slane %v1932_v9, %v5673_v15  ;;  %v6144_v23 = vrot.slane %v1930_v61, %v5673_v15 }
 0x1bb   : > { %1618 = vperm.xlu1 %5477, %v5746_v49   ;;  %1622 = vperm.xlu0 %5476, %v5708_v35   ;;  %v6110_v35 = vrot.slane %v1909_v3, %v5673_v15  ;;  %v1934_v3 = vcombine.high %v1930_v61, %v1930_v61 }
 0x1bf   : > { %1626 = vperm.xlu1 %5477, %v5751_v51   ;;  %1630 = vperm.xlu0 %5476, %v5714_v37   ;;  %v1883_v37 = vld [vmem:[%s9347_s1 + $0x8] sm:$0xff] }
 0x1c0   : > { %v1942_v38 = vrot.slane %v1883_v37, %v5666_v10  ;;  %v1935_v62 = vcombine.high %v1883_v37, %v1883_v37  ;;  %v6157_v37 = vrot.slane %v1934_v3, %v5673_v15  ;;  %v6176_v3 = vpop.permute.xlu1 %1293 }
 0x1c1   : > { %9567 = vst [vmem:[#allocation52_spill] sm:$0xff] %v6176_v3 }
 0x1c2   : > { %v1958_v26 = vrot.slane %v1942_v38, %v5666_v10  ;;  %v1950_v29 = vcombine.high %v1942_v38, %v1942_v38  ;;  %v1949_v24 = vrot.slane %v1935_v62, %v5666_v10 }
 0x1c3   : > { %1634 = vperm.xlu1 %5477, %v5755_v53   ;;  %1638 = vperm.xlu0 %5476, %v5719_v39   ;;  %v6122_v39 = vrot.slane %v1916_v11, %v5673_v15 }
 0x1c4   : > { %v6150_v32 = vrot.slane %v1958_v26, %v5673_v15  ;;  %v1980_v46 = vcombine.high %v1958_v26, %v1958_v26  ;;  %v1972_v27 = vrot.slane %v1950_v29, %v5666_v10  ;;  %v1965_v11 = vrot.slane %v1949_v24, %v5666_v10  ;;  %v6174_v29 = vpop.permute.xlu0 %1291  ;;  %v6194_v6 = vpop.permute.xlu1 %1297 }
 0x1c5   : > { %v1951_v26 = vcombine.high %v1949_v24, %v1949_v24  ;;  %9566 = vst [vmem:[#allocation51_spill] sm:$0xff] %v6174_v29  ;;  %9569 = vst [vmem:[#allocation54_spill] sm:$0xff] %v6194_v6  ;;  %v5604_v6 = vmov 5  }
 0x1c6   : > { %v6167_v9 = vrot.slane %v1972_v27, %v5673_v15  ;;  %v6170_v38 = vrot.slane %v1965_v11, %v5673_v15  ;;  %v1982_v61 = vcombine.high %v1972_v27, %v1972_v27  ;;  %v1981_v62 = vcombine.high %v1965_v11, %v1965_v11 }
 0x1c7   : > { %5478 = vset.pattern.permute.xlu1 %v5603_v1  ;;  %5479 = vset.pattern.permute.xlu0 %v5603_v1  ;;  %v6160_v1 = vrot.slane %v1980_v46, %v5673_v15  ;;  %v1979_v0 = vrot.slane %v1951_v26, %v5666_v10 }
 0x1c8   : > { %2049 = vperm.xlu1 %5478, %v6110_v35   ;;  %2053 = vperm.xlu0 %5479, %v6113_v20   ;;  %v6181_v46 = vrot.slane %v1982_v61, %v5673_v15  ;;  %v6184_v41 = vrot.slane %v1981_v62, %v5673_v15  ;;  %v6192_v11 = vpop.permute.xlu0 %1295  ;;  %v6202_v26 = vpop.permute.xlu1 %1301 }
 0x1c9   : > { %v6190_v24 = vrot.slane %v1979_v0, %v5673_v15  ;;  %v1983_v27 = vcombine.high %v1979_v0, %v1979_v0  ;;  %9568 = vst [vmem:[#allocation53_spill] sm:$0xff] %v6192_v11  ;;  %9571 = vst [vmem:[#allocation56_spill] sm:$0xff] %v6202_v26 }
 0x1cb   : > { %v6198_v61 = vrot.slane %v1983_v27, %v5673_v15 }
 0x1cc   : > { %2057 = vperm.xlu1 %5478, %v6119_v50   ;;  %2065 = vperm.xlu0 %5479, %v6122_v39   ;;  %v6200_v62 = vpop.permute.xlu0 %1299  ;;  %v6207_v3 = vpop.permute.xlu1 %1305 }
 0x1cd   : > { %9570 = vst [vmem:[#allocation55_spill] sm:$0xff] %v6200_v62  ;;  %9573 = vst [vmem:[#allocation58_spill] sm:$0xff] %v6207_v3 }
 0x1d0   : > { %2061 = vperm.xlu1 %5478, %v6133_v25   ;;  %2073 = vperm.xlu0 %5479, %v6136_v28   ;;  %v6205_v48 = vpop.permute.xlu0 %1303  ;;  %v6211_v11 = vpop.permute.xlu1 %1309 }
 0x1d1   : > { %9572 = vst [vmem:[#allocation57_spill] sm:$0xff] %v6205_v48  ;;  %9575 = vst [vmem:[#allocation60_spill] sm:$0xff] %v6211_v11 }
 0x1d4   : > { %2069 = vperm.xlu1 %5478, %v6144_v23   ;;  %2081 = vperm.xlu0 %5479, %v6150_v32   ;;  %v6209_v0 = vpop.permute.xlu0 %1307 }
 0x1d5   : > { %9574 = vst [vmem:[#allocation59_spill] sm:$0xff] %v6209_v0 }
 0x1d8   : > { %2077 = vperm.xlu1 %5478, %v6157_v37   ;;  %2089 = vperm.xlu0 %5479, %v6160_v1  }
 0x1dc   : > { %2085 = vperm.xlu1 %5478, %v6167_v9   ;;  %2097 = vperm.xlu0 %5479, %v6170_v38  }
 0x1e0   : > { %2093 = vperm.xlu1 %5478, %v6181_v46   ;;  %2105 = vperm.xlu0 %5479, %v6184_v41  }
 0x1e4   : > { %2101 = vperm.xlu1 %5478, %v6190_v24   ;;  %5481 = vset.pattern.permute.xlu0 %v5604_v6 }
 0x1e8   : > { %2109 = vperm.xlu1 %5478, %v6198_v61  }
 0x1ec   : > { %5480 = vset.pattern.permute.xlu1 %v5604_v6 }
 0x1f5   : > { %v6213_v29 = vpop.permute.xlu0 %1311  ;;  %v6215_v27 = vpop.permute.xlu1 %1313 }
 0x1f6   : > { %9576 = vst [vmem:[#allocation61_spill] sm:$0xff] %v6213_v29  ;;  %9577 = vst [vmem:[#allocation62_spill] sm:$0xff] %v6215_v27 }
 0x1f9   : > { %v6217_v62 = vpop.permute.xlu0 %1315  ;;  %v6219_v26 = vpop.permute.xlu1 %1317 }
 0x1fa   : > { %9578 = vst [vmem:[#allocation63_spill] sm:$0xff] %v6217_v62  ;;  %9579 = vst [vmem:[#allocation64_spill] sm:$0xff] %v6219_v26 }
 0x1fd   : > { %v6221_v12 = vpop.permute.xlu0 %1319  ;;  %v6223_v48 = vpop.permute.xlu1 %1321 }
 0x1fe   : > { %9580 = vst [vmem:[#allocation65_spill] sm:$0xff] %v6221_v12  ;;  %9581 = vst [vmem:[#allocation66_spill] sm:$0xff] %v6223_v48 }
 0x201   : > { %v6225_v3 = vpop.permute.xlu0 %1323  ;;  %v6227_v0 = vpop.permute.xlu1 %1325 }
 0x202   : > { %9582 = vst [vmem:[#allocation67_spill] sm:$0xff] %v6225_v3  ;;  %9583 = vst [vmem:[#allocation68_spill] sm:$0xff] %v6227_v0 }
 0x205   : > { %v6229_v11 = vpop.permute.xlu0 %1327  ;;  %v6231_v2 = vpop.permute.xlu1 %1329 }
 0x206   : > { %9584 = vst [vmem:[#allocation69_spill] sm:$0xff] %v6229_v11  ;;  %9585 = vst [vmem:[#allocation70_spill] sm:$0xff] %v6231_v2 }
 0x209   : > { %v6233_v6 = vpop.permute.xlu0 %1331  ;;  %v6235_v29 = vpop.permute.xlu1 %1333 }
 0x20a   : > { %9586 = vst [vmem:[#allocation71_spill] sm:$0xff] %v6233_v6  ;;  %9587 = vst [vmem:[#allocation72_spill] sm:$0xff] %v6235_v29 }
 0x20d   : > { %v6237_v27 = vpop.permute.xlu0 %1335  ;;  %v6239_v62 = vpop.permute.xlu1 %1337 }
 0x20e   : > { %9588 = vst [vmem:[#allocation73_spill] sm:$0xff] %v6237_v27  ;;  %9589 = vst [vmem:[#allocation74_spill] sm:$0xff] %v6239_v62 }
 0x211   : > { %v6241_v26 = vpop.permute.xlu0 %1339  ;;  %v6243_v12 = vpop.permute.xlu1 %1341 }
 0x212   : > { %9590 = vst [vmem:[#allocation75_spill] sm:$0xff] %v6241_v26  ;;  %9591 = vst [vmem:[#allocation76_spill] sm:$0xff] %v6243_v12 }
 0x215   : > { %v6245_v48 = vpop.permute.xlu0 %1343  ;;  %v6247_v3 = vpop.permute.xlu1 %1345 }
 0x216   : > { %9592 = vst [vmem:[#allocation77_spill] sm:$0xff] %v6245_v48  ;;  %9593 = vst [vmem:[#allocation78_spill] sm:$0xff] %v6247_v3 }
 0x222   : > { %v6249_v0 = vpop.permute.xlu0 %1578  ;;  %v6251_v2 = vpop.permute.xlu1 %1582 }
 0x223   : > { %9594 = vst [vmem:[#allocation79_spill] sm:$0xff] %v6249_v0  ;;  %9595 = vst [vmem:[#allocation80_spill] sm:$0xff] %v6251_v2 }
 0x226   : > { %v6253_v6 = vpop.permute.xlu0 %1590  ;;  %v6255_v29 = vpop.permute.xlu1 %1586 }
 0x227   : > { %9596 = vst [vmem:[#allocation81_spill] sm:$0xff] %v6253_v6  ;;  %9597 = vst [vmem:[#allocation82_spill] sm:$0xff] %v6255_v29 }
 0x22a   : > { %v6257_v27 = vpop.permute.xlu0 %1598  ;;  %v6259_v62 = vpop.permute.xlu1 %1594 }
 0x22b   : > { %9598 = vst [vmem:[#allocation83_spill] sm:$0xff] %v6257_v27  ;;  %9599 = vst [vmem:[#allocation84_spill] sm:$0xff] %v6259_v62  ;;  %v6282_v62 = vld [vmem:[%s5772_s27 + $0x28] sm:$0x3] }
 0x22e   : > { %v6261_v26 = vpop.permute.xlu0 %1606  ;;  %v6263_v12 = vpop.permute.xlu1 %1602 }
 0x22f   : > { %9600 = vst [vmem:[#allocation85_spill] sm:$0xff] %v6261_v26  ;;  %9601 = vst [vmem:[#allocation86_spill] sm:$0xff] %v6263_v12 }
 0x232   : > { %v6265_v48 = vpop.permute.xlu0 %1614  ;;  %v6267_v3 = vpop.permute.xlu1 %1610 }
 0x233   : > { %9602 = vst [vmem:[#allocation87_spill] sm:$0xff] %v6265_v48  ;;  %9603 = vst [vmem:[#allocation88_spill] sm:$0xff] %v6267_v3  ;;  %v6285_v48 = vld [vmem:[%s5772_s27 + $0x10] sm:$0x3] }
 0x236   : > { %v6269_v0 = vpop.permute.xlu0 %1622  ;;  %v6271_v2 = vpop.permute.xlu1 %1618 }
 0x237   : > { %9604 = vst [vmem:[#allocation89_spill] sm:$0xff] %v6269_v0  ;;  %9605 = vst [vmem:[#allocation90_spill] sm:$0xff] %v6271_v2 }
 0x23a   : > { %v6273_v6 = vpop.permute.xlu0 %1630  ;;  %v6275_v29 = vpop.permute.xlu1 %1626 }
 0x23b   : > { %9606 = vst [vmem:[#allocation91_spill] sm:$0xff] %v6273_v6  ;;  %9607 = vst [vmem:[#allocation92_spill] sm:$0xff] %v6275_v29 }
 0x23e   : > { %v6277_v11 = vpop.permute.xlu0 %1638  ;;  %v6279_v27 = vpop.permute.xlu1 %1634 }
 0x23f   : > { %9608 = vst [vmem:[#allocation93_spill] sm:$0xff] %v6277_v11  ;;  %9609 = vst [vmem:[#allocation94_spill] sm:$0xff] %v6279_v27 }
 0x243   : > { %v2054_v26 = vpop.permute.xlu0 %2053  ;;  %v2050_v12 = vpop.permute.xlu1 %2049 }
 0x244   : > { %v2115_v3 = vmul.f32 %v2054_v26, %v5829_v33  ;;  %v2116_v0 = vmul.f32 %v2054_v26, %v5832_v34  ;;  %v2117_v2 = vmul.f32 %v2054_v26, %v6282_v62  ;;  %v2112_v6 = vmul.f32 %v2050_v12, %v5775_v54 }
 0x245   : > { %v2113_v29 = vmul.f32 %v2050_v12, %v5778_v55  ;;  %v2114_v11 = vmul.f32 %v2050_v12, %v6285_v48 }
 0x246   : > { %v2213_v27 = vrot.slane %v2115_v3, 1  ;;  %v2208_v63 = vrot.slane %v2112_v6, 1  ;;  %v2214_v60 = vrot.slane %v2116_v0, 1  ;;  %v2216_v57 = vrot.slane %v2117_v2, 1 }
 0x247   : > { %v2209_v53 = vrot.slane %v2113_v29, 1  ;;  %v2211_v51 = vrot.slane %v2114_v11, 1  ;;  %v2058_v49 = vpop.permute.xlu1 %2057  ;;  %v2066_v26 = vpop.permute.xlu0 %2065 }
 0x248   : > { %v2118_v33 = vmul.f32 %v2058_v49, %v5841_v42  ;;  %v2119_v34 = vmul.f32 %v2058_v49, %v5844_v44  ;;  %v2120_v54 = vmul.f32 %v2058_v49, %v6294_v47  ;;  %v2217_v29 = vsel %vm1737_vm0, %v2214_v60, %v2216_v57  ;;  %v6306_v42 = vld [vmem:[%s5772_s27 + $0x58] sm:$0x3]  ;;  %v6314_v57 = vld [vmem:[%s5772_s27 + $0x70] sm:$0x3] }
 0x249   : > { %v2212_v55 = vsel %vm1737_vm0, %v2209_v53, %v2211_v51  ;;  %v2210_v12 = vsel %vm1737_vm0, %v2208_v63, %v2209_v53  ;;  %v2215_v3 = vsel %vm1737_vm0, %v2213_v27, %v2214_v60  ;;  %v2124_v60 = vmul.f32 %v2066_v26, %v5801_v7 }
 0x24a   : > { %2290 = vrot.lane.b32.xlu1 %v2212_v55, %s5600_s28  ;;  %2288 = vrot.lane.b32.xlu0 %v2210_v12, %s5600_s28  ;;  %v2219_v11 = vrot.slane %v2119_v34, 1  ;;  %v2221_v44 = vrot.slane %v2120_v54, 1  ;;  %v2218_v49 = vrot.slane %v2118_v33, 1  ;;  %v2125_v0 = vmul.f32 %v2066_v26, %v5804_v8  ;;  %v6324_v55 = vld [vmem:[%s5772_s27 + $0x88] sm:$0x3] }
 0x24b   : > { %v2062_v2 = vpop.permute.xlu1 %2061  ;;  %v2126_v27 = vmul.f32 %v2066_v26, %v6314_v57  ;;  %v2228_v7 = vrot.slane %v2124_v60, 1 }
 0x24c   : > { %v2121_v51 = vmul.f32 %v2062_v2, %v5911_v21  ;;  %v2122_v53 = vmul.f32 %v2062_v2, %v5914_v31  ;;  %v2123_v63 = vmul.f32 %v2062_v2, %v6306_v42  ;;  %v2222_v6 = vsel %vm1737_vm0, %v2219_v11, %v2221_v44 }
 0x24d   : > { %v2220_v54 = vsel %vm1737_vm0, %v2218_v49, %v2219_v11  ;;  %v2229_v12 = vrot.slane %v2125_v0, 1  ;;  %v2231_v8 = vrot.slane %v2126_v27, 1  ;;  %v6334_v49 = vld [vmem:[%s5772_s27 + $0xa0] sm:$0x3] }
 0x24e   : > { %2294 = vrot.lane.b32.xlu1 %v2217_v29, %s5600_s28  ;;  %2292 = vrot.lane.b32.xlu0 %v2215_v3, %s5600_s28  ;;  %v2223_v21 = vrot.slane %v2121_v51, 1  ;;  %v2224_v33 = vrot.slane %v2122_v53, 1  ;;  %v2226_v31 = vrot.slane %v2123_v63, 1  ;;  %v2074_v29 = vpop.permute.xlu0 %2073 }
 0x24f   : > { %v2070_v34 = vpop.permute.xlu1 %2069  ;;  %v2130_v51 = vmul.f32 %v2074_v29, %v5859_v4  ;;  %v2132_v53 = vmul.f32 %v2074_v29, %v6334_v49 }
 0x250   : > { %v2127_v2 = vmul.f32 %v2070_v34, %v5851_v52  ;;  %v2128_v3 = vmul.f32 %v2070_v34, %v5854_v56  ;;  %v2129_v44 = vmul.f32 %v2070_v34, %v6324_v55  ;;  %v2227_v26 = vsel %vm1737_vm0, %v2224_v33, %v2226_v31 }
 0x251   : > { %v2225_v11 = vsel %vm1737_vm0, %v2223_v21, %v2224_v33  ;;  %v2131_v52 = vmul.f32 %v2074_v29, %v5862_v5  ;;  %v2232_v56 = vsel %vm1737_vm0, %v2229_v12, %v2231_v8  ;;  %v6344_v21 = vld [vmem:[%s5772_s27 + $0xb8] sm:$0x3]  ;;  %v2238_v4 = vrot.slane %v2130_v51, 1 }
 0x252   : > { %2298 = vrot.lane.b32.xlu1 %v2222_v6, %s5600_s28  ;;  %2296 = vrot.lane.b32.xlu0 %v2220_v54, %s5600_s28  ;;  %v2233_v63 = vrot.slane %v2127_v2, 1  ;;  %v2234_v60 = vrot.slane %v2128_v3, 1  ;;  %v2236_v0 = vrot.slane %v2129_v44, 1  ;;  %v2230_v6 = vsel %vm1737_vm0, %v2228_v7, %v2229_v12  ;;  %v2082_v34 = vpop.permute.xlu0 %2081  ;;  %v6354_v12 = vld [vmem:[%s5772_s27 + $0xd0] sm:$0x3] }
 0x253   : > { %v2078_v27 = vpop.permute.xlu1 %2077  ;;  %v2239_v33 = vrot.slane %v2131_v52, 1  ;;  %v2241_v5 = vrot.slane %v2132_v53, 1  ;;  %v2136_v29 = vmul.f32 %v2082_v34, %v5811_v14  ;;  %v2138_v3 = vmul.f32 %v2082_v34, %v6354_v12  ;;  %v6364_v53 = vld [vmem:[%s5772_s27 + $0xe8] sm:$0x3] }
 0x254   : > { %v2133_v31 = vmul.f32 %v2078_v27, %v5921_v58  ;;  %v2134_v54 = vmul.f32 %v2078_v27, %v5924_v59  ;;  %v2135_v8 = vmul.f32 %v2078_v27, %v6344_v21  ;;  %v2237_v2 = vsel %vm1737_vm0, %v2234_v60, %v2236_v0 }
 0x255   : > { %v2235_v7 = vsel %vm1737_vm0, %v2233_v63, %v2234_v60  ;;  %v2137_v58 = vmul.f32 %v2082_v34, %v5814_v16  ;;  %v2242_v59 = vsel %vm1737_vm0, %v2239_v33, %v2241_v5  ;;  %v2240_v52 = vsel %vm1737_vm0, %v2238_v4, %v2239_v33  ;;  %v6374_v33 = vld [vmem:[%s5772_s27 + $0x100] sm:$0x3] }
 0x256   : > { %2302 = vrot.lane.b32.xlu1 %v2227_v26, %s5600_s28  ;;  %2300 = vrot.lane.b32.xlu0 %v2225_v11, %s5600_s28  ;;  %v2243_v44 = vrot.slane %v2133_v31, 1  ;;  %v2244_v26 = vrot.slane %v2134_v54, 1  ;;  %v2246_v11 = vrot.slane %v2135_v8, 1  ;;  %v2248_v14 = vrot.slane %v2136_v29, 1  ;;  %v2090_v60 = vpop.permute.xlu0 %2089  ;;  %9610 = vst [vmem:[#allocation95_spill] sm:$0xff] %v6374_v33 }
 0x257   : > { %v2086_v51 = vpop.permute.xlu1 %2085  ;;  %v2251_v16 = vrot.slane %v2138_v3, 1  ;;  %v2142_v5 = vmul.f32 %v2090_v60, %v5879_v30  ;;  %v2143_v31 = vmul.f32 %v2090_v60, %v5882_v13 }
 0x258   : > { %v2139_v63 = vmul.f32 %v2086_v51, %v5871_v17  ;;  %v2140_v0 = vmul.f32 %v2086_v51, %v5874_v18  ;;  %v2141_v27 = vmul.f32 %v2086_v51, %v6364_v53  ;;  %v2245_v4 = vsel %vm1737_vm0, %v2243_v44, %v2244_v26 }
 0x259   : > { %v2144_v17 = vmul.f32 %v2090_v60, %v6374_v33  ;;  %v2258_v29 = vrot.slane %v2142_v5, 1 }
 0x25a   : > { %2306 = vrot.lane.b32.xlu1 %v2232_v56, %s5600_s28  ;;  %2304 = vrot.lane.b32.xlu0 %v2230_v6, %s5600_s28  ;;  %v2249_v56 = vrot.slane %v2137_v58, 1  ;;  %v2247_v6 = vsel %vm1737_vm0, %v2244_v26, %v2246_v11  ;;  %v2253_v34 = vrot.slane %v2139_v63, 1  ;;  %v2254_v54 = vrot.slane %v2140_v0, 1 }
 0x25b   : > { %v2256_v8 = vrot.slane %v2141_v27, 1  ;;  %v2259_v58 = vrot.slane %v2143_v31, 1  ;;  %v2261_v30 = vrot.slane %v2144_v17, 1 }
 0x25c   : > { %v2252_v18 = vsel %vm1737_vm0, %v2249_v56, %v2251_v16  ;;  %v2255_v44 = vsel %vm1737_vm0, %v2253_v34, %v2254_v54 }
 0x25d   : > { %v2262_v51 = vsel %vm1737_vm0, %v2259_v58, %v2261_v30 }
 0x25e   : > { %2310 = vrot.lane.b32.xlu1 %v2237_v2, %s5600_s28  ;;  %2308 = vrot.lane.b32.xlu0 %v2235_v7, %s5600_s28  ;;  %v2250_v2 = vsel %vm1737_vm0, %v2248_v14, %v2249_v56  ;;  %v6381_v7 = vpop.permute.xlu1 %2093  ;;  %v6433_v14 = vpop.permute.xlu0 %2097 }
 0x25f   : > { %v2145_v13 = vmul.f32 %v6381_v7, %v5931_v19  ;;  %v6389_v3 = vmul.f32 %v6381_v7, %v5934_v36  ;;  %v5605_v36 = vmov 7  }
 0x261   : > { %v2263_v26 = vrot.slane %v2145_v13, 1  ;;  %v2264_v11 = vrot.slane %v6389_v3, 1 }
 0x262   : > { %2314 = vrot.lane.b32.xlu1 %v2242_v59, %s5600_s28  ;;  %2312 = vrot.lane.b32.xlu0 %v2240_v52, %s5600_s28  ;;  %v2257_v59 = vsel %vm1737_vm0, %v2254_v54, %v2256_v8  ;;  %v2260_v52 = vsel %vm1737_vm0, %v2258_v29, %v2259_v58  ;;  %v6435_v56 = vpop.permute.xlu1 %2101 }
 0x263   : > { %v2265_v19 = vsel %vm1737_vm0, %v2263_v26, %v2264_v11 }
 0x266   : > { %2318 = vrot.lane.b32.xlu1 %v2247_v6, %s5600_s28  ;;  %2316 = vrot.lane.b32.xlu0 %v2245_v4, %s5600_s28 }
 0x26a   : > { %2322 = vrot.lane.b32.xlu1 %v2252_v18, %s5600_s28  ;;  %2320 = vrot.lane.b32.xlu0 %v2250_v2, %s5600_s28 }
 0x26e   : > { %2326 = vrot.lane.b32.xlu1 %v2257_v59, %s5600_s28  ;;  %2324 = vrot.lane.b32.xlu0 %v2255_v44, %s5600_s28 }
 0x272   : > { %2330 = vrot.lane.b32.xlu1 %v2262_v51, %s5600_s28  ;;  %2328 = vrot.lane.b32.xlu0 %v2260_v52, %s5600_s28 }
 0x276   : > { %2615 = vperm.xlu1 %5480, %v6150_v32   ;;  %2332 = vrot.lane.b32.xlu0 %v2265_v19, %s5600_s28 }
 0x27a   : > { %2623 = vperm.xlu1 %5480, %v6160_v1   ;;  %2619 = vperm.xlu0 %5481, %v6167_v9  }
 0x27e   : > { %2627 = vperm.xlu1 %5480, %v6181_v46   ;;  %2631 = vperm.xlu0 %5481, %v6170_v38  }
 0x282   : > { %2635 = vperm.xlu1 %5480, %v6190_v24   ;;  %2639 = vperm.xlu0 %5481, %v6184_v41  }
 0x286   : > { %2643 = vperm.xlu1 %5480, %v6198_v61   ;;  %2583 = vperm.xlu0 %5481, %v6110_v35  }
 0x28a   : > { %2587 = vperm.xlu1 %5480, %v6113_v20   ;;  %2591 = vperm.xlu0 %5481, %v6119_v50  }
 0x28e   : > { %2595 = vperm.xlu1 %5480, %v6133_v25   ;;  %2599 = vperm.xlu0 %5481, %v6122_v39  }
 0x292   : > { %2603 = vperm.xlu1 %5480, %v6144_v23   ;;  %2607 = vperm.xlu0 %5481, %v6136_v28  }
 0x296   : > { %2611 = vperm.xlu1 %5480, %v6157_v37   ;;  %5482 = vset.pattern.permute.xlu0 %v5605_v36 }
 0x297   : > { %3620 = vperm.xlu0 %5482, %v6150_v32  }
 0x29a   : > { %5483 = vset.pattern.permute.xlu1 %v5605_v36 }
 0x29b   : > { %3624 = vperm.xlu1 %5483, %v6167_v9   ;;  %3632 = vperm.xlu0 %5482, %v6181_v46  }
 0x29f   : > { %3628 = vperm.xlu1 %5483, %v6160_v1   ;;  %3640 = vperm.xlu0 %5482, %v6190_v24  }
 0x2a3   : > { %3636 = vperm.xlu1 %5483, %v6170_v38   ;;  %3648 = vperm.xlu0 %5482, %v6198_v61  }
 0x2a7   : > { %3644 = vperm.xlu1 %5483, %v6184_v41   ;;  %3592 = vperm.xlu0 %5482, %v6113_v20   ;;  %v3955_v20 = vld [vmem:[%s9347_s1] sm:$0xff] }
 0x2a8   : > { %v3959_v16 = vcombine.high %v3955_v20, %v3955_v20 }
 0x2ab   : > { %3588 = vperm.xlu1 %5483, %v6110_v35   ;;  %3600 = vperm.xlu0 %5482, %v6133_v25   ;;  %v5606_v35 = vmov 8   ;;  %v6443_v25 = vpop.permute.xlu0 %2105 }
 0x2af   : > { %3596 = vperm.xlu1 %5483, %v6119_v50   ;;  %3608 = vperm.xlu0 %5482, %v6144_v23   ;;  %v6445_v50 = vpop.permute.xlu1 %2109  ;;  %v3966_v23 = vrot.slane %v3955_v20, %v5666_v10 }
 0x2b1   : > { %v3974_v4 = vcombine.high %v3966_v23, %v3966_v23 }
 0x2b3   : > { %3604 = vperm.xlu1 %5483, %v6122_v39   ;;  %3616 = vperm.xlu0 %5482, %v6157_v37   ;;  %v3996_v18 = vrot.slane %v3974_v4, %v5666_v10 }
 0x2b5   : > { %v4064_v58 = vrot.slane %v3996_v18, %v5673_v15  ;;  %v4006_v13 = vcombine.high %v3996_v18, %v3996_v18 }
 0x2b7   : > { %3612 = vperm.xlu1 %5483, %v6136_v28   ;;  %5485 = vset.pattern.permute.xlu0 %v5606_v35  ;;  %v3982_v28 = vrot.slane %v3966_v23, %v5666_v10  ;;  %v4072_v52 = vrot.slane %v4006_v13, %v5673_v15 }
 0x2b8   : > { %4158 = vperm.xlu0 %5485, %v6167_v9  }
 0x2b9   : > { %v6463_v60 = vrot.slane %v3982_v28, %v5673_v15  ;;  %v4004_v0 = vcombine.high %v3982_v28, %v3982_v28  ;;  %v5607_v28 = vmov 6  }
 0x2bb   : > { %5484 = vset.pattern.permute.xlu1 %v5606_v35 }
 0x2bc   : > { %v6449_v39 = vpop.permute.xlu0 %2288  ;;  %4154 = vperm.xlu1 %5484, %v6150_v32   ;;  %4170 = vperm.xlu0 %5485, %v6170_v38   ;;  %v6453_v37 = vpop.permute.xlu1 %2290  ;;  %v3973_v32 = vrot.slane %v3959_v16, %v5666_v10  ;;  %v2951_v38 = vld [vmem:[%s9347_s1 + $0x8] sm:$0xff] }
 0x2bd   : > { %9611 = vst [vmem:[#allocation96_spill] sm:$0xff] %v6449_v39  ;;  %9612 = vst [vmem:[#allocation97_spill] sm:$0xff] %v6453_v37  ;;  %v3010_v5 = vrot.slane %v2951_v38, %v5666_v10  ;;  %v3003_v54 = vcombine.high %v2951_v38, %v2951_v38  ;;  %v6652_v39 = vld [vmem:[%s5772_s27 + $0xc8] sm:$0xff]  ;;  %v9643_v37 = vld [vmem:[#allocation5_spill] sm:$0xff] }
 0x2be   : > { %v3989_v6 = vrot.slane %v3973_v32, %v5666_v10  ;;  %v3975_v2 = vcombine.high %v3973_v32, %v3973_v32 }
 0x2bf   : > { %v3018_v8 = vcombine.high %v3010_v5, %v3010_v5  ;;  %v3026_v59 = vrot.slane %v3010_v5, %v5666_v10  ;;  %v3017_v26 = vrot.slane %v3003_v54, %v5666_v10 }
 0x2c0   : > { %v6456_v63 = vpop.permute.xlu0 %2292  ;;  %4162 = vperm.xlu1 %5484, %v6160_v1   ;;  %4178 = vperm.xlu0 %5485, %v6184_v41   ;;  %v6460_v9 = vpop.permute.xlu1 %2294  ;;  %v6476_v41 = vrot.slane %v4004_v0, %v5673_v15  ;;  %v4005_v34 = vcombine.high %v3989_v6, %v3989_v6  ;;  %v4003_v19 = vrot.slane %v3975_v2, %v5666_v10 }
 0x2c1   : > { %9613 = vst [vmem:[#allocation98_spill] sm:$0xff] %v6456_v63  ;;  %9614 = vst [vmem:[#allocation99_spill] sm:$0xff] %v6460_v9  ;;  %v3040_v44 = vrot.slane %v3018_v8, %v5666_v10  ;;  %v3087_v36 = vrot.slane %v3026_v59, %v5673_v15  ;;  %v3019_v35 = vcombine.high %v3017_v26, %v3017_v26  ;;  %v9642_v63 = vld [vmem:[#allocation4_spill] sm:$0xff] }
 0x2c2   : > { %v6498_v30 = vrot.slane %v4005_v34, %v5673_v15  ;;  %v4080_v16 = vrot.slane %v4003_v19, %v5673_v15  ;;  %v4007_v0 = vcombine.high %v4003_v19, %v4003_v19  ;;  %v3048_v13 = vcombine.high %v3026_v59, %v3026_v59 }
 0x2c3   : > { %v3050_v20 = vcombine.high %v3040_v44, %v3040_v44  ;;  %v3091_v8 = vrot.slane %v3040_v44, %v5673_v15 }
 0x2c4   : > { %v6469_v27 = vpop.permute.xlu0 %2296  ;;  %4166 = vperm.xlu1 %5484, %v6181_v46   ;;  %4122 = vperm.xlu0 %5485, %v6463_v60   ;;  %v6473_v1 = vpop.permute.xlu1 %2298  ;;  %v6487_v46 = vrot.slane %v3989_v6, %v5673_v15  ;;  %v3047_v6 = vrot.slane %v3019_v35, %v5666_v10  ;;  %v4088_v4 = vrot.slane %v4007_v0, %v5673_v15 }
 0x2c5   : > { %9615 = vst [vmem:[#allocation100_spill] sm:$0xff] %v6469_v27  ;;  %9616 = vst [vmem:[#allocation101_spill] sm:$0xff] %v6473_v1  ;;  %v3099_v38 = vrot.slane %v3050_v20, %v5673_v15  ;;  %v3095_v20 = vrot.slane %v3048_v13, %v5673_v15  ;;  %v3033_v35 = vrot.slane %v3017_v26, %v5666_v10  ;;  %v9634_v26 = vmov 0  }
 0x2c6   : > { %v3107_v18 = vrot.slane %v3047_v6, %v5673_v15  ;;  %v3051_v34 = vcombine.high %v3047_v6, %v3047_v6 }
 0x2c7   : > { %v3103_v44 = vrot.slane %v3033_v35, %v5673_v15 }
 0x2c8   : > { %v6480_v31 = vpop.permute.xlu0 %2300  ;;  %4174 = vperm.xlu1 %5484, %v6190_v24   ;;  %4130 = vperm.xlu0 %5485, %v6476_v41   ;;  %v6484_v17 = vpop.permute.xlu1 %2302  ;;  %v3115_v2 = vrot.slane %v3051_v34, %v5673_v15 }
 0x2c9   : > { %9617 = vst [vmem:[#allocation102_spill] sm:$0xff] %v6480_v31  ;;  %9618 = vst [vmem:[#allocation103_spill] sm:$0xff] %v6484_v17 }
 0x2cc   : > { %v6490_v29 = vpop.permute.xlu0 %2304  ;;  %4182 = vperm.xlu1 %5484, %v6198_v61   ;;  %4138 = vperm.xlu0 %5485, %v6487_v46   ;;  %v6494_v24 = vpop.permute.xlu1 %2306 }
 0x2cd   : > { %9619 = vst [vmem:[#allocation104_spill] sm:$0xff] %v6490_v29  ;;  %9620 = vst [vmem:[#allocation105_spill] sm:$0xff] %v6494_v24  ;;  %v6632_v29 = vld [vmem:[%s5772_s27 + $0x170] sm:$0xff] }
 0x2d0   : > { %v6503_v51 = vpop.permute.xlu0 %2308  ;;  %4126 = vperm.xlu1 %5484, %v4064_v58   ;;  %4146 = vperm.xlu0 %5485, %v6498_v30   ;;  %v6506_v61 = vpop.permute.xlu1 %2310 }
 0x2d1   : > { %9621 = vst [vmem:[#allocation106_spill] sm:$0xff] %v6503_v51  ;;  %9622 = vst [vmem:[#allocation107_spill] sm:$0xff] %v6506_v61 }
 0x2d4   : > { %v6511_v23 = vpop.permute.xlu0 %2312  ;;  %4134 = vperm.xlu1 %5484, %v4072_v52   ;;  %5486 = vset.pattern.permute.xlu0 %v5607_v28  ;;  %v6514_v32 = vpop.permute.xlu1 %2314 }
 0x2d5   : > { %9623 = vst [vmem:[#allocation108_spill] sm:$0xff] %v6511_v23  ;;  %9624 = vst [vmem:[#allocation109_spill] sm:$0xff] %v6514_v32  ;;  %3149 = vperm.xlu0 %5486, %v3087_v36   ;;  %v6628_v32 = vld [vmem:[%s5772_s27 + $0x178] sm:$0x3] }
 0x2d8   : > { %4142 = vperm.xlu1 %5484, %v4080_v16   ;;  %v6519_v5 = vpop.permute.xlu0 %2316  ;;  %v6522_v54 = vpop.permute.xlu1 %2318 }
 0x2d9   : > { %9625 = vst [vmem:[#allocation110_spill] sm:$0xff] %v6519_v5  ;;  %3161 = vperm.xlu0 %5486, %v3099_v38   ;;  %9626 = vst [vmem:[#allocation111_spill] sm:$0xff] %v6522_v54  ;;  %v3049_v38 = vcombine.high %v3033_v35, %v3033_v35  ;;  %v6688_v5 = vld [vmem:[%s5772_s27 + $0x138] sm:$0xff] }
 0x2db   : > { %v3111_v59 = vrot.slane %v3049_v38, %v5673_v15 }
 0x2dc   : > { %4150 = vperm.xlu1 %5484, %v4088_v4   ;;  %v6526_v19 = vpop.permute.xlu0 %2320  ;;  %v6528_v36 = vpop.permute.xlu1 %2322 }
 0x2dd   : > { %3169 = vperm.xlu0 %5486, %v3107_v18   ;;  %9627 = vst [vmem:[#allocation112_spill] sm:$0xff] %v6526_v19  ;;  %9628 = vst [vmem:[#allocation113_spill] sm:$0xff] %v6528_v36 }
 0x2e0   : > { %5487 = vset.pattern.permute.xlu1 %v5607_v28  ;;  %v6532_v0 = vpop.permute.xlu0 %2324  ;;  %v6535_v6 = vpop.permute.xlu1 %2326 }
 0x2e1   : > { %3153 = vperm.xlu1 %5487, %v3091_v8   ;;  %3177 = vperm.xlu0 %5486, %v3115_v2   ;;  %9629 = vst [vmem:[#allocation114_spill] sm:$0xff] %v6532_v0  ;;  %9630 = vst [vmem:[#allocation115_spill] sm:$0xff] %v6535_v6  ;;  %v6569_v8 = vld [vmem:[%s5772_s27 + $0x128] sm:$0xff]  ;;  %v6679_v0 = vld [vmem:[%s5772_s27 + $0xe0] sm:$0xff] }
 0x2e2   : > { %9637 = vst [vmem:[#allocation121_spill] sm:$0xff] %v6569_v8 }
 0x2e4   : > { %v6538_v28 = vpop.permute.xlu0 %2328  ;;  %v6540_v18 = vpop.permute.xlu1 %2330 }
 0x2e5   : > { %3157 = vperm.xlu1 %5487, %v3095_v20   ;;  %3121 = vperm.xlu0 %5486, %v4064_v58   ;;  %9631 = vst [vmem:[#allocation116_spill] sm:$0xff] %v6538_v28  ;;  %9632 = vst [vmem:[#allocation117_spill] sm:$0xff] %v6540_v18  ;;  %v6609_v20 = vld [vmem:[%s5772_s27 + $0x158] sm:$0xff] }
 0x2e6   : > { %9639 = vst [vmem:[#allocation123_spill] sm:$0xff] %v6609_v20  ;;  %v6613_v28 = vmul.f32 %v6609_v20, %v6443_v25 }
 0x2e8   : > { %v6542_v10 = vpop.permute.xlu0 %2332 }
 0x2e9   : > { %3165 = vperm.xlu1 %5487, %v3103_v44   ;;  %3129 = vperm.xlu0 %5486, %v4072_v52   ;;  %9633 = vst [vmem:[#allocation118_spill] sm:$0xff] %v6542_v10  ;;  %v6588_v44 = vld [vmem:[%s5772_s27 + $0x140] sm:$0xff] }
 0x2ea   : > { %v6592_v38 = vmul.f32 %v6588_v44, %v6435_v56 }
 0x2ed   : > { %3173 = vperm.xlu1 %5487, %v3111_v59   ;;  %3137 = vperm.xlu0 %5486, %v4080_v16   ;;  %v6555_v16 = vld [vmem:[%s5772_s27 + $0x118] sm:$0x3] }
 0x2ee   : > { %9635 = vst [vmem:[#allocation119_spill] sm:$0xff] %v6555_v16  ;;  %v2147_v34 = vmul.f32 %v6381_v7, %v6555_v16 }
 0x2f0   : > { %v2266_v2 = vrot.slane %v2147_v34, 1 }
 0x2f1   : > { %3117 = vperm.xlu1 %5487, %v6463_v60   ;;  %3145 = vperm.xlu0 %5486, %v4088_v4   ;;  %v6545_v58 = vpop.permute.xlu1 %2615  ;;  %v6566_v4 = vld [vmem:[%s5772_s27 + $0x130] sm:$0x3] }
 0x2f2   : > { %9636 = vst [vmem:[#allocation120_spill] sm:$0xff] %v6566_v4  ;;  %v2150_v7 = vmul.f32 %v6433_v14, %v6566_v4  ;;  %v2267_v59 = vsel %vm1737_vm0, %v2264_v11, %v2266_v2  ;;  %v9384_v11 = vrot.slane %v6592_v38, 1 }
 0x2f4   : > { %v2271_v35 = vrot.slane %v2150_v7, 1  ;;  %v6606_v7 = vld [vmem:[%s5772_s27 + $0x160] sm:$0x3] }
 0x2f5   : > { %3125 = vperm.xlu1 %5487, %v6476_v41   ;;  %5488 = vset.pattern.permute.xlu0 %v9634_v26  ;;  %v6549_v15 = vpop.permute.xlu0 %2619  ;;  %v6551_v52 = vpop.permute.xlu1 %2623  ;;  %9638 = vst [vmem:[#allocation122_spill] sm:$0xff] %v6606_v7  ;;  %v2156_v3 = vmul.f32 %v6443_v25, %v6606_v7 }
 0x2f6   : > { %440 = vperm.xlu0 %5488, %v5678_v22   ;;  %v6573_v22 = vmul.f32 %v6569_v8, %v6433_v14 }
 0x2f8   : > { %v9648_v27 = vrot.slane %v6573_v22, 1 }
 0x2f9   : > { %3133 = vperm.xlu1 %5487, %v6487_v46   ;;  %v6560_v60 = vpop.permute.xlu0 %2631  ;;  %v6562_v41 = vpop.permute.xlu1 %2627 }
 0x2fa   : > { %444 = vperm.xlu0 %5488, %v5724_v40   ;;  %v6584_v40 = vld [vmem:[%s5772_s27 + $0x148] sm:$0x3] }
 0x2fd   : > { %3141 = vperm.xlu1 %5487, %v6498_v30   ;;  %v6578_v46 = vpop.permute.xlu0 %2639  ;;  %v6580_v13 = vpop.permute.xlu1 %2635  ;;  %v2153_v30 = vmul.f32 %v6435_v56, %v6584_v40 }
 0x2fe   : > { %456 = vperm.xlu0 %5488, %v5729_v43  }
 0x2ff   : > { %v2276_v2 = vrot.slane %v2153_v30, 1  ;;  %v6636_v30 = vmul.f32 %v6632_v29, %v6445_v50 }
 0x301   : > { %2334 = vrot.lane.b32.xlu1 %v2267_v59, %s5600_s28  ;;  %v6600_v43 = vpop.permute.xlu0 %2583  ;;  %v6602_v34 = vpop.permute.xlu1 %2643  ;;  %v9640_v59 = vrot.slane %v6573_v22, 1  ;;  %v2277_v36 = vsel %vm1737_vm0, %v9384_v11, %v2276_v2  ;;  %v2672_v2 = vmul.f32 %v6545_v58, %v6354_v12  ;;  %v6664_v11 = vld [vmem:[%s5772_s27 + $0x120] sm:$0xff]  ;;  %v9644_v10 = vrot.slane %v6636_v30, 1 }
 0x302   : > { %464 = vperm.xlu0 %5488, %v5734_v45   ;;  %5489 = vset.pattern.permute.xlu1 %v9634_v26  ;;  %v9641_v26 = vld [vmem:[#allocation3_spill] sm:$0xff] }
 0x303   : > { %v2272_v45 = vsel %vm1737_vm0, %v9640_v59, %v2271_v35  ;;  %v2159_v35 = vmul.f32 %v6445_v50, %v6628_v32  ;;  %v9385_v59 = vrot.slane %v6613_v28, 1 }
 0x305   : > { %2338 = vrot.lane.b32.xlu1 %v2272_v45, %s5600_s28  ;;  %v6623_v23 = vpop.permute.xlu0 %2591  ;;  %v6625_v19 = vpop.permute.xlu1 %2587  ;;  %v2281_v45 = vrot.slane %v2156_v3, 1  ;;  %v2286_v18 = vrot.slane %v2159_v35, 1  ;;  %v6656_v3 = vmul.f32 %v6652_v39, %v6545_v58 }
 0x306   : > { %472 = vperm.xlu0 %5488, %v9641_v26  }
 0x307   : > { %v2287_v6 = vsel %vm1737_vm0, %v9644_v10, %v2286_v18  ;;  %v9645_v10 = vld [vmem:[#allocation6_spill] sm:$0xff] }
 0x309   : > { %v6644_v24 = vpop.permute.xlu0 %2599  ;;  %2342 = vrot.lane.b32.xlu1 %v2277_v36, %s5600_s28  ;;  %v6647_v26 = vpop.permute.xlu1 %2595  ;;  %v2282_v36 = vsel %vm1737_vm0, %v9385_v59, %v2281_v45  ;;  %v2785_v59 = vrot.slane %v2672_v2, 1  ;;  %v6699_v45 = vld [vmem:[%s5772_s27 + $0xf8] sm:$0xff] }
 0x30a   : > { %480 = vperm.xlu0 %5488, %v9642_v63   ;;  %v2148_v63 = vmul.f32 %v6664_v11, %v6433_v14  ;;  %v6683_v14 = vmul.f32 %v6679_v0, %v6549_v15  ;;  %9646 = vst [vmem:[#allocation3_spill] sm:$0xff] %v6699_v45  ;;  %v6703_v61 = vmul.f32 %v6699_v45, %v6551_v52  ;;  %v6727_v45 = vld [vmem:[%s5772_s27 + $0x110] sm:$0xff] }
 0x30b   : > { %9649 = vst [vmem:[#allocation4_spill] sm:$0xff] %v6727_v45 }
 0x30c   : > { %v2268_v54 = vrot.slane %v2148_v63, 1 }
 0x30d   : > { %v6668_v35 = vpop.permute.xlu0 %2607  ;;  %2346 = vrot.lane.b32.xlu1 %v2282_v36, %s5600_s28  ;;  %v6671_v9 = vpop.permute.xlu1 %2603  ;;  %v2675_v36 = vmul.f32 %v6549_v15, %v6364_v53 }
 0x30e   : > { %488 = vperm.xlu0 %5488, %v9643_v37   ;;  %v2151_v37 = vmul.f32 %v6688_v5, %v6435_v56  ;;  %v2678_v56 = vmul.f32 %v6551_v52, %v6374_v33 }
 0x30f   : > { %v2790_v51 = vrot.slane %v2675_v36, 1  ;;  %v2270_v36 = vsel %vm1737_vm0, %v2268_v54, %v9648_v27  ;;  %v9650_v27 = vrot.slane %v6683_v14, 1 }
 0x310   : > { %v2273_v1 = vrot.slane %v2151_v37, 1  ;;  %v6739_v37 = vld [vmem:[%s5772_s27 + $0x168] sm:$0xff] }
 0x311   : > { %2350 = vrot.lane.b32.xlu1 %v2287_v6, %s5600_s28  ;;  %v6693_v18 = vpop.permute.xlu1 %2611  ;;  %v9647_v6 = vrot.slane %v6656_v3, 1  ;;  %v2791_v54 = vsel %vm1737_vm0, %v9650_v27, %v2790_v51  ;;  %v2684_v51 = vmul.f32 %v6560_v60, %v6566_v4 }
 0x312   : > { %496 = vperm.xlu0 %5488, %v9645_v10   ;;  %v6696_v2 = vpop.permute.xlu0 %3620  ;;  %v6712_v10 = vld [vmem:[%s5772_s27 + $0x150] sm:$0xff] }
 0x313   : > { %v2786_v17 = vsel %vm1737_vm0, %v9647_v6, %v2785_v59  ;;  %v2154_v31 = vmul.f32 %v6712_v10, %v6443_v25  ;;  %v2795_v6 = vrot.slane %v2678_v56, 1  ;;  %v6731_v25 = vmul.f32 %v6727_v45, %v6562_v41 }
 0x314   : > { %v2157_v56 = vmul.f32 %v6739_v37, %v6445_v50 }
 0x315   : > { %2856 = vrot.lane.b32.xlu1 %v2786_v17, %s5601_s29  ;;  %v2681_v17 = vmul.f32 %v6562_v41, %v6555_v16  ;;  %v2278_v22 = vrot.slane %v2154_v31, 1  ;;  %v6754_v31 = vmul.f32 %v6569_v8, %v6560_v60  ;;  %v9399_v50 = vrot.slane %v6731_v25, 1 }
 0x316   : > { %2336 = vrot.lane.b32.xlu0 %v2270_v36, %s5600_s28  ;;  %v6721_v63 = vpop.permute.xlu0 %3632  ;;  %v6723_v33 = vpop.permute.xlu1 %3624  ;;  %v9651_v36 = vrot.slane %v6592_v38, 1  ;;  %v9653_v38 = vrot.slane %v6703_v61, 1 }
 0x317   : > { %v2800_v27 = vrot.slane %v2681_v17, 1 }
 0x318   : > { %v2275_v59 = vsel %vm1737_vm0, %v2273_v1, %v9651_v36  ;;  %v2796_v1 = vsel %vm1737_vm0, %v9653_v38, %v2795_v6  ;;  %v6763_v36 = vld [vmem:[%s5772_s27 + $0xc0] sm:$0xff]  ;;  %v6779_v38 = vmul.f32 %v6588_v44, %v6580_v13 }
 0x319   : > { %2860 = vrot.lane.b32.xlu1 %v2791_v54, %s5601_s29  ;;  %v2283_v54 = vrot.slane %v2157_v56, 1  ;;  %v2805_v56 = vrot.slane %v2684_v51, 1  ;;  %v9656_v51 = vrot.slane %v6636_v30, 1  ;;  %v9658_v30 = vrot.slane %v6754_v31, 1 }
 0x31a   : > { %v6747_v45 = vpop.permute.xlu0 %3640  ;;  %2340 = vrot.lane.b32.xlu0 %v2275_v59, %s5600_s28  ;;  %v6750_v16 = vpop.permute.xlu1 %3628  ;;  %v2670_v59 = vmul.f32 %v6763_v36, %v6545_v58  ;;  %v2687_v58 = vmul.f32 %v6580_v13, %v6584_v40 }
 0x31b   : > { %9652 = vst [vmem:[#allocation5_spill] sm:$0xff] %v6747_v45  ;;  %v9654_v45 = vrot.slane %v6613_v28, 1  ;;  %v2801_v28 = vsel %vm1737_vm0, %v9399_v50, %v2800_v27  ;;  %v6802_v27 = vmul.f32 %v6609_v20, %v6578_v46  ;;  %v6811_v50 = vld [vmem:[%s5772_s27 + $0xf0] sm:$0xff] }
 0x31d   : > { %2864 = vrot.lane.b32.xlu1 %v2796_v1, %s5601_s29  ;;  %v2280_v4 = vsel %vm1737_vm0, %v2278_v22, %v9654_v45  ;;  %v2782_v45 = vrot.slane %v2670_v59, 1  ;;  %v6787_v22 = vld [vmem:[%s5772_s27 + $0xd8] sm:$0xff]  ;;  %v2285_v1 = vsel %vm1737_vm0, %v2283_v54, %v9656_v51  ;;  %v2690_v59 = vmul.f32 %v6578_v46, %v6606_v7 }
 0x31e   : > { %v6771_v8 = vpop.permute.xlu0 %3648  ;;  %2344 = vrot.lane.b32.xlu0 %v2280_v4, %s5600_s28  ;;  %v6774_v17 = vpop.permute.xlu1 %3636  ;;  %v2673_v4 = vmul.f32 %v6787_v22, %v6549_v15  ;;  %v9404_v15 = vrot.slane %v6779_v38, 1  ;;  %v2806_v54 = vsel %vm1737_vm0, %v9658_v30, %v2805_v56  ;;  %v6827_v30 = vmul.f32 %v6632_v29, %v6602_v34 }
 0x31f   : > { %9655 = vst [vmem:[#allocation6_spill] sm:$0xff] %v6771_v8 }
 0x320   : > { %v2787_v51 = vrot.slane %v2673_v4, 1  ;;  %v2815_v4 = vrot.slane %v2690_v59, 1  ;;  %v9661_v59 = vrot.slane %v6683_v14, 1  ;;  %v9409_v14 = vrot.slane %v6827_v30, 1 }
 0x321   : > { %2868 = vrot.lane.b32.xlu1 %v2801_v28, %s5601_s29  ;;  %v2810_v28 = vrot.slane %v2687_v58, 1 }
 0x322   : > { %v6795_v6 = vpop.permute.xlu0 %3592  ;;  %2348 = vrot.lane.b32.xlu0 %v2285_v1, %s5600_s28  ;;  %v6798_v8 = vpop.permute.xlu1 %3644  ;;  %v2676_v1 = vmul.f32 %v6811_v50, %v6551_v52  ;;  %v2693_v52 = vmul.f32 %v6602_v34, %v6628_v32 }
 0x323   : > { %9657 = vst [vmem:[#allocation124_spill] sm:$0xff] %v6795_v6  ;;  %v9659_v6 = vrot.slane %v6656_v3, 1  ;;  %v2811_v3 = vsel %vm1737_vm0, %v9404_v15, %v2810_v28  ;;  %v6849_v28 = vld [vmem:[%s5772_s27 + $0x8] sm:$0xff] }
 0x324   : > { %9664 = vst [vmem:[#allocation128_spill] sm:$0xff] %v6849_v28 }
 0x325   : > { %2872 = vrot.lane.b32.xlu1 %v2806_v54, %s5601_s29  ;;  %v2784_v7 = vsel %vm1737_vm0, %v2782_v45, %v9659_v6  ;;  %v2792_v6 = vrot.slane %v2676_v1, 1  ;;  %v6835_v45 = vld [vmem:[%s5772_s27 + $0x108] sm:$0xff]  ;;  %v2789_v54 = vsel %vm1737_vm0, %v2787_v51, %v9661_v59  ;;  %v6853_v1 = vmul.f32 %v6849_v28, %v6600_v43 }
 0x326   : > { %v6819_v20 = vpop.permute.xlu0 %3600  ;;  %2854 = vrot.lane.b32.xlu0 %v2784_v7, %s5601_s29  ;;  %v6822_v58 = vpop.permute.xlu1 %3588  ;;  %v2679_v7 = vmul.f32 %v6835_v45, %v6562_v41  ;;  %v2648_v41 = vmul.f32 %v6600_v43, %v6285_v48  ;;  %v9665_v51 = vrot.slane %v6802_v27, 1 }
 0x327   : > { %9660 = vst [vmem:[#allocation125_spill] sm:$0xff] %v6819_v20 }
 0x328   : > { %v2816_v59 = vsel %vm1737_vm0, %v9665_v51, %v2815_v4  ;;  %v2797_v15 = vrot.slane %v2679_v7, 1  ;;  %v2745_v4 = vrot.slane %v2648_v41, 1  ;;  %v6874_v51 = vld [vmem:[%s5772_s27 + $0x20] sm:$0xff]  ;;  %v9667_v7 = vrot.slane %v6731_v25, 1 }
 0x329   : > { %2876 = vrot.lane.b32.xlu1 %v2811_v3, %s5601_s29  ;;  %v2820_v3 = vrot.slane %v2693_v52, 1  ;;  %v6895_v52 = vld [vmem:[%s5772_s27 + $0x38] sm:$0xff] }
 0x32a   : > { %v6843_v56 = vpop.permute.xlu0 %3608  ;;  %2858 = vrot.lane.b32.xlu0 %v2789_v54, %s5601_s29  ;;  %v6846_v20 = vpop.permute.xlu1 %3596  ;;  %v2682_v54 = vmul.f32 %v6664_v11, %v6560_v60  ;;  %v6878_v60 = vmul.f32 %v6874_v51, %v6625_v19  ;;  %v2799_v41 = vsel %vm1737_vm0, %v2797_v15, %v9667_v7  ;;  %9668 = vst [vmem:[#allocation129_spill] sm:$0xff] %v6895_v52  ;;  %v9670_v15 = vrot.slane %v6853_v1, 1 }
 0x32b   : > { %9662 = vst [vmem:[#allocation126_spill] sm:$0xff] %v6843_v56  ;;  %9663 = vst [vmem:[#allocation127_spill] sm:$0xff] %v6846_v20  ;;  %v9666_v56 = vrot.slane %v6703_v61, 1  ;;  %v2651_v61 = vmul.f32 %v6625_v19, %v6282_v62  ;;  %v6899_v62 = vmul.f32 %v6895_v52, %v6623_v23  ;;  %v2688_v7 = vmul.f32 %v6712_v10, %v6578_v46 }
 0x32d   : > { %2880 = vrot.lane.b32.xlu1 %v2816_v59, %s5601_s29  ;;  %v2794_v20 = vsel %vm1737_vm0, %v2792_v6, %v9666_v56  ;;  %v2821_v56 = vsel %vm1737_vm0, %v9409_v14, %v2820_v3  ;;  %v2802_v6 = vrot.slane %v2682_v54, 1  ;;  %v2750_v54 = vrot.slane %v2651_v61, 1 }
 0x32e   : > { %v6867_v28 = vpop.permute.xlu0 %3616  ;;  %2862 = vrot.lane.b32.xlu0 %v2794_v20, %s5601_s29  ;;  %v6870_v48 = vpop.permute.xlu1 %3604  ;;  %v2685_v20 = vmul.f32 %v6688_v5, %v6580_v13  ;;  %v2654_v13 = vmul.f32 %v6623_v23, %v6294_v47  ;;  %v9671_v14 = vrot.slane %v6754_v31, 1  ;;  %v2657_v31 = vmul.f32 %v6647_v26, %v6306_v42  ;;  %v6941_v47 = vld [vmem:[%s5772_s27 + $0x68] sm:$0xff] }
 0x32f   : > { %9675 = vst [vmem:[#allocation132_spill] sm:$0xff] %v6941_v47  ;;  %v6945_v42 = vmul.f32 %v6941_v47, %v6644_v24 }
 0x331   : > { %2884 = vrot.lane.b32.xlu1 %v2821_v56, %s5601_s29  ;;  %v2746_v56 = vsel %vm1737_vm0, %v9670_v15, %v2745_v4  ;;  %v2755_v4 = vrot.slane %v2654_v13, 1  ;;  %v6922_v15 = vld [vmem:[%s5772_s27 + $0x50] sm:$0xff]  ;;  %v9674_v13 = vrot.slane %v6779_v38, 1 }
 0x332   : > { %2866 = vrot.lane.b32.xlu0 %v2799_v41, %s5601_s29  ;;  %v6892_v59 = vpop.permute.xlu1 %3612  ;;  %v2807_v41 = vrot.slane %v2685_v20, 1  ;;  %v6926_v46 = vmul.f32 %v6922_v15, %v6647_v26  ;;  %v2812_v20 = vrot.slane %v2688_v7, 1  ;;  %v2760_v7 = vrot.slane %v2657_v31, 1 }
 0x333   : > { %v6901_v3 = vpop.permute.xlu0 %4158 }
 0x334   : > { %9669 = vst [vmem:[#allocation130_spill] sm:$0xff] %v6901_v3  ;;  %v2804_v3 = vsel %vm1737_vm0, %v2802_v6, %v9671_v14  ;;  %v9673_v14 = vrot.slane %v6878_v60, 1 }
 0x335   : > { %2824 = vrot.lane.b32.xlu1 %v2746_v56, %s5601_s29  ;;  %v2809_v56 = vsel %vm1737_vm0, %v2807_v41, %v9674_v13  ;;  %v9678_v41 = vrot.slane %v6899_v62, 1 }
 0x336   : > { %2870 = vrot.lane.b32.xlu0 %v2804_v3, %s5601_s29  ;;  %v2751_v6 = vsel %vm1737_vm0, %v9673_v14, %v2750_v54  ;;  %v2691_v3 = vmul.f32 %v6739_v37, %v6602_v34  ;;  %v2660_v34 = vmul.f32 %v6644_v24, %v6314_v57 }
 0x337   : > { %v6917_v61 = vpop.permute.xlu0 %4170  ;;  %v6919_v25 = vpop.permute.xlu1 %4154  ;;  %v2756_v14 = vsel %vm1737_vm0, %v9678_v41, %v2755_v4 }
 0x338   : > { %9672 = vst [vmem:[#allocation131_spill] sm:$0xff] %v6917_v61  ;;  %v2765_v41 = vrot.slane %v2660_v34, 1 }
 0x339   : > { %2828 = vrot.lane.b32.xlu1 %v2751_v6, %s5601_s29  ;;  %v6958_v6 = vld [vmem:[%s5772_s27] sm:$0xff] }
 0x33a   : > { %2874 = vrot.lane.b32.xlu0 %v2809_v56, %s5601_s29  ;;  %v2646_v13 = vmul.f32 %v6958_v6, %v6600_v43  ;;  %v2817_v56 = vrot.slane %v2691_v3, 1 }
 0x33b   : > { %v6947_v61 = vpop.permute.xlu0 %4178  ;;  %v6949_v54 = vpop.permute.xlu1 %4162 }
 0x33c   : > { %9676 = vst [vmem:[#allocation133_spill] sm:$0xff] %v6947_v61  ;;  %9677 = vst [vmem:[#allocation134_spill] sm:$0xff] %v6949_v54  ;;  %v9679_v61 = vrot.slane %v6802_v27, 1  ;;  %v6973_v54 = vld [vmem:[%s5772_s27 + $0x80] sm:$0xff]  ;;  %v2663_v27 = vmul.f32 %v6671_v9, %v6324_v55  ;;  %v2742_v3 = vrot.slane %v2646_v13, 1  ;;  %v6995_v55 = vld [vmem:[%s5772_s27 + $0x98] sm:$0xff] }
 0x33d   : > { %2832 = vrot.lane.b32.xlu1 %v2756_v14, %s5601_s29  ;;  %9682 = vst [vmem:[#allocation137_spill] sm:$0xff] %v6973_v54  ;;  %v6977_v43 = vmul.f32 %v6973_v54, %v6671_v9  ;;  %v6985_v14 = vld [vmem:[%s5772_s27 + $0x18] sm:$0xff]  ;;  %9685 = vst [vmem:[#allocation138_spill] sm:$0xff] %v6995_v55 }
 0x33e   : > { %v2814_v57 = vsel %vm1737_vm0, %v2812_v20, %v9679_v61  ;;  %v9683_v61 = vrot.slane %v6926_v46, 1  ;;  %v2649_v34 = vmul.f32 %v6985_v14, %v6625_v19  ;;  %v2666_v19 = vmul.f32 %v6668_v35, %v6334_v49 }
 0x33f   : > { %2878 = vrot.lane.b32.xlu0 %v2814_v57, %s5601_s29  ;;  %v6968_v38 = vpop.permute.xlu0 %4122  ;;  %v6970_v4 = vpop.permute.xlu1 %4166  ;;  %v9684_v57 = vrot.slane %v6827_v30, 1 }
 0x340   : > { %9680 = vst [vmem:[#allocation135_spill] sm:$0xff] %v6968_v38  ;;  %9681 = vst [vmem:[#allocation136_spill] sm:$0xff] %v6970_v4  ;;  %v2761_v20 = vsel %vm1737_vm0, %v9683_v61, %v2760_v7  ;;  %v6999_v38 = vmul.f32 %v6995_v55, %v6668_v35  ;;  %v2770_v61 = vrot.slane %v2663_v27, 1  ;;  %v7027_v4 = vld [vmem:[%s5772_s27 + $0xb0] sm:$0xff] }
 0x341   : > { %2836 = vrot.lane.b32.xlu1 %v2761_v20, %s5601_s29  ;;  %v2819_v31 = vsel %vm1737_vm0, %v2817_v56, %v9684_v57  ;;  %v9688_v56 = vrot.slane %v6945_v42, 1  ;;  %v7012_v20 = vld [vmem:[%s5772_s27 + $0x30] sm:$0xff]  ;;  %9693 = vst [vmem:[#allocation144_spill] sm:$0xff] %v7027_v4 }
 0x342   : > { %9689 = vst [vmem:[#allocation141_spill] sm:$0xff] %v7012_v20  ;;  %v2652_v57 = vmul.f32 %v7012_v20, %v6623_v23  ;;  %v7031_v23 = vmul.f32 %v7027_v4, %v6693_v18 }
 0x343   : > { %2882 = vrot.lane.b32.xlu0 %v2819_v31, %s5601_s29  ;;  %v7001_v7 = vpop.permute.xlu0 %4130  ;;  %v7003_v13 = vpop.permute.xlu1 %4174  ;;  %v2766_v31 = vsel %vm1737_vm0, %v9688_v56, %v2765_v41  ;;  %v2775_v56 = vrot.slane %v2666_v19, 1 }
 0x344   : > { %9686 = vst [vmem:[#allocation139_spill] sm:$0xff] %v7001_v7  ;;  %9687 = vst [vmem:[#allocation140_spill] sm:$0xff] %v7003_v13  ;;  %v2747_v7 = vrot.slane %v2649_v34, 1  ;;  %v9690_v13 = vrot.slane %v6853_v1, 1  ;;  %v2669_v1 = vmul.f32 %v6693_v18, %v6344_v21  ;;  %v7050_v21 = vmul.f32 %v6652_v39, %v6696_v2 }
 0x345   : > { %2840 = vrot.lane.b32.xlu1 %v2766_v31, %s5601_s29  ;;  %v7039_v31 = vld [vmem:[%s5772_s27 + $0x48] sm:$0xff] }
 0x346   : > { %v2744_v49 = vsel %vm1737_vm0, %v2742_v3, %v9690_v13  ;;  %v9694_v3 = vrot.slane %v6977_v43, 1  ;;  %v2752_v13 = vrot.slane %v2652_v57, 1  ;;  %v2655_v19 = vmul.f32 %v7039_v31, %v6647_v26 }
 0x347   : > { %2822 = vrot.lane.b32.xlu0 %v2744_v49, %s5601_s29  ;;  %v7022_v30 = vpop.permute.xlu0 %4138  ;;  %v7024_v41 = vpop.permute.xlu1 %4182  ;;  %v9695_v49 = vrot.slane %v6878_v60, 1  ;;  %v9698_v60 = vrot.slane %v6999_v38, 1 }
 0x348   : > { %9691 = vst [vmem:[#allocation142_spill] sm:$0xff] %v7022_v30  ;;  %9692 = vst [vmem:[#allocation143_spill] sm:$0xff] %v7024_v41  ;;  %v2771_v34 = vsel %vm1737_vm0, %v9694_v3, %v2770_v61  ;;  %v3677_v61 = vmul.f32 %v6696_v2, %v6354_v12  ;;  %v2757_v30 = vrot.slane %v2655_v19, 1  ;;  %v9700_v12 = vrot.slane %v6899_v62, 1 }
 0x349   : > { %2844 = vrot.lane.b32.xlu1 %v2771_v34, %s5601_s29  ;;  %v2749_v27 = vsel %vm1737_vm0, %v2747_v7, %v9695_v49  ;;  %v2780_v34 = vrot.slane %v2669_v1, 1  ;;  %v2776_v7 = vsel %vm1737_vm0, %v9698_v60, %v2775_v56  ;;  %v9423_v1 = vrot.slane %v7050_v21, 2  ;;  %v7087_v60 = vld [vmem:[%s5772_s27 + $0x78] sm:$0xff] }
 0x34a   : > { %v3790_v26 = vrot.slane %v3677_v61, 2  ;;  %v7077_v56 = vmul.f32 %v6679_v0, %v6723_v33  ;;  %v9703_v62 = vrot.slane %v7031_v23, 1  ;;  %9704 = vst [vmem:[#allocation150_spill] sm:$0xff] %v7087_v60  ;;  %v2661_v61 = vmul.f32 %v7087_v60, %v6671_v9 }
 0x34b   : > { %2826 = vrot.lane.b32.xlu0 %v2749_v27, %s5601_s29  ;;  %v7054_v57 = vpop.permute.xlu0 %4146  ;;  %v7056_v3 = vpop.permute.xlu1 %4126  ;;  %v7063_v27 = vld [vmem:[%s5772_s27 + $0x60] sm:$0xff] }
 0x34c   : > { %9696 = vst [vmem:[#allocation145_spill] sm:$0xff] %v7054_v57  ;;  %9697 = vst [vmem:[#allocation146_spill] sm:$0xff] %v7056_v3  ;;  %v2658_v49 = vmul.f32 %v7063_v27, %v6644_v24  ;;  %v2754_v57 = vsel %vm1737_vm0, %v2752_v13, %v9700_v12  ;;  %v3680_v24 = vmul.f32 %v6723_v33, %v6364_v53 }
 0x34d   : > { %9699 = vst [vmem:[#allocation147_spill] sm:$0xff] %v7063_v27  ;;  %2848 = vrot.lane.b32.xlu1 %v2776_v7, %s5601_s29  ;;  %v2781_v13 = vsel %vm1737_vm0, %v9703_v62, %v2780_v34  ;;  %v9705_v7 = vrot.slane %v6926_v46, 1  ;;  %v3791_v34 = vsel %vm3276_vm1, %v9423_v1, %v3790_v26  ;;  %v9711_v26 = vrot.slane %v6945_v42, 1  ;;  %v9712_v1 = vld [vmem:[#allocation4_spill] sm:$0xff] }
 0x34e   : > { %v3795_v62 = vrot.slane %v3680_v24, 2  ;;  %v9716_v42 = vrot.slane %v7077_v56, 2 }
 0x34f   : > { %2830 = vrot.lane.b32.xlu0 %v2754_v57, %s5601_s29  ;;  %v7073_v3 = vpop.permute.xlu1 %4134  ;;  %v2762_v57 = vrot.slane %v2658_v49, 1  ;;  %v2759_v53 = vsel %vm1737_vm0, %v2757_v30, %v9705_v7  ;;  %v7111_v7 = vld [vmem:[%s5772_s27 + $0x90] sm:$0xff] }
 0x350   : > { %9701 = vst [vmem:[#allocation148_spill] sm:$0xff] %v7073_v3  ;;  %v7081_v19 = vpop.permute.xlu0 %3149 }
 0x351   : > { %9702 = vst [vmem:[#allocation149_spill] sm:$0xff] %v7081_v19  ;;  %2852 = vrot.lane.b32.xlu1 %v2781_v13, %s5601_s29  ;;  %v9707_v19 = vld [vmem:[#allocation3_spill] sm:$0xff]  ;;  %v2764_v24 = vsel %vm1737_vm0, %v2762_v57, %v9711_v26  ;;  %v3796_v57 = vsel %vm3276_vm1, %v9716_v42, %v3795_v62 }
 0x352   : > { %v7104_v9 = vmul.f32 %v9707_v19, %v6750_v16  ;;  %v9708_v13 = vld [vmem:[#allocation95_spill] sm:$0xff] }
 0x353   : > { %2834 = vrot.lane.b32.xlu0 %v2759_v53, %s5601_s29  ;;  %v7096_v12 = vpop.permute.xlu1 %4142  ;;  %v3683_v46 = vmul.f32 %v6750_v16, %v9708_v13  ;;  %9710 = vst [vmem:[#allocation95_spill] sm:$0xff] %v7111_v7  ;;  %v2664_v53 = vmul.f32 %v7111_v7, %v6668_v35  ;;  %v7122_v13 = vmul.f32 %v9712_v1, %v6721_v63  ;;  %v7135_v26 = vld [vmem:[%s5772_s27 + $0xa8] sm:$0xff] }
 0x354   : > { %9706 = vst [vmem:[#allocation151_spill] sm:$0xff] %v7096_v12  ;;  %v7108_v30 = vpop.permute.xlu0 %3161  ;;  %v2767_v12 = vrot.slane %v2661_v61, 1 }
 0x355   : > { %9709 = vst [vmem:[#allocation3_spill] sm:$0xff] %v7108_v30  ;;  %3861 = vrot.lane.b32.xlu1 %v3791_v34, %s5600_s28  ;;  %v9714_v30 = vld [vmem:[#allocation119_spill] sm:$0xff]  ;;  %v3800_v61 = vrot.slane %v3683_v46, 2  ;;  %v2772_v34 = vrot.slane %v2664_v53, 1  ;;  %v9719_v53 = vld [vmem:[#allocation120_spill] sm:$0xff]  ;;  %v9724_v46 = vld [vmem:[#allocation5_spill] sm:$0xff] }
 0x356   : > { %v3686_v3 = vmul.f32 %v6721_v63, %v9714_v30  ;;  %v3689_v42 = vmul.f32 %v6774_v17, %v9719_v53 }
 0x357   : > { %2838 = vrot.lane.b32.xlu0 %v2764_v24, %s5601_s29  ;;  %v7124_v49 = vpop.permute.xlu1 %4150  ;;  %v2667_v24 = vmul.f32 %v7135_v26, %v6693_v18 }
 0x358   : > { %9713 = vst [vmem:[#allocation4_spill] sm:$0xff] %v7124_v49  ;;  %v7129_v41 = vpop.permute.xlu0 %3169  ;;  %v9717_v49 = vrot.slane %v6977_v43, 1  ;;  %v3805_v35 = vrot.slane %v3686_v3, 2  ;;  %v9722_v43 = vrot.slane %v7104_v9, 2  ;;  %v9723_v3 = vrot.slane %v6999_v38, 1 }
 0x359   : > { %9715 = vst [vmem:[#allocation152_spill] sm:$0xff] %v7129_v41  ;;  %3865 = vrot.lane.b32.xlu1 %v3796_v57, %s5600_s28  ;;  %v9718_v41 = vld [vmem:[#allocation121_spill] sm:$0xff]  ;;  %v9727_v38 = vrot.slane %v7122_v13, 2 }
 0x35a   : > { %v2769_v30 = vsel %vm1737_vm0, %v2767_v12, %v9717_v49  ;;  %v7147_v62 = vmul.f32 %v9718_v41, %v6774_v17  ;;  %v3801_v12 = vsel %vm3276_vm1, %v9722_v43, %v3800_v61  ;;  %v2777_v49 = vrot.slane %v2667_v24, 1 }
 0x35b   : > { %2842 = vrot.lane.b32.xlu0 %v2769_v30, %s5601_s29  ;;  %v3675_v30 = vmul.f32 %v6763_v36, %v6696_v2  ;;  %v2774_v57 = vsel %vm1737_vm0, %v2772_v34, %v9723_v3  ;;  %v3810_v24 = vrot.slane %v3689_v42, 2  ;;  %v3806_v34 = vsel %vm3276_vm1, %v9727_v38, %v3805_v35  ;;  %v9730_v35 = vld [vmem:[#allocation122_spill] sm:$0xff] }
 0x35c   : > { %v7151_v7 = vpop.permute.xlu0 %3177  ;;  %v7153_v18 = vpop.permute.xlu1 %3153  ;;  %v3678_v3 = vmul.f32 %v6787_v22, %v6723_v33 }
 0x35d   : > { %9720 = vst [vmem:[#allocation121_spill] sm:$0xff] %v7151_v7  ;;  %9721 = vst [vmem:[#allocation120_spill] sm:$0xff] %v7153_v18  ;;  %3869 = vrot.lane.b32.xlu1 %v3801_v12, %s5600_s28  ;;  %v7167_v7 = vmul.f32 %v6588_v44, %v9724_v46  ;;  %v3692_v18 = vmul.f32 %v9724_v46, %v6584_v40  ;;  %v3787_v12 = vrot.slane %v3675_v30, 2 }
 0x35e   : > { %v3695_v30 = vmul.f32 %v6798_v8, %v9730_v35 }
 0x35f   : > { %2846 = vrot.lane.b32.xlu0 %v2774_v57, %s5601_s29  ;;  %v9728_v57 = vrot.slane %v7031_v23, 1  ;;  %v9437_v42 = vrot.slane %v7167_v7, 2  ;;  %v3815_v61 = vrot.slane %v3692_v18, 2  ;;  %v9733_v23 = vrot.slane %v7147_v62, 2 }
 0x360   : > { %v7172_v43 = vpop.permute.xlu0 %3121  ;;  %v7174_v2 = vpop.permute.xlu1 %3157  ;;  %v9734_v18 = vrot.slane %v7050_v21, 2 }
 0x361   : > { %9725 = vst [vmem:[#allocation5_spill] sm:$0xff] %v7172_v43  ;;  %9726 = vst [vmem:[#allocation153_spill] sm:$0xff] %v7174_v2  ;;  %3873 = vrot.lane.b32.xlu1 %v3806_v34, %s5600_s28  ;;  %v2779_v40 = vsel %vm1737_vm0, %v2777_v49, %v9728_v57  ;;  %v9729_v2 = vld [vmem:[#allocation123_spill] sm:$0xff]  ;;  %v3811_v49 = vsel %vm3276_vm1, %v9733_v23, %v3810_v24  ;;  %v3792_v34 = vrot.slane %v3678_v3, 2  ;;  %v3820_v23 = vrot.slane %v3695_v30, 2  ;;  %v9744_v30 = vld [vmem:[#allocation124_spill] sm:$0xff] }
 0x362   : > { %v7189_v43 = vmul.f32 %v9729_v2, %v6798_v8  ;;  %v3681_v57 = vmul.f32 %v6811_v50, %v6750_v16  ;;  %v3789_v2 = vsel %vm3276_vm1, %v3787_v12, %v9734_v18  ;;  %v3816_v21 = vsel %vm3276_vm1, %v9437_v42, %v3815_v61  ;;  %v7234_v61 = vld [vmem:[%s5772_s27 + $0x10] sm:$0x3] }
 0x363   : > { %2850 = vrot.lane.b32.xlu0 %v2779_v40, %s5601_s29  ;;  %v9735_v40 = vld [vmem:[#allocation6_spill] sm:$0xff]  ;;  %v3684_v12 = vmul.f32 %v6835_v45, %v6721_v63  ;;  %v3653_v63 = vmul.f32 %v7234_v61, %v6822_v58 }
 0x364   : > { %v7193_v38 = vpop.permute.xlu0 %3129  ;;  %v7195_v33 = vpop.permute.xlu1 %3165  ;;  %v7209_v35 = vmul.f32 %v6632_v29, %v9735_v40  ;;  %v3698_v24 = vmul.f32 %v9735_v40, %v6628_v32  ;;  %v3797_v18 = vrot.slane %v3681_v57, 2 }
 0x365   : > { %9731 = vst [vmem:[#allocation123_spill] sm:$0xff] %v7193_v38  ;;  %9732 = vst [vmem:[#allocation122_spill] sm:$0xff] %v7195_v33  ;;  %3877 = vrot.lane.b32.xlu1 %v3811_v49, %s5600_s28 }
 0x366   : > { %v3825_v3 = vrot.slane %v3698_v24, 2  ;;  %v3687_v24 = vmul.f32 %v6664_v11, %v6774_v17  ;;  %v3750_v17 = vrot.slane %v3653_v63, 2 }
 0x367   : > { %3859 = vrot.lane.b32.xlu0 %v3789_v2, %s5600_s28  ;;  %v9738_v2 = vrot.slane %v7077_v56, 2 }
 0x368   : > { %v7214_v16 = vpop.permute.xlu0 %3137  ;;  %v7216_v49 = vpop.permute.xlu1 %3173 }
 0x369   : > { %9736 = vst [vmem:[#allocation6_spill] sm:$0xff] %v7214_v16  ;;  %9737 = vst [vmem:[#allocation154_spill] sm:$0xff] %v7216_v49  ;;  %3881 = vrot.lane.b32.xlu1 %v3816_v21, %s5600_s28  ;;  %v3794_v32 = vsel %vm3276_vm1, %v3792_v34, %v9738_v2  ;;  %v9739_v16 = vld [vmem:[#allocation128_spill] sm:$0xff]  ;;  %v9742_v34 = vrot.slane %v7189_v43, 2  ;;  %v3802_v2 = vrot.slane %v3684_v12, 2 }
 0x36a   : > { %v7231_v49 = vmul.f32 %v9739_v16, %v6822_v58 }
 0x36b   : > { %3863 = vrot.lane.b32.xlu0 %v3794_v32, %s5600_s28  ;;  %v3821_v21 = vsel %vm3276_vm1, %v9742_v34, %v3820_v23  ;;  %v9743_v32 = vrot.slane %v7104_v9, 2  ;;  %v9746_v9 = vrot.slane %v7209_v35, 2  ;;  %v3807_v34 = vrot.slane %v3687_v24, 2 }
 0x36c   : > { %v7238_v57 = vpop.permute.xlu0 %3145  ;;  %v7240_v56 = vpop.permute.xlu1 %3117 }
 0x36d   : > { %9740 = vst [vmem:[#allocation128_spill] sm:$0xff] %v7238_v57  ;;  %9741 = vst [vmem:[#allocation155_spill] sm:$0xff] %v7240_v56  ;;  %3885 = vrot.lane.b32.xlu1 %v3821_v21, %s5600_s28  ;;  %v3799_v42 = vsel %vm3276_vm1, %v3797_v18, %v9743_v32  ;;  %v7254_v57 = vmul.f32 %v6874_v51, %v9744_v30  ;;  %v7257_v56 = vld [vmem:[%s5772_s27 + $0x28] sm:$0x3]  ;;  %v3826_v18 = vsel %vm3276_vm1, %v9746_v9, %v3825_v3 }
 0x36e   : > { %v3656_v23 = vmul.f32 %v7257_v56, %v9744_v30  ;;  %v9748_v32 = vrot.slane %v7122_v13, 2  ;;  %v9752_v13 = vrot.slane %v7231_v49, 2 }
 0x36f   : > { %3867 = vrot.lane.b32.xlu0 %v3799_v42, %s5600_s28  ;;  %v3690_v42 = vmul.f32 %v6688_v5, %v9724_v46  ;;  %v7282_v46 = vld [vmem:[%s5772_s27 + $0x40] sm:$0x3] }
 0x370   : > { %v7262_v12 = vpop.permute.xlu1 %3125  ;;  %v3804_v38 = vsel %vm3276_vm1, %v3802_v2, %v9748_v32  ;;  %v3755_v11 = vrot.slane %v3656_v23, 2  ;;  %v3751_v2 = vsel %vm3276_vm1, %v9752_v13, %v3750_v17  ;;  %v9754_v32 = vrot.slane %v7147_v62, 2  ;;  %v7305_v17 = vld [vmem:[%s5772_s27 + $0x58] sm:$0x3] }
 0x371   : > { %9745 = vst [vmem:[#allocation124_spill] sm:$0xff] %v7262_v12  ;;  %v7269_v21 = vpop.permute.xlu0 %440  ;;  %3889 = vrot.lane.b32.xlu1 %v3826_v18, %s5600_s28  ;;  %v9749_v12 = vld [vmem:[#allocation127_spill] sm:$0xff]  ;;  %v3812_v18 = vrot.slane %v3690_v42, 2  ;;  %v9758_v62 = vrot.slane %v7254_v57, 2 }
 0x372   : > { %9747 = vst [vmem:[#allocation156_spill] sm:$0xff] %v7269_v21  ;;  %v7279_v3 = vmul.f32 %v6895_v52, %v9749_v12  ;;  %9750 = vst [vmem:[#allocation127_spill] sm:$0xff] %v7282_v46  ;;  %v3659_v24 = vmul.f32 %v7282_v46, %v9749_v12  ;;  %v3809_v63 = vsel %vm3276_vm1, %v3807_v34, %v9754_v32  ;;  %v9755_v21 = vld [vmem:[#allocation125_spill] sm:$0xff] }
 0x373   : > { %3871 = vrot.lane.b32.xlu0 %v3804_v38, %s5600_s28  ;;  %v3693_v38 = vmul.f32 %v6712_v10, %v6798_v8  ;;  %9756 = vst [vmem:[#allocation125_spill] sm:$0xff] %v7305_v17  ;;  %v3662_v8 = vmul.f32 %v7305_v17, %v9755_v21  ;;  %v3756_v34 = vsel %vm3276_vm1, %v9758_v62, %v3755_v11  ;;  %v9811_v17 = vld [vmem:[#allocation28_spill] sm:$0xff] }
 0x374   : > { %v7286_v9 = vpop.permute.xlu1 %3133  ;;  %v3760_v42 = vrot.slane %v3659_v24, 2  ;;  %v7327_v11 = vmul.f32 %v6941_v47, %v6870_v48 }
 0x375   : > { %9751 = vst [vmem:[#allocation157_spill] sm:$0xff] %v7286_v9  ;;  %v7293_v23 = vpop.permute.xlu0 %444  ;;  %3829 = vrot.lane.b32.xlu1 %v3751_v2, %s5600_s28  ;;  %v7302_v9 = vmul.f32 %v6922_v15, %v9755_v21  ;;  %v3817_v2 = vrot.slane %v3693_v38, 2  ;;  %v3765_v10 = vrot.slane %v3662_v8, 2 }
 0x376   : > { %9753 = vst [vmem:[#allocation158_spill] sm:$0xff] %v7293_v23  ;;  %v9760_v23 = vrot.slane %v7167_v7, 2  ;;  %v9763_v7 = vrot.slane %v7279_v3, 2 }
 0x377   : > { %3875 = vrot.lane.b32.xlu0 %v3809_v63, %s5600_s28  ;;  %v3696_v63 = vmul.f32 %v6739_v37, %v9735_v40  ;;  %v7330_v40 = vld [vmem:[%s5772_s27 + $0x70] sm:$0x3] }
 0x378   : > { %v7310_v13 = vpop.permute.xlu1 %3141  ;;  %v3814_v33 = vsel %vm3276_vm1, %v3812_v18, %v9760_v23  ;;  %9761 = vst [vmem:[#allocation161_spill] sm:$0xff] %v7330_v40  ;;  %v3665_v38 = vmul.f32 %v7330_v40, %v6870_v48  ;;  %v3761_v18 = vsel %vm3276_vm1, %v9763_v7, %v3760_v42  ;;  %v7353_v42 = vld [vmem:[%s5772_s27 + $0x88] sm:$0x3] }
 0x379   : > { %9757 = vst [vmem:[#allocation159_spill] sm:$0xff] %v7310_v13  ;;  %v7317_v32 = vpop.permute.xlu0 %456  ;;  %3833 = vrot.lane.b32.xlu1 %v3756_v34, %s5600_s28  ;;  %v3822_v23 = vrot.slane %v3696_v63, 2  ;;  %v9765_v34 = vrot.slane %v7189_v43, 2  ;;  %v9766_v13 = vld [vmem:[#allocation126_spill] sm:$0xff]  ;;  %v9769_v43 = vrot.slane %v7302_v9, 2 }
 0x37a   : > { %9759 = vst [vmem:[#allocation160_spill] sm:$0xff] %v7317_v32  ;;  %9767 = vst [vmem:[#allocation126_spill] sm:$0xff] %v7353_v42  ;;  %v3770_v7 = vrot.slane %v3665_v38, 2  ;;  %v9771_v32 = vrot.slane %v7209_v35, 2  ;;  %v9774_v35 = vrot.slane %v7327_v11, 2 }
 0x37b   : > { %3879 = vrot.lane.b32.xlu0 %v3814_v33, %s5600_s28  ;;  %v3651_v33 = vmul.f32 %v6958_v6, %v6822_v58  ;;  %v3819_v24 = vsel %vm3276_vm1, %v3817_v2, %v9765_v34  ;;  %v3668_v58 = vmul.f32 %v7353_v42, %v9766_v13  ;;  %v3766_v2 = vsel %vm3276_vm1, %v9769_v43, %v3765_v10 }
 0x37c   : > { %v7334_v62 = vpop.permute.xlu1 %2334  ;;  %v3824_v40 = vsel %vm3276_vm1, %v3822_v23, %v9771_v32  ;;  %v7375_v10 = vmul.f32 %v6995_v55, %v6892_v59  ;;  %v3771_v32 = vsel %vm3276_vm1, %v9774_v35, %v3770_v7  ;;  %v7401_v7 = vld [vmem:[%s5772_s27 + $0xb8] sm:$0x3] }
 0x37d   : > { %9762 = vst [vmem:[#allocation162_spill] sm:$0xff] %v7334_v62  ;;  %v7341_v8 = vpop.permute.xlu0 %464  ;;  %3837 = vrot.lane.b32.xlu1 %v3761_v18, %s5600_s28  ;;  %v7350_v62 = vmul.f32 %v6973_v54, %v9766_v13  ;;  %v3747_v34 = vrot.slane %v3651_v33, 2  ;;  %v3775_v63 = vrot.slane %v3668_v58, 2  ;;  %9777 = vst [vmem:[#allocation169_spill] sm:$0xff] %v7401_v7 }
 0x37e   : > { %9764 = vst [vmem:[#allocation163_spill] sm:$0xff] %v7341_v8 }
 0x37f   : > { %3883 = vrot.lane.b32.xlu0 %v3819_v24, %s5600_s28  ;;  %v3654_v24 = vmul.f32 %v6985_v14, %v9744_v30  ;;  %v7378_v30 = vld [vmem:[%s5772_s27 + $0xa0] sm:$0x3] }
 0x380   : > { %v7358_v18 = vpop.permute.xlu1 %2338  ;;  %9772 = vst [vmem:[#allocation166_spill] sm:$0xff] %v7378_v30  ;;  %v3671_v33 = vmul.f32 %v7378_v30, %v6892_v59 }
 0x381   : > { %9768 = vst [vmem:[#allocation164_spill] sm:$0xff] %v7358_v18  ;;  %v7365_v8 = vpop.permute.xlu0 %472  ;;  %3841 = vrot.lane.b32.xlu1 %v3766_v2, %s5600_s28  ;;  %v3752_v23 = vrot.slane %v3654_v24, 2  ;;  %v9776_v2 = vrot.slane %v7231_v49, 2  ;;  %v7398_v18 = vmul.f32 %v7027_v4, %v6867_v28  ;;  %v9779_v49 = vrot.slane %v7350_v62, 2 }
 0x382   : > { %9770 = vst [vmem:[#allocation165_spill] sm:$0xff] %v7365_v8  ;;  %v3780_v35 = vrot.slane %v3671_v33, 2  ;;  %v9781_v8 = vrot.slane %v7254_v57, 2  ;;  %v9784_v57 = vrot.slane %v7375_v10, 2  ;;  %v9787_v33 = vld [vmem:[#allocation7_spill] sm:$0xff] }
 0x383   : > { %3887 = vrot.lane.b32.xlu0 %v3824_v40, %s5600_s28  ;;  %v3657_v40 = vmul.f32 %v7012_v20, %v9749_v12  ;;  %v3749_v38 = vsel %vm3276_vm1, %v3747_v34, %v9776_v2  ;;  %v3674_v12 = vmul.f32 %v7401_v7, %v6867_v28  ;;  %v3776_v34 = vsel %vm3276_vm1, %v9779_v49, %v3775_v63  ;;  %v7426_v49 = vld [vmem:[%s5772_s27 + $0xd0] sm:$0x3] }
 0x384   : > { %v7382_v43 = vpop.permute.xlu1 %2342  ;;  %v7423_v63 = vmul.f32 %v6652_v39, %v6919_v25  ;;  %9782 = vst [vmem:[#allocation172_spill] sm:$0xff] %v7426_v49  ;;  %v9786_v39 = vrot.slane %v7279_v3, 2  ;;  %v9794_v55 = vrot.slane %v7398_v18, 2  ;;  %v3666_v7 = vmul.f32 %v7087_v60, %v9766_v13 }
 0x385   : > { %9773 = vst [vmem:[#allocation167_spill] sm:$0xff] %v7382_v43  ;;  %v7389_v58 = vpop.permute.xlu0 %480  ;;  %3845 = vrot.lane.b32.xlu1 %v3771_v32, %s5600_s28  ;;  %v3757_v2 = vrot.slane %v3657_v40, 2  ;;  %v3785_v24 = vrot.slane %v3674_v12, 2 }
 0x386   : > { %9775 = vst [vmem:[#allocation168_spill] sm:$0xff] %v7389_v58  ;;  %v3754_v58 = vsel %vm3276_vm1, %v3752_v23, %v9781_v8  ;;  %v3781_v8 = vsel %vm3276_vm1, %v9784_v57, %v3780_v35 }
 0x387   : > { %3827 = vrot.lane.b32.xlu0 %v3749_v38, %s5600_s28  ;;  %v3660_v38 = vmul.f32 %v7039_v31, %v9755_v21  ;;  %v4211_v21 = vmul.f32 %v7426_v49, %v6919_v25 }
 0x388   : > { %v7406_v32 = vpop.permute.xlu1 %2346 }
 0x389   : > { %9778 = vst [vmem:[#allocation170_spill] sm:$0xff] %v7406_v32  ;;  %v7413_v43 = vpop.permute.xlu0 %488  ;;  %3849 = vrot.lane.b32.xlu1 %v3776_v34, %s5600_s28  ;;  %v3762_v23 = vrot.slane %v3660_v38, 2  ;;  %v3759_v34 = vsel %vm3276_vm1, %v3757_v2, %v9786_v39  ;;  %v507_v32 = vmul.f32 %v7012_v20, %v9787_v33  ;;  %v9789_v38 = vld [vmem:[#allocation9_spill] sm:$0xff]  ;;  %v9790_v2 = vld [vmem:[#allocation130_spill] sm:$0xff]  ;;  %v7461_v39 = vld [vmem:[%s5772_s27 + $0xe8] sm:$0x3] }
 0x38a   : > { %9780 = vst [vmem:[#allocation171_spill] sm:$0xff] %v7413_v43  ;;  %v9788_v43 = vld [vmem:[#allocation8_spill] sm:$0xff]  ;;  %v521_v57 = vmul.f32 %v6787_v22, %v9789_v38  ;;  %v522_v3 = vmul.f32 %v6679_v0, %v9789_v38  ;;  %9791 = vst [vmem:[#allocation7_spill] sm:$0xff] %v7461_v39  ;;  %v4324_v49 = vrot.slane %v4211_v21, 2  ;;  %v3786_v38 = vsel %vm3276_vm1, %v9794_v55, %v3785_v24 }
 0x38b   : > { %3831 = vrot.lane.b32.xlu0 %v3754_v58, %s5600_s28  ;;  %v3663_v58 = vmul.f32 %v7063_v27, %v6870_v48  ;;  %v513_v35 = vmul.f32 %v7087_v60, %v9788_v43  ;;  %v514_v48 = vmul.f32 %v6973_v54, %v9788_v43  ;;  %v9796_v21 = vrot.slane %v7302_v9, 2  ;;  %v9798_v24 = vld [vmem:[#allocation12_spill] sm:$0xff]  ;;  %v7504_v54 = vld [vmem:[%s5772_s27 + $0x100] sm:$0x3] }
 0x38c   : > { %v7430_v40 = vpop.permute.xlu1 %2350  ;;  %v526_v13 = vmul.f32 %v9712_v1, %v9798_v24  ;;  %9802 = vst [vmem:[#allocation130_spill] sm:$0xff] %v7504_v54  ;;  %v9807_v60 = vrot.slane %v7327_v11, 2 }
 0x38d   : > { %9783 = vst [vmem:[#allocation173_spill] sm:$0xff] %v7430_v40  ;;  %v7437_v12 = vpop.permute.xlu0 %496  ;;  %3853 = vrot.lane.b32.xlu1 %v3781_v8, %s5600_s28  ;;  %v508_v40 = vmul.f32 %v6895_v52, %v9787_v33  ;;  %v7458_v8 = vmul.f32 %v6679_v0, %v9790_v2  ;;  %v4214_v33 = vmul.f32 %v7461_v39, %v9790_v2  ;;  %v3767_v39 = vrot.slane %v3663_v58, 2  ;;  %v9799_v58 = vld [vmem:[#allocation13_spill] sm:$0xff]  ;;  %v9809_v52 = vld [vmem:[#allocation26_spill] sm:$0xff] }
 0x38e   : > { %9785 = vst [vmem:[#allocation174_spill] sm:$0xff] %v7437_v12  ;;  %v9792_v12 = vld [vmem:[#allocation10_spill] sm:$0xff]  ;;  %v530_v9 = vmul.f32 %v6588_v44, %v9799_v58  ;;  %v961_v20 = vadd.f32 %v9809_v52, %v507_v32  ;;  %v9816_v52 = vld [vmem:[#allocation136_spill] sm:$0xff] }
 0x38f   : > { %3835 = vrot.lane.b32.xlu0 %v3759_v34, %s5600_s28  ;;  %v509_v43 = vmul.f32 %v7039_v31, %v9792_v12  ;;  %v510_v0 = vmul.f32 %v6922_v15, %v9792_v12  ;;  %v3764_v34 = vsel %vm3276_vm1, %v3762_v23, %v9796_v21  ;;  %v525_v12 = vmul.f32 %v6835_v45, %v9798_v24 }
 0x390   : > { %v7468_v30 = vpop.permute.xlu1 %2856  ;;  %v4329_v21 = vrot.slane %v4214_v33, 2  ;;  %v9815_v11 = vrot.slane %v7458_v8, 2  ;;  %v7537_v32 = vmul.f32 %v9712_v1, %v9816_v52 }
 0x391   : > { %9793 = vst [vmem:[#allocation8_spill] sm:$0xff] %v7468_v30  ;;  %v7477_v47 = vpop.permute.xlu0 %2336  ;;  %3857 = vrot.lane.b32.xlu1 %v3786_v38, %s5600_s28  ;;  %v9797_v30 = vld [vmem:[#allocation11_spill] sm:$0xff]  ;;  %v529_v38 = vmul.f32 %v6688_v5, %v9799_v58  ;;  %v9804_v5 = vrot.slane %v7423_v63, 2  ;;  %v3772_v58 = vrot.slane %v3666_v7, 2 }
 0x392   : > { %9795 = vst [vmem:[#allocation9_spill] sm:$0xff] %v7477_v47  ;;  %v517_v27 = vmul.f32 %v7135_v26, %v9797_v30  ;;  %v518_v55 = vmul.f32 %v7027_v4, %v9797_v30  ;;  %v9800_v47 = vld [vmem:[#allocation14_spill] sm:$0xff]  ;;  %v9813_v7 = vld [vmem:[#allocation31_spill] sm:$0xff] }
 0x393   : > { %3839 = vrot.lane.b32.xlu0 %v3764_v34, %s5600_s28  ;;  %v533_v30 = vmul.f32 %v6739_v37, %v9800_v47  ;;  %v9801_v4 = vld [vmem:[#allocation134_spill] sm:$0xff]  ;;  %v4325_v44 = vsel %vm3276_vm1, %v9804_v5, %v4324_v49  ;;  %v534_v33 = vmul.f32 %v6632_v29, %v9800_v47  ;;  %v9805_v37 = vld [vmem:[#allocation95_spill] sm:$0xff]  ;;  %v967_v29 = vadd.f32 %v9811_v17, %v513_v35  ;;  %v9812_v47 = vld [vmem:[#allocation32_spill] sm:$0xff] }
 0x394   : > { %v7501_v42 = vmul.f32 %v9707_v19, %v9801_v4  ;;  %v4217_v34 = vmul.f32 %v7504_v54, %v9801_v4  ;;  %v7508_v24 = vpop.permute.xlu1 %2860  ;;  %v3669_v23 = vmul.f32 %v9805_v37, %v6892_v59  ;;  %v3769_v54 = vsel %vm3276_vm1, %v3767_v39, %v9807_v60  ;;  %v9810_v49 = vld [vmem:[#allocation27_spill] sm:$0xff]  ;;  %v9814_v37 = vld [vmem:[#allocation37_spill] sm:$0xff] }
 0x395   : > { %9803 = vst [vmem:[#allocation10_spill] sm:$0xff] %v7508_v24  ;;  %v7517_v19 = vpop.permute.xlu0 %2340  ;;  %4395 = vrot.lane.b32.xlu1 %v4325_v44, %s5601_s29  ;;  %v9808_v24 = vld [vmem:[#allocation25_spill] sm:$0xff]  ;;  %v968_v5 = vadd.f32 %v9810_v49, %v514_v48  ;;  %v976_v59 = vadd.f32 %v9812_v47, %v522_v3  ;;  %v984_v44 = vadd.f32 %v9814_v37, %v530_v9  ;;  %v9817_v17 = vld [vmem:[#allocation119_spill] sm:$0xff]  ;;  %v9819_v48 = vld [vmem:[#allocation34_spill] sm:$0xff] }
 0x396   : > { %9806 = vst [vmem:[#allocation11_spill] sm:$0xff] %v7517_v19  ;;  %v962_v46 = vadd.f32 %v9808_v24, %v508_v40  ;;  %v975_v19 = vadd.f32 %v9813_v7, %v521_v57  ;;  %v4330_v60 = vsel %vm3276_vm1, %v9815_v11, %v4329_v21  ;;  %v4334_v39 = vrot.slane %v4217_v34, 2  ;;  %v9822_v34 = vld [vmem:[#allocation41_spill] sm:$0xff]  ;;  %v9823_v49 = vld [vmem:[#allocation38_spill] sm:$0xff]  ;;  %v9824_v7 = vld [vmem:[#allocation43_spill] sm:$0xff] }
 0x397   : > { %3843 = vrot.lane.b32.xlu0 %v3769_v54, %s5600_s28  ;;  %v4220_v54 = vmul.f32 %v9816_v52, %v9817_v17  ;;  %v983_v57 = vadd.f32 %v9819_v48, %v529_v38  ;;  %v3672_v3 = vmul.f32 %v7135_v26, %v6867_v28  ;;  %v3777_v9 = vrot.slane %v3669_v23, 2  ;;  %v9825_v17 = vld [vmem:[#allocation40_spill] sm:$0xff]  ;;  %v9826_v28 = vld [vmem:[#allocation45_spill] sm:$0xff]  ;;  %v9827_v48 = vld [vmem:[#allocation42_spill] sm:$0xff] }
 0x398   : > { %v7541_v35 = vpop.permute.xlu1 %2864  ;;  %v9821_v21 = vrot.slane %v7350_v62, 2  ;;  %v964_v37 = vadd.f32 %v9822_v34, %v510_v0  ;;  %v963_v47 = vadd.f32 %v9823_v49, %v509_v43  ;;  %v972_v11 = vadd.f32 %v9824_v7, %v518_v55  ;;  %v9838_v7 = vld [vmem:[#allocation54_spill] sm:$0xff] }
 0x399   : > { %9818 = vst [vmem:[#allocation12_spill] sm:$0xff] %v7541_v35  ;;  %v7546_v24 = vpop.permute.xlu0 %2344  ;;  %4399 = vrot.lane.b32.xlu1 %v4330_v60, %s5601_s29  ;;  %v971_v38 = vadd.f32 %v9825_v17, %v517_v27  ;;  %v980_v23 = vadd.f32 %v9826_v28, %v526_v13  ;;  %v979_v40 = vadd.f32 %v9827_v48, %v525_v12  ;;  %v9829_v35 = vld [vmem:[#allocation131_spill] sm:$0xff]  ;;  %v9485_v43 = vrot.slane %v7537_v32, 2 }
 0x39a   : > { %9820 = vst [vmem:[#allocation13_spill] sm:$0xff] %v7546_v24  ;;  %v3774_v1 = vsel %vm3276_vm1, %v3772_v58, %v9821_v21  ;;  %v9828_v24 = vld [vmem:[#allocation44_spill] sm:$0xff]  ;;  %v7562_v62 = vmul.f32 %v9718_v41, %v9829_v35  ;;  %v4223_v0 = vmul.f32 %v9829_v35, %v9719_v53  ;;  %v4339_v55 = vrot.slane %v4220_v54, 2  ;;  %v9832_v21 = vld [vmem:[#allocation49_spill] sm:$0xff] }
 0x39b   : > { %3847 = vrot.lane.b32.xlu0 %v3774_v1, %s5600_s28  ;;  %v987_v60 = vadd.f32 %v9828_v24, %v533_v30  ;;  %v9831_v27 = vrot.slane %v7501_v42, 2  ;;  %v988_v12 = vadd.f32 %v9832_v21, %v534_v33  ;;  %v3782_v30 = vrot.slane %v3672_v3, 2  ;;  %v9835_v1 = vld [vmem:[#allocation51_spill] sm:$0xff]  ;;  %v9837_v33 = vld [vmem:[#allocation52_spill] sm:$0xff] }
 0x39c   : > { %v7567_v58 = vpop.permute.xlu1 %2868  ;;  %v4209_v41 = vmul.f32 %v6763_v36, %v6919_v25  ;;  %v9834_v53 = vrot.slane %v7375_v10, 2  ;;  %v7582_v34 = vadd.f32 %v9835_v1, %v961_v20  ;;  %v7588_v3 = vadd.f32 %v9837_v33, %v962_v46  ;;  %v9839_v25 = vld [vmem:[#allocation57_spill] sm:$0xff]  ;;  %v9840_v10 = vld [vmem:[#allocation58_spill] sm:$0xff]  ;;  %v9842_v46 = vld [vmem:[#allocation140_spill] sm:$0xff] }
 0x39d   : > { %9830 = vst [vmem:[#allocation14_spill] sm:$0xff] %v7567_v58  ;;  %v4335_v13 = vsel %vm3276_vm1, %v9831_v27, %v4334_v39  ;;  %v7575_v24 = vpop.permute.xlu0 %2348  ;;  %v9836_v39 = vld [vmem:[#allocation53_spill] sm:$0xff]  ;;  %v7591_v36 = vadd.f32 %v9838_v7, %v964_v37  ;;  %v7595_v17 = vadd.f32 %v9839_v25, %v967_v29  ;;  %v7598_v28 = vadd.f32 %v9840_v10, %v968_v5  ;;  %v7605_v27 = vld [vmem:[%s5772_s27 + $0x140] sm:$0xff] }
 0x39e   : > { %9833 = vst [vmem:[#allocation134_spill] sm:$0xff] %v7575_v24  ;;  %4403 = vrot.lane.b32.xlu1 %v4335_v13, %s5601_s29  ;;  %v3779_v54 = vsel %vm3276_vm1, %v3777_v9, %v9834_v53  ;;  %v7585_v49 = vadd.f32 %v9836_v39, %v963_v47  ;;  %v9841_v9 = vld [vmem:[#allocation61_spill] sm:$0xff]  ;;  %v9486_v47 = vrot.slane %v7562_v62, 2  ;;  %v4344_v48 = vrot.slane %v4223_v0, 2  ;;  %v7612_v13 = vld [vmem:[%s5772_s27 + $0x148] sm:$0x3] }
 0x39f   : > { %3851 = vrot.lane.b32.xlu0 %v3779_v54, %s5600_s28  ;;  %v7601_v20 = vadd.f32 %v9841_v9, %v971_v38  ;;  %v7609_v37 = vmul.f32 %v7605_v27, %v9842_v46  ;;  %v4226_v29 = vmul.f32 %v7612_v13, %v9842_v46  ;;  %v4340_v5 = vsel %vm3276_vm1, %v9485_v43, %v4339_v55  ;;  %v9844_v38 = vld [vmem:[#allocation62_spill] sm:$0xff]  ;;  %v9847_v7 = vld [vmem:[#allocation65_spill] sm:$0xff]  ;;  %v7707_v24 = vld [vmem:[%s5772_s27 + $0x170] sm:$0xff] }
 0x3a0   : > { %v7616_v21 = vpop.permute.xlu1 %2872  ;;  %v7622_v0 = vadd.f32 %v9844_v38, %v972_v11  ;;  %v4212_v53 = vmul.f32 %v6787_v22, %v9790_v2  ;;  %v4321_v54 = vrot.slane %v4209_v41, 2  ;;  %v9846_v39 = vrot.slane %v7398_v18, 2  ;;  %v9849_v55 = vld [vmem:[#allocation66_spill] sm:$0xff]  ;;  %v9851_v11 = vld [vmem:[#allocation69_spill] sm:$0xff] }
 0x3a1   : > { %9843 = vst [vmem:[#allocation25_spill] sm:$0xff] %v7616_v21  ;;  %v7626_v1 = vpop.permute.xlu0 %2854  ;;  %v7633_v25 = vadd.f32 %v9847_v7, %v975_v19  ;;  %v7636_v10 = vadd.f32 %v9849_v55, %v976_v59  ;;  %v7639_v9 = vadd.f32 %v9851_v11, %v979_v40  ;;  %v9853_v38 = vld [vmem:[#allocation70_spill] sm:$0xff]  ;;  %v9855_v2 = vld [vmem:[#allocation73_spill] sm:$0xff]  ;;  %v4349_v7 = vrot.slane %v4226_v29, 2 }
 0x3a2   : > { %9845 = vst [vmem:[#allocation26_spill] sm:$0xff] %v7626_v1  ;;  %4407 = vrot.lane.b32.xlu1 %v4340_v5, %s5601_s29  ;;  %v3784_v33 = vsel %vm3276_vm1, %v3782_v30, %v9846_v39  ;;  %v7642_v22 = vadd.f32 %v9853_v38, %v980_v23  ;;  %v7646_v41 = vadd.f32 %v9855_v2, %v983_v57  ;;  %v9857_v18 = vld [vmem:[#allocation74_spill] sm:$0xff]  ;;  %v9859_v30 = vld [vmem:[#allocation79_spill] sm:$0xff]  ;;  %v7656_v59 = vld [vmem:[%s5772_s27 + $0x158] sm:$0xff]  ;;  %v4326_v38 = vrot.slane %v4212_v53, 2 }
 0x3a3   : > { %9848 = vst [vmem:[#allocation27_spill] sm:$0xff] %v7633_v25  ;;  %9850 = vst [vmem:[#allocation28_spill] sm:$0xff] %v7636_v10  ;;  %3855 = vrot.lane.b32.xlu0 %v3784_v33, %s5600_s28  ;;  %v7649_v5 = vadd.f32 %v9857_v18, %v984_v44  ;;  %v7653_v19 = vmul.f32 %v6958_v6, %v9859_v30  ;;  %v9860_v39 = vld [vmem:[#allocation133_spill] sm:$0xff]  ;;  %v7663_v23 = vld [vmem:[%s5772_s27 + $0x160] sm:$0x3]  ;;  %v4345_v55 = vsel %vm3276_vm1, %v9486_v47, %v4344_v48 }
 0x3a4   : > { %9852 = vst [vmem:[#allocation32_spill] sm:$0xff] %v7639_v9  ;;  %9854 = vst [vmem:[#allocation31_spill] sm:$0xff] %v7642_v22  ;;  %v7660_v40 = vmul.f32 %v7656_v59, %v9860_v39  ;;  %v4229_v33 = vmul.f32 %v7663_v23, %v9860_v39  ;;  %v7668_v44 = vpop.permute.xlu1 %2876  ;;  %v7675_v11 = vmul.f32 %v9739_v16, %v9859_v30  ;;  %v9864_v29 = vrot.slane %v7423_v63, 2  ;;  %v9865_v47 = vld [vmem:[#allocation80_spill] sm:$0xff]  ;;  %v9889_v9 = vld [vmem:[#allocation146_spill] sm:$0xff] }
 0x3a5   : > { %9856 = vst [vmem:[#allocation37_spill] sm:$0xff] %v7646_v41  ;;  %9858 = vst [vmem:[#allocation136_spill] sm:$0xff] %v7649_v5  ;;  %v4215_v2 = vmul.f32 %v6811_v50, %v9801_v4  ;;  %v7679_v18 = vpop.permute.xlu0 %2858  ;;  %v1643_v48 = vmul.f32 %v7234_v61, %v9859_v30  ;;  %v7689_v57 = vmul.f32 %v6985_v14, %v9865_v47  ;;  %v9866_v4 = vld [vmem:[#allocation77_spill] sm:$0xff]  ;;  %v1738_v30 = vrot.slane %v7653_v19, 1  ;;  %v9911_v25 = vld [vmem:[#allocation148_spill] sm:$0xff] }
 0x3a6   : > { %9861 = vst [vmem:[#allocation119_spill] sm:$0xff] %v7663_v23  ;;  %9862 = vst [vmem:[#allocation34_spill] sm:$0xff] %v7668_v44  ;;  %4411 = vrot.lane.b32.xlu1 %v4345_v55, %s5601_s29  ;;  %v4323_v43 = vsel %vm3276_vm1, %v4321_v54, %v9864_v29  ;;  %v7693_v53 = vmul.f32 %v6874_v51, %v9865_v47  ;;  %v1646_v50 = vmul.f32 %v7257_v56, %v9865_v47  ;;  %v9868_v54 = vld [vmem:[#allocation78_spill] sm:$0xff]  ;;  %v9870_v44 = vld [vmem:[#allocation143_spill] sm:$0xff] }
 0x3a7   : > { %9863 = vst [vmem:[#allocation41_spill] sm:$0xff] %v7679_v18  ;;  %4393 = vrot.lane.b32.xlu0 %v4323_v43, %s5601_s29  ;;  %v7699_v63 = vadd.f32 %v9866_v4, %v987_v60  ;;  %v7702_v55 = vadd.f32 %v9868_v54, %v988_v12  ;;  %v4354_v18 = vrot.slane %v4229_v33, 2  ;;  %v7711_v1 = vmul.f32 %v7707_v24, %v9870_v44  ;;  %v7714_v47 = vld [vmem:[%s5772_s27 + $0x178] sm:$0x3] }
 0x3a8   : > { %v4232_v60 = vmul.f32 %v7714_v47, %v9870_v44  ;;  %v7718_v43 = vpop.permute.xlu1 %2880  ;;  %v9872_v12 = vrot.slane %v7609_v37, 2  ;;  %v1739_v4 = vrot.slane %v7675_v11, 1  ;;  %v4331_v33 = vrot.slane %v4215_v2, 2  ;;  %v9875_v11 = vld [vmem:[#allocation81_spill] sm:$0xff] }
 0x3a9   : > { %9867 = vst [vmem:[#allocation38_spill] sm:$0xff] %v7699_v63  ;;  %9869 = vst [vmem:[#allocation43_spill] sm:$0xff] %v7702_v55  ;;  %v4218_v54 = vmul.f32 %v6835_v45, %v9816_v52  ;;  %v7726_v29 = vpop.permute.xlu0 %2862  ;;  %v9874_v21 = vrot.slane %v7458_v8, 2  ;;  %v1743_v63 = vrot.slane %v7689_v57, 1  ;;  %v7737_v45 = vmul.f32 %v7039_v31, %v9875_v11  ;;  %v9876_v8 = vld [vmem:[#allocation125_spill] sm:$0xff]  ;;  %v7762_v55 = vld [vmem:[%s5772_s27 + $0x120] sm:$0xff] }
 0x3aa   : > { %9871 = vst [vmem:[#allocation40_spill] sm:$0xff] %v7718_v43  ;;  %v4350_v19 = vsel %vm3276_vm1, %v9872_v12, %v4349_v7  ;;  %9873 = vst [vmem:[#allocation45_spill] sm:$0xff] %v7726_v29  ;;  %v1741_v43 = vrot.slane %v1643_v48, 1  ;;  %v1744_v7 = vrot.slane %v7693_v53, 1  ;;  %v1746_v12 = vrot.slane %v1646_v50, 1  ;;  %v9880_v29 = vld [vmem:[#allocation82_spill] sm:$0xff] }
 0x3ab   : > { %4415 = vrot.lane.b32.xlu1 %v4350_v19, %s5601_s29  ;;  %v4328_v58 = vsel %vm3276_vm1, %v4326_v38, %v9874_v21  ;;  %v7741_v52 = vmul.f32 %v6922_v15, %v9875_v11  ;;  %v7745_v21 = vmul.f32 %v9876_v8, %v9875_v11  ;;  %v9877_v38 = vld [vmem:[#allocation135_spill] sm:$0xff]  ;;  %v4359_v48 = vrot.slane %v4232_v60, 2  ;;  %v9881_v41 = vld [vmem:[#allocation141_spill] sm:$0xff]  ;;  %9882 = vst [vmem:[#allocation44_spill] sm:$0xff] %v7762_v55 }
 0x3ac   : > { %4397 = vrot.lane.b32.xlu0 %v4328_v58, %s5601_s29  ;;  %v7749_v57 = vmul.f32 %v9739_v16, %v9877_v38  ;;  %v4187_v2 = vmul.f32 %v7234_v61, %v9877_v38  ;;  %v7754_v53 = vpop.permute.xlu1 %2884  ;;  %v9879_v50 = vrot.slane %v7660_v40, 2  ;;  %v1647_v11 = vmul.f32 %v9881_v41, %v9880_v29  ;;  %v9885_v58 = vld [vmem:[#allocation129_spill] sm:$0xff] }
 0x3ad   : > { %9878 = vst [vmem:[#allocation42_spill] sm:$0xff] %v7754_v53  ;;  %v4221_v16 = vmul.f32 %v7762_v55, %v9829_v35  ;;  %v4336_v5 = vrot.slane %v4218_v54, 2  ;;  %v7766_v22 = vpop.permute.xlu0 %2866  ;;  %v9884_v61 = vrot.slane %v7501_v42, 2  ;;  %v7778_v35 = vsel %vm1737_vm0, %v1739_v4, %v1741_v43 }
 0x3ae   : > { %v4355_v19 = vsel %vm3276_vm1, %v9879_v50, %v4354_v18  ;;  %9883 = vst [vmem:[#allocation131_spill] sm:$0xff] %v7766_v22  ;;  %v1648_v18 = vmul.f32 %v9885_v58, %v9880_v29  ;;  %v9886_v50 = vld [vmem:[#allocation127_spill] sm:$0xff]  ;;  %9887 = vst [vmem:[#allocation49_spill] sm:$0xff] %v7778_v35  ;;  %v7781_v54 = vsel %vm1737_vm0, %v1744_v7, %v1746_v12  ;;  %v4284_v22 = vrot.slane %v4187_v2, 2  ;;  %v7799_v35 = vld [vmem:[%s5772_s27 + $0x138] sm:$0xff] }
 0x3af   : > { %4419 = vrot.lane.b32.xlu1 %v4355_v19, %s5601_s29  ;;  %v4333_v60 = vsel %vm3276_vm1, %v4331_v33, %v9884_v61  ;;  %v1649_v53 = vmul.f32 %v9886_v50, %v9880_v29  ;;  %9888 = vst [vmem:[#allocation51_spill] sm:$0xff] %v7781_v54  ;;  %v7789_v29 = vmul.f32 %v6874_v51, %v9889_v9  ;;  %v9891_v12 = vrot.slane %v7711_v1, 2 }
 0x3b0   : > { %4401 = vrot.lane.b32.xlu0 %v4333_v60, %s5601_s29  ;;  %v4190_v43 = vmul.f32 %v7257_v56, %v9889_v9  ;;  %v7793_v60 = vpop.permute.xlu1 %2824  ;;  %v1748_v54 = vrot.slane %v1647_v11, 1  ;;  %v4341_v42 = vrot.slane %v4221_v16, 2  ;;  %v4224_v2 = vmul.f32 %v7799_v35, %v9842_v46  ;;  %v9896_v46 = vld [vmem:[#allocation83_spill] sm:$0xff]  ;;  %v9897_v16 = vld [vmem:[#allocation150_spill] sm:$0xff] }
 0x3b1   : > { %9890 = vst [vmem:[#allocation53_spill] sm:$0xff] %v7793_v60  ;;  %v4360_v19 = vsel %vm3276_vm1, %v9891_v12, %v4359_v48  ;;  %v7803_v33 = vpop.permute.xlu0 %2870  ;;  %v9893_v51 = vrot.slane %v7537_v32, 2  ;;  %v1749_v61 = vrot.slane %v1648_v18, 1  ;;  %v1751_v60 = vrot.slane %v1649_v53, 1  ;;  %v9900_v53 = vld [vmem:[#allocation139_spill] sm:$0xff] }
 0x3b2   : > { %9892 = vst [vmem:[#allocation52_spill] sm:$0xff] %v7803_v33  ;;  %v7811_v48 = vsel %vm1737_vm0, %v1738_v30, %v1739_v4  ;;  %v7814_v11 = vsel %vm1737_vm0, %v1743_v63, %v1744_v7  ;;  %v7818_v12 = vmul.f32 %v9897_v16, %v9896_v46  ;;  %v4193_v63 = vmul.f32 %v9886_v50, %v9900_v53  ;;  %v9903_v33 = vld [vmem:[#allocation84_spill] sm:$0xff] }
 0x3b3   : > { %4423 = vrot.lane.b32.xlu1 %v4360_v19, %s5601_s29  ;;  %v4338_v56 = vsel %vm3276_vm1, %v4336_v5, %v9893_v51  ;;  %9894 = vst [vmem:[#allocation54_spill] sm:$0xff] %v7811_v48  ;;  %9895 = vst [vmem:[#allocation57_spill] sm:$0xff] %v7814_v11  ;;  %v9898_v19 = vld [vmem:[#allocation137_spill] sm:$0xff]  ;;  %v9899_v5 = vld [vmem:[#allocation126_spill] sm:$0xff]  ;;  %v7830_v51 = vmul.f32 %v9885_v58, %v9900_v53  ;;  %v4289_v4 = vrot.slane %v4190_v43, 2  ;;  %v4346_v10 = vrot.slane %v4224_v2, 2 }
 0x3b4   : > { %4405 = vrot.lane.b32.xlu0 %v4338_v56, %s5601_s29  ;;  %v7822_v32 = vmul.f32 %v9898_v19, %v9896_v46  ;;  %v7826_v18 = vmul.f32 %v9899_v5, %v9896_v46  ;;  %v7835_v7 = vpop.permute.xlu1 %2828  ;;  %v9902_v56 = vrot.slane %v7749_v57, 2  ;;  %v9904_v11 = vld [vmem:[#allocation147_spill] sm:$0xff]  ;;  %v7845_v48 = vld [vmem:[%s5772_s27 + $0x150] sm:$0xff]  ;;  %v9908_v43 = vrot.slane %v7562_v62, 2 }
 0x3b5   : > { %9901 = vst [vmem:[#allocation58_spill] sm:$0xff] %v7835_v7  ;;  %v7842_v46 = vmul.f32 %v9904_v11, %v9903_v33  ;;  %9906 = vst [vmem:[#allocation140_spill] sm:$0xff] %v7845_v48  ;;  %v4227_v58 = vmul.f32 %v7845_v48, %v9860_v39  ;;  %v7849_v50 = vpop.permute.xlu0 %2874  ;;  %v9910_v11 = vld [vmem:[#allocation161_spill] sm:$0xff]  ;;  %v1750_v39 = vsel %vm1737_vm0, %v1748_v54, %v1749_v61 }
 0x3b6   : > { %v4285_v16 = vsel %vm3276_vm1, %v9902_v56, %v4284_v22  ;;  %9907 = vst [vmem:[#allocation62_spill] sm:$0xff] %v7849_v50  ;;  %v4343_v30 = vsel %vm3276_vm1, %v4341_v42, %v9908_v43  ;;  %v9909_v22 = vld [vmem:[#allocation132_spill] sm:$0xff]  ;;  %v7861_v7 = vmul.f32 %v9910_v11, %v9903_v33  ;;  %v1752_v2 = vsel %vm1737_vm0, %v1749_v61, %v1751_v60  ;;  %v7883_v42 = vld [vmem:[%s5772_s27 + $0x168] sm:$0xff]  ;;  %v9921_v43 = vld [vmem:[#allocation142_spill] sm:$0xff] }
 0x3b7   : > { %9905 = vst [vmem:[#allocation61_spill] sm:$0xff] %v7842_v46  ;;  %4363 = vrot.lane.b32.xlu1 %v4285_v16, %s5601_s29  ;;  %v7857_v56 = vmul.f32 %v9909_v22, %v9903_v33  ;;  %v4294_v50 = vrot.slane %v4193_v63, 2  ;;  %v7872_v23 = vmul.f32 %v6922_v15, %v9911_v25  ;;  %v4196_v54 = vmul.f32 %v9876_v8, %v9911_v25 }
 0x3b8   : > { %4409 = vrot.lane.b32.xlu0 %v4343_v30, %s5601_s29  ;;  %v7876_v33 = vpop.permute.xlu1 %2832  ;;  %v9913_v61 = vrot.slane %v7789_v29, 2  ;;  %v4351_v16 = vrot.slane %v4227_v58, 2  ;;  %v4230_v63 = vmul.f32 %v7883_v42, %v9870_v44  ;;  %v9915_v15 = vrot.slane %v7609_v37, 2  ;;  %v9918_v44 = vld [vmem:[#allocation85_spill] sm:$0xff]  ;;  %v9919_v37 = vld [vmem:[#allocation144_spill] sm:$0xff] }
 0x3b9   : > { %9912 = vst [vmem:[#allocation65_spill] sm:$0xff] %v7876_v33  ;;  %v7887_v62 = vpop.permute.xlu0 %2878  ;;  %v7899_v58 = vadd.f32 %v1752_v2, %v7588_v3  ;;  %v7904_v30 = vmul.f32 %v7135_v26, %v9918_v44  ;;  %v4199_v3 = vmul.f32 %v9910_v11, %v9921_v43  ;;  %v4299_v2 = vrot.slane %v4196_v54, 2  ;;  %v9925_v33 = vld [vmem:[#allocation95_spill] sm:$0xff] }
 0x3ba   : > { %v4290_v60 = vsel %vm3276_vm1, %v9913_v61, %v4289_v4  ;;  %9914 = vst [vmem:[#allocation66_spill] sm:$0xff] %v7887_v62  ;;  %v4348_v8 = vsel %vm3276_vm1, %v4346_v10, %v9915_v15  ;;  %v7896_v61 = vadd.f32 %v1750_v39, %v7582_v34  ;;  %v9920_v10 = vld [vmem:[#allocation169_spill] sm:$0xff]  ;;  %v7916_v34 = vmul.f32 %v9909_v22, %v9921_v43  ;;  %v9924_v62 = vld [vmem:[#allocation86_spill] sm:$0xff] }
 0x3bb   : > { %4367 = vrot.lane.b32.xlu1 %v4290_v60, %s5601_s29  ;;  %9917 = vst [vmem:[#allocation70_spill] sm:$0xff] %v7899_v58  ;;  %v7908_v60 = vmul.f32 %v9919_v37, %v9918_v44  ;;  %v7912_v15 = vmul.f32 %v9920_v10, %v9918_v44  ;;  %v7928_v44 = vmul.f32 %v9925_v33, %v9924_v62  ;;  %v4356_v58 = vrot.slane %v4230_v63, 2  ;;  %v9928_v39 = vld [vmem:[#allocation138_spill] sm:$0xff] }
 0x3bc   : > { %9916 = vst [vmem:[#allocation69_spill] sm:$0xff] %v7896_v61  ;;  %4413 = vrot.lane.b32.xlu0 %v4348_v8, %s5601_s29  ;;  %v7921_v26 = vpop.permute.xlu1 %2836  ;;  %v9923_v8 = vrot.slane %v7830_v51, 2  ;;  %v4185_v22 = vmul.f32 %v6958_v6, %v9877_v38  ;;  %v9927_v11 = vrot.slane %v7660_v40, 2  ;;  %v9931_v6 = vrot.slane %v7737_v45, 1  ;;  %v9934_v45 = vld [vmem:[#allocation151_spill] sm:$0xff] }
 0x3bd   : > { %9922 = vst [vmem:[#allocation73_spill] sm:$0xff] %v7921_v26  ;;  %v7932_v61 = vpop.permute.xlu0 %2882  ;;  %v7940_v26 = vmul.f32 %v9928_v39, %v9924_v62  ;;  %v9932_v63 = vrot.slane %v7745_v21, 1  ;;  %v4304_v46 = vrot.slane %v4199_v3, 2  ;;  %v4188_v3 = vmul.f32 %v6985_v14, %v9889_v9  ;;  %v7991_v14 = vld [vmem:[%s5772_s27 + $0xd8] sm:$0xff]  ;;  %v9942_v9 = vld [vmem:[#allocation87_spill] sm:$0xff] }
 0x3be   : > { %v4295_v4 = vsel %vm3276_vm1, %v9923_v8, %v4294_v50  ;;  %9926 = vst [vmem:[#allocation74_spill] sm:$0xff] %v7932_v61  ;;  %v4353_v54 = vsel %vm3276_vm1, %v4351_v16, %v9927_v11  ;;  %v9929_v50 = vld [vmem:[#allocation166_spill] sm:$0xff]  ;;  %v9930_v8 = vrot.slane %v7741_v52, 1  ;;  %v9490_v61 = vrot.slane %v7916_v34, 2  ;;  %9941 = vst [vmem:[#allocation78_spill] sm:$0xff] %v7991_v14 }
 0x3bf   : > { %4371 = vrot.lane.b32.xlu1 %v4295_v4, %s5601_s29  ;;  %v7944_v33 = vmul.f32 %v9929_v50, %v9924_v62  ;;  %v4202_v52 = vmul.f32 %v9899_v5, %v9934_v45  ;;  %v8021_v11 = vld [vmem:[%s5772_s27 + $0xc0] sm:$0xff] }
 0x3c0   : > { %v1755_v38 = vsel %vm1737_vm0, %v9931_v6, %v9930_v8  ;;  %v9933_v40 = vmov %v9930_v8  ;;  %4417 = vrot.lane.b32.xlu0 %v4353_v54, %s5601_s29  ;;  %v7963_v8 = vmul.f32 %v9898_v19, %v9934_v45  ;;  %v7967_v21 = vpop.permute.xlu1 %2840  ;;  %v9936_v54 = vrot.slane %v7872_v23, 2 }
 0x3c1   : > { %v1757_v16 = vsel %vm1737_vm0, %v9933_v40, %v9932_v63  ;;  %9935 = vst [vmem:[#allocation79_spill] sm:$0xff] %v7967_v21  ;;  %v4281_v40 = vrot.slane %v4185_v22, 2  ;;  %v7975_v62 = vpop.permute.xlu0 %2822  ;;  %v9938_v19 = vrot.slane %v7711_v1, 2  ;;  %v7995_v1 = vmul.f32 %v7991_v14, %v9942_v9 }
 0x3c2   : > { %v4300_v6 = vsel %vm3276_vm1, %v9936_v54, %v4299_v2  ;;  %9937 = vst [vmem:[#allocation133_spill] sm:$0xff] %v7975_v62  ;;  %v7984_v2 = vadd.f32 %v1755_v38, %v7585_v49  ;;  %v7987_v22 = vadd.f32 %v1757_v16, %v7591_v36  ;;  %v9944_v49 = vld [vmem:[#allocation7_spill] sm:$0xff]  ;;  %v9945_v36 = vld [vmem:[#allocation145_spill] sm:$0xff]  ;;  %v4305_v4 = vsel %vm3276_vm1, %v9490_v61, %v4304_v46  ;;  %v9950_v61 = vld [vmem:[#allocation172_spill] sm:$0xff] }
 0x3c3   : > { %4375 = vrot.lane.b32.xlu1 %v4300_v6, %s5601_s29  ;;  %v4358_v5 = vsel %vm3276_vm1, %v4356_v58, %v9938_v19  ;;  %v7998_v58 = vld [vmem:[%s5772_s27 + $0xe0] sm:$0xff]  ;;  %v8006_v38 = vmul.f32 %v9944_v49, %v9942_v9  ;;  %v8010_v16 = vmul.f32 %v9928_v39, %v9945_v36  ;;  %v4205_v6 = vmul.f32 %v9929_v50, %v9945_v36 }
 0x3c4   : > { %9939 = vst [vmem:[#allocation80_spill] sm:$0xff] %v7984_v2  ;;  %9940 = vst [vmem:[#allocation77_spill] sm:$0xff] %v7987_v22  ;;  %4421 = vrot.lane.b32.xlu0 %v4358_v5, %s5601_s29  ;;  %v8002_v54 = vmul.f32 %v7998_v58, %v9942_v9  ;;  %v4309_v5 = vrot.slane %v4202_v52, 2  ;;  %v8015_v63 = vpop.permute.xlu1 %2844  ;;  %v9947_v9 = vld [vmem:[#allocation88_spill] sm:$0xff]  ;;  %v4191_v39 = vmul.f32 %v9881_v41, %v9900_v53  ;;  %v4286_v21 = vrot.slane %v4188_v3, 2 }
 0x3c5   : > { %9943 = vst [vmem:[#allocation143_spill] sm:$0xff] %v7998_v58  ;;  %9946 = vst [vmem:[#allocation81_spill] sm:$0xff] %v8015_v63  ;;  %v8025_v62 = vmul.f32 %v8021_v11, %v9947_v9  ;;  %v8029_v50 = vpop.permute.xlu0 %2826  ;;  %v9949_v52 = vrot.slane %v7749_v57, 2  ;;  %v8036_v63 = vld [vmem:[%s5772_s27 + $0xc8] sm:$0xff]  ;;  %v8044_v14 = vmul.f32 %v9950_v61, %v9947_v9  ;;  %v9951_v41 = vrot.slane %v7822_v32, 1 }
 0x3c6   : > { %9948 = vst [vmem:[#allocation125_spill] sm:$0xff] %v8029_v50  ;;  %v8040_v46 = vmul.f32 %v8036_v63, %v9947_v9  ;;  %v9952_v53 = vrot.slane %v7818_v12, 1  ;;  %v9953_v57 = vrot.slane %v7826_v18, 1  ;;  %v4314_v49 = vrot.slane %v4205_v6, 2  ;;  %v8083_v12 = vld [vmem:[%s5772_s27 + $0x108] sm:$0xff]  ;;  %v8113_v9 = vld [vmem:[%s5772_s27 + $0xf8] sm:$0xff] }
 0x3c7   : > { %4379 = vrot.lane.b32.xlu1 %v4305_v4, %s5601_s29  ;;  %v4283_v19 = vsel %vm3276_vm1, %v4281_v40, %v9949_v52  ;;  %v9954_v40 = vmov %v9951_v41  ;;  %v4291_v50 = vrot.slane %v4191_v39, 2  ;;  %v4194_v6 = vmul.f32 %v7039_v31, %v9911_v25  ;;  %9960 = vst [vmem:[#allocation141_spill] sm:$0xff] %v8083_v12  ;;  %v8090_v39 = vld [vmem:[%s5772_s27 + $0x110] sm:$0xff]  ;;  %v8097_v25 = vld [vmem:[%s5772_s27 + $0x118] sm:$0x3]  ;;  %9964 = vst [vmem:[#allocation127_spill] sm:$0xff] %v8113_v9 }
 0x3c8   : > { %v1765_v4 = vsel %vm1737_vm0, %v9952_v53, %v9951_v41  ;;  %v1767_v3 = vsel %vm1737_vm0, %v9954_v40, %v9953_v57  ;;  %4361 = vrot.lane.b32.xlu0 %v4283_v19, %s5601_s29  ;;  %v9955_v41 = vld [vmem:[#allocation4_spill] sm:$0xff]  ;;  %v8067_v19 = vpop.permute.xlu1 %2848  ;;  %v9957_v53 = vrot.slane %v7963_v8, 2 }
 0x3c9   : > { %v8063_v18 = vmul.f32 %v9919_v37, %v9955_v41  ;;  %v4208_v32 = vmul.f32 %v9920_v10, %v9955_v41  ;;  %9956 = vst [vmem:[#allocation135_spill] sm:$0xff] %v8067_v19  ;;  %v8075_v52 = vpop.permute.xlu0 %2830  ;;  %v9959_v37 = vrot.slane %v7789_v29, 2  ;;  %v8120_v19 = vadd.f32 %v1765_v4, %v7595_v17 }
 0x3ca   : > { %v4310_v57 = vsel %vm3276_vm1, %v9957_v53, %v4309_v5  ;;  %9958 = vst [vmem:[#allocation82_spill] sm:$0xff] %v8075_v52  ;;  %v9961_v5 = vld [vmem:[#allocation89_spill] sm:$0xff] }
 0x3cb   : > { %4383 = vrot.lane.b32.xlu1 %v4310_v57, %s5601_s29  ;;  %v4288_v10 = vsel %vm3276_vm1, %v4286_v21, %v9959_v37  ;;  %v8087_v53 = vmul.f32 %v8083_v12, %v9961_v5  ;;  %v8094_v31 = vmul.f32 %v8090_v39, %v9961_v5  ;;  %v8101_v29 = vmul.f32 %v8097_v25, %v9961_v5  ;;  %v8106_v57 = vld [vmem:[%s5772_s27 + $0xf0] sm:$0xff]  ;;  %v9963_v37 = vld [vmem:[#allocation90_spill] sm:$0xff] }
 0x3cc   : > { %4365 = vrot.lane.b32.xlu0 %v4288_v10, %s5601_s29  ;;  %9962 = vst [vmem:[#allocation129_spill] sm:$0xff] %v8106_v57  ;;  %v8110_v40 = vmul.f32 %v8106_v57, %v9963_v37  ;;  %v8117_v52 = vmul.f32 %v8113_v9, %v9963_v37  ;;  %v8123_v5 = vadd.f32 %v1767_v3, %v7598_v28  ;;  %v4319_v21 = vrot.slane %v4208_v32, 2  ;;  %v8126_v58 = vpop.permute.xlu1 %2852  ;;  %v9967_v12 = vld [vmem:[#allocation130_spill] sm:$0xff] }
 0x3cd   : > { %9965 = vst [vmem:[#allocation146_spill] sm:$0xff] %v8126_v58  ;;  %v9966_v57 = vrot.slane %v8010_v16, 2  ;;  %v8133_v2 = vmul.f32 %v9967_v12, %v9963_v37  ;;  %v8136_v9 = vld [vmem:[%s5772_s27 + $0x60] sm:$0xff]  ;;  %v4296_v28 = vrot.slane %v4194_v6, 2  ;;  %v8140_v4 = vpop.permute.xlu0 %2834  ;;  %v9970_v3 = vrot.slane %v7830_v51, 2 }
 0x3ce   : > { %9968 = vst [vmem:[#allocation83_spill] sm:$0xff] %v8136_v9  ;;  %v4197_v17 = vmul.f32 %v8136_v9, %v9921_v43  ;;  %9969 = vst [vmem:[#allocation150_spill] sm:$0xff] %v8140_v4  ;;  %v1796_v37 = vrot.slane %v8101_v29, 1  ;;  %v9971_v10 = vrot.slane %v7908_v60, 1  ;;  %v9972_v43 = vrot.slane %v7904_v30, 1 }
 0x3cf   : > { %v4315_v22 = vsel %vm3276_vm1, %v9966_v57, %v4314_v49  ;;  %v4293_v32 = vsel %vm3276_vm1, %v4291_v50, %v9970_v3  ;;  %v1793_v49 = vrot.slane %v8087_v53, 1  ;;  %v1794_v57 = vrot.slane %v8094_v31, 1  ;;  %v9973_v50 = vld [vmem:[#allocation91_spill] sm:$0xff] }
 0x3d0   : > { %4387 = vrot.lane.b32.xlu1 %v4315_v22, %s5601_s29  ;;  %v1775_v6 = vsel %vm1737_vm0, %v9972_v43, %v9971_v10  ;;  %4369 = vrot.lane.b32.xlu0 %v4293_v32, %s5601_s29  ;;  %v1680_v53 = vmul.f32 %v7799_v35, %v9973_v50  ;;  %v9974_v3 = vrot.slane %v7912_v15, 1  ;;  %v9975_v31 = vmov %v9971_v10  ;;  %v9976_v32 = vld [vmem:[#allocation93_spill] sm:$0xff]  ;;  %v8172_v22 = vpop.permute.xlu1 %3861 }
 0x3d1   : > { %v1681_v30 = vmul.f32 %v7605_v27, %v9973_v50  ;;  %v1682_v10 = vmul.f32 %v7612_v13, %v9973_v50  ;;  %v8170_v43 = vmul.f32 %v7707_v24, %v9976_v32  ;;  %9977 = vst [vmem:[#allocation137_spill] sm:$0xff] %v8172_v22  ;;  %v9978_v51 = vrot.slane %v8063_v18, 2  ;;  %v8184_v4 = vpop.permute.xlu0 %2838 }
 0x3d2   : > { %v1777_v29 = vsel %vm1737_vm0, %v9975_v31, %v9974_v3  ;;  %v1688_v15 = vmul.f32 %v7714_v47, %v9976_v32  ;;  %v4301_v3 = vrot.slane %v4197_v17, 2  ;;  %v8180_v31 = vld [vmem:[%s5772_s27 + $0x78] sm:$0xff]  ;;  %9980 = vst [vmem:[#allocation139_spill] sm:$0xff] %v8184_v4  ;;  %v9981_v58 = vrot.slane %v7872_v23, 2  ;;  %v8194_v17 = vld [vmem:[%s5772_s27 + $0x128] sm:$0xff] }
 0x3d3   : > { %v4320_v60 = vsel %vm3276_vm1, %v9978_v51, %v4319_v21  ;;  %9979 = vst [vmem:[#allocation126_spill] sm:$0xff] %v8180_v31  ;;  %v4200_v50 = vmul.f32 %v8180_v31, %v9934_v45  ;;  %v1791_v9 = vrot.slane %v8133_v2, 1  ;;  %v9982_v21 = vld [vmem:[#allocation92_spill] sm:$0xff]  ;;  %9983 = vst [vmem:[#allocation84_spill] sm:$0xff] %v8194_v17  ;;  %v8199_v45 = vadd.f32 %v1775_v6, %v7601_v20 }
 0x3d4   : > { %4391 = vrot.lane.b32.xlu1 %v4320_v60, %s5601_s29  ;;  %v4298_v22 = vsel %vm3276_vm1, %v4296_v28, %v9981_v58  ;;  %v1677_v51 = vmul.f32 %v7762_v55, %v9982_v21  ;;  %v1678_v12 = vmul.f32 %v8194_v17, %v9982_v21  ;;  %v1803_v60 = vrot.slane %v1680_v53, 1  ;;  %v8203_v23 = vld [vmem:[%s5772_s27 + $0x130] sm:$0x3]  ;;  %v8218_v53 = vpop.permute.xlu1 %3865 }
 0x3d5   : > { %4373 = vrot.lane.b32.xlu0 %v4298_v22, %s5601_s29  ;;  %9984 = vst [vmem:[#allocation147_spill] sm:$0xff] %v8203_v23  ;;  %v1679_v2 = vmul.f32 %v8203_v23, %v9982_v21  ;;  %v8208_v58 = vadd.f32 %v1777_v29, %v7622_v0  ;;  %v9985_v28 = vrot.slane %v8002_v54, 1  ;;  %v9986_v4 = vrot.slane %v7995_v1, 1  ;;  %9987 = vst [vmem:[#allocation132_spill] sm:$0xff] %v8218_v53  ;;  %v8221_v21 = vld [vmem:[%s5772_s27 + $0x90] sm:$0xff]  ;;  %v8225_v23 = vpop.permute.xlu0 %2842 }
 0x3d6   : > { %v1804_v17 = vrot.slane %v1681_v30, 1  ;;  %v1806_v20 = vrot.slane %v1682_v10, 1  ;;  %v1686_v6 = vmul.f32 %v7883_v42, %v9976_v32  ;;  %v1814_v22 = vrot.slane %v8170_v43, 1  ;;  %9988 = vst [vmem:[#allocation161_spill] sm:$0xff] %v8221_v21  ;;  %9989 = vst [vmem:[#allocation148_spill] sm:$0xff] %v8225_v23  ;;  %v9991_v10 = vld [vmem:[#allocation94_spill] sm:$0xff] }
 0x3d7   : > { %v1785_v31 = vsel %vm1737_vm0, %v9986_v4, %v9985_v28  ;;  %v1816_v55 = vrot.slane %v1688_v15, 1  ;;  %v4203_v0 = vmul.f32 %v8221_v21, %v9945_v36  ;;  %v4306_v29 = vrot.slane %v4200_v50, 2  ;;  %v9992_v15 = vld [vmem:[#allocation119_spill] sm:$0xff] }
 0x3d8   : > { %v9990_v1 = vrot.slane %v7916_v34, 2  ;;  %v1798_v30 = vrot.slane %v1677_v51, 1  ;;  %v1683_v32 = vmul.f32 %v7845_v48, %v9991_v10  ;;  %v1684_v43 = vmul.f32 %v7656_v59, %v9991_v10  ;;  %v9993_v23 = vld [vmem:[#allocation27_spill] sm:$0xff] }
 0x3d9   : > { %v1685_v28 = vmul.f32 %v9992_v15, %v9991_v10  ;;  %v1799_v36 = vrot.slane %v1678_v12, 1  ;;  %v1801_v50 = vrot.slane %v1679_v2, 1  ;;  %v8238_v53 = vadd.f32 %v1785_v31, %v9993_v23  ;;  %v8248_v15 = vpop.permute.xlu1 %3869  ;;  %v8251_v2 = vld [vmem:[%s5772_s27 + $0xa8] sm:$0xff] }
 0x3da   : > { %v4303_v4 = vsel %vm3276_vm1, %v4301_v3, %v9990_v1  ;;  %v9994_v34 = vrot.slane %v8006_v38, 1  ;;  %v9995_v3 = vrot.slane %v8002_v54, 1  ;;  %v1813_v1 = vrot.slane %v1686_v6, 1  ;;  %9996 = vst [vmem:[#allocation85_spill] sm:$0xff] %v8248_v15  ;;  %9997 = vst [vmem:[#allocation144_spill] sm:$0xff] %v8251_v2  ;;  %v8256_v54 = vpop.permute.xlu0 %2846 }
 0x3db   : > { %4377 = vrot.lane.b32.xlu0 %v4303_v4, %s5601_s29  ;;  %v1795_v21 = vsel %vm1737_vm0, %v1793_v49, %v1794_v57  ;;  %v1797_v48 = vsel %vm1737_vm0, %v1794_v57, %v1796_v37  ;;  %v1807_v10 = vsel %vm1737_vm0, %v1804_v17, %v1806_v20  ;;  %v4311_v12 = vrot.slane %v4203_v0, 2  ;;  %9998 = vst [vmem:[#allocation169_spill] sm:$0xff] %v8256_v54  ;;  %v10000_v0 = vld [vmem:[#allocation28_spill] sm:$0xff] }
 0x3dc   : > { %v1787_v51 = vsel %vm1737_vm0, %v9995_v3, %v9994_v34  ;;  %v4206_v31 = vmul.f32 %v8251_v2, %v9955_v41  ;;  %v1817_v38 = vsel %vm1737_vm0, %v1814_v22, %v1816_v55  ;;  %v9999_v23 = vrot.slane %v7963_v8, 2  ;;  %v10001_v34 = vld [vmem:[#allocation32_spill] sm:$0xff]  ;;  %v10002_v41 = vld [vmem:[#allocation31_spill] sm:$0xff] }
 0x3dd   : > { %v1808_v6 = vrot.slane %v1683_v32, 1  ;;  %v1809_v57 = vrot.slane %v1684_v43, 1  ;;  %v1811_v37 = vrot.slane %v1685_v28, 1  ;;  %v1805_v20 = vsel %vm1737_vm0, %v1803_v60, %v1804_v17  ;;  %v10003_v55 = vld [vmem:[#allocation136_spill] sm:$0xff]  ;;  %v10004_v8 = vld [vmem:[#allocation43_spill] sm:$0xff]  ;;  %v10007_v28 = vld [vmem:[#allocation37_spill] sm:$0xff] }
 0x3de   : > { %v4308_v49 = vsel %vm3276_vm1, %v4306_v29, %v9999_v23  ;;  %v1869_v4 = vadd.f32 %v1787_v51, %v10000_v0  ;;  %v1872_v3 = vadd.f32 %v1795_v21, %v10001_v34  ;;  %v8266_v15 = vadd.f32 %v1797_v48, %v10002_v41  ;;  %v8285_v48 = vpop.permute.xlu1 %3873 }
 0x3df   : > { %4381 = vrot.lane.b32.xlu0 %v4308_v49, %s5601_s29  ;;  %v8269_v54 = vadd.f32 %v1807_v10, %v10003_v55  ;;  %v8272_v2 = vadd.f32 %v1817_v38, %v10004_v8  ;;  %v10005_v29 = vrot.slane %v8044_v14, 1  ;;  %v10006_v32 = vrot.slane %v8040_v46, 1  ;;  %v8295_v38 = vpop.permute.xlu0 %2850  ;;  %v10022_v55 = vld [vmem:[#allocation61_spill] sm:$0xff] }
 0x3e0   : > { %v8282_v60 = vsel %vm1737_vm0, %v1798_v30, %v1799_v36  ;;  %v1815_v21 = vsel %vm1737_vm0, %v1813_v1, %v1814_v22  ;;  %v4316_v43 = vrot.slane %v4206_v31, 2  ;;  %v8288_v51 = vadd.f32 %v1805_v20, %v10007_v28  ;;  %10009 = vst [vmem:[#allocation142_spill] sm:$0xff] %v8295_v38  ;;  %v10063_v38 = vld [vmem:[#allocation121_spill] sm:$0xff] }
 0x3e1   : > { %v8279_v17 = vsel %vm1737_vm0, %v10006_v32, %v10005_v29  ;;  %v10008_v10 = vrot.slane %v8117_v52, 1  ;;  %v10010_v23 = vrot.slane %v8010_v16, 2  ;;  %v8301_v49 = vsel %vm1737_vm0, %v1808_v6, %v1809_v57  ;;  %v10013_v16 = vld [vmem:[#allocation38_spill] sm:$0xff]  ;;  %v10020_v52 = vld [vmem:[#allocation149_spill] sm:$0xff] }
 0x3e2   : > { %v8304_v22 = vsel %vm1737_vm0, %v1799_v36, %v1801_v50  ;;  %v10011_v1 = vmov %v10006_v32  ;;  %v10012_v31 = vrot.slane %v8025_v62, 1  ;;  %v10015_v36 = vrot.slane %v8110_v40, 1  ;;  %v8359_v28 = vpop.permute.xlu1 %3877 }
 0x3e3   : > { %v8293_v14 = vsel %vm1737_vm0, %v10008_v10, %v1791_v9  ;;  %v4313_v30 = vsel %vm3276_vm1, %v4311_v12, %v10010_v23  ;;  %v8314_v9 = vsel %vm1737_vm0, %v1809_v57, %v1811_v37  ;;  %v8318_v12 = vadd.f32 %v1815_v21, %v10013_v16  ;;  %10026 = vst [vmem:[#allocation86_spill] sm:$0xff] %v8359_v28  ;;  %v10027_v23 = vld [vmem:[#allocation3_spill] sm:$0xff]  ;;  %v10031_v16 = vld [vmem:[#allocation100_spill] sm:$0xff] }
 0x3e4   : > { %v8311_v20 = vsel %vm1737_vm0, %v10012_v31, %v10011_v1  ;;  %4385 = vrot.lane.b32.xlu0 %v4313_v30, %s5601_s29  ;;  %v10014_v6 = vmov %v10008_v10  ;;  %v10016_v62 = vrot.slane %v7861_v7, 1  ;;  %v10017_v46 = vrot.slane %v7857_v56, 1  ;;  %v8367_v1 = vpop.permute.xlu0 %3859  ;;  %v10030_v31 = vld [vmem:[#allocation69_spill] sm:$0xff]  ;;  %v10082_v28 = vld [vmem:[#allocation123_spill] sm:$0xff] }
 0x3e5   : > { %v8325_v50 = vsel %vm1737_vm0, %v10015_v36, %v10014_v6  ;;  %v10018_v57 = vrot.slane %v7944_v33, 1  ;;  %v10019_v37 = vrot.slane %v7940_v26, 1  ;;  %v3204_v40 = vmul.f32 %v8021_v11, %v10020_v52  ;;  %10028 = vst [vmem:[#allocation95_spill] sm:$0xff] %v8367_v1  ;;  %v10033_v36 = vld [vmem:[#allocation70_spill] sm:$0xff] }
 0x3e6   : > { %v8332_v0 = vsel %vm1737_vm0, %v10017_v46, %v10016_v62  ;;  %v3205_v41 = vmul.f32 %v8036_v63, %v10020_v52  ;;  %v10021_v7 = vmov %v10017_v46  ;;  %v10023_v8 = vrot.slane %v10022_v55, 1  ;;  %v10034_v62 = vld [vmem:[#allocation101_spill] sm:$0xff] }
 0x3e7   : > { %v8339_v34 = vsel %vm1737_vm0, %v10019_v37, %v10018_v57  ;;  %v10024_v33 = vmov %v10019_v37  ;;  %v10025_v32 = vrot.slane %v7928_v44, 1  ;;  %v3206_v10 = vmul.f32 %v9950_v61, %v10020_v52  ;;  %v10036_v61 = vld [vmem:[#allocation80_spill] sm:$0xff]  ;;  %v10037_v57 = vld [vmem:[#allocation102_spill] sm:$0xff]  ;;  %v10041_v52 = vld [vmem:[#allocation103_spill] sm:$0xff] }
 0x3e8   : > { %v8350_v29 = vsel %vm1737_vm0, %v10023_v8, %v10021_v7  ;;  %v3214_v56 = vmul.f32 %v8090_v39, %v10027_v23  ;;  %v3215_v30 = vmul.f32 %v8097_v25, %v10027_v23  ;;  %v10029_v26 = vrot.slane %v8063_v18, 2  ;;  %v10039_v25 = vld [vmem:[#allocation141_spill] sm:$0xff]  ;;  %v10043_v7 = vld [vmem:[#allocation106_spill] sm:$0xff]  ;;  %v10045_v8 = vld [vmem:[#allocation107_spill] sm:$0xff] }
 0x3e9   : > { %v8357_v21 = vsel %vm1737_vm0, %v10025_v32, %v10024_v33  ;;  %v8374_v6 = vadd.f32 %v10031_v16, %v10030_v31  ;;  %v8378_v46 = vadd.f32 %v10034_v62, %v10033_v36  ;;  %v8382_v39 = vadd.f32 %v10037_v57, %v10036_v61  ;;  %v10040_v18 = vld [vmem:[#allocation77_spill] sm:$0xff]  ;;  %v10047_v32 = vld [vmem:[#allocation110_spill] sm:$0xff] }
 0x3ea   : > { %v4318_v44 = vsel %vm3276_vm1, %v4316_v43, %v10029_v26  ;;  %v3213_v37 = vmul.f32 %v10039_v25, %v10027_v23  ;;  %v8389_v43 = vadd.f32 %v10041_v52, %v10040_v18  ;;  %v8393_v55 = vadd.f32 %v10043_v7, %v8120_v19  ;;  %v10049_v23 = vld [vmem:[#allocation152_spill] sm:$0xff]  ;;  %v8409_v19 = vpop.permute.xlu1 %3881  ;;  %v8411_v25 = vpop.permute.xlu0 %3863  ;;  %v10055_v52 = vld [vmem:[#allocation143_spill] sm:$0xff] }
 0x3eb   : > { %10032 = vst [vmem:[#allocation138_spill] sm:$0xff] %v8374_v6  ;;  %10035 = vst [vmem:[#allocation166_spill] sm:$0xff] %v8378_v46  ;;  %4389 = vrot.lane.b32.xlu0 %v4318_v44, %s5601_s29  ;;  %v8397_v33 = vadd.f32 %v10045_v8, %v8123_v5  ;;  %v8401_v26 = vadd.f32 %v10047_v32, %v8199_v45  ;;  %v3317_v31 = vrot.slane %v3204_v40, 2  ;;  %v3318_v62 = vrot.slane %v3205_v41, 2  ;;  %v10052_v45 = vld [vmem:[#allocation111_spill] sm:$0xff]  ;;  %v10077_v6 = vld [vmem:[#allocation44_spill] sm:$0xff] }
 0x3ec   : > { %10038 = vst [vmem:[#allocation151_spill] sm:$0xff] %v8382_v39  ;;  %10042 = vst [vmem:[#allocation87_spill] sm:$0xff] %v8389_v43  ;;  %v3219_v44 = vmul.f32 %v7799_v35, %v10049_v23  ;;  %v3220_v16 = vmul.f32 %v7605_v27, %v10049_v23  ;;  %v3221_v36 = vmul.f32 %v7612_v13, %v10049_v23  ;;  %v3320_v61 = vrot.slane %v3206_v10, 2  ;;  %v10054_v35 = vld [vmem:[#allocation120_spill] sm:$0xff]  ;;  %v10056_v27 = vld [vmem:[#allocation7_spill] sm:$0xff] }
 0x3ed   : > { %10044 = vst [vmem:[#allocation145_spill] sm:$0xff] %v8393_v55  ;;  %10046 = vst [vmem:[#allocation88_spill] sm:$0xff] %v8397_v33  ;;  %v3333_v5 = vrot.slane %v3214_v56, 2  ;;  %v3335_v57 = vrot.slane %v3215_v30, 2  ;;  %v8415_v40 = vadd.f32 %v10052_v45, %v8208_v58  ;;  %v3332_v18 = vrot.slane %v3213_v37, 2  ;;  %v10057_v13 = vld [vmem:[#allocation114_spill] sm:$0xff] }
 0x3ee   : > { %10048 = vst [vmem:[#allocation172_spill] sm:$0xff] %v8401_v26  ;;  %10050 = vst [vmem:[#allocation4_spill] sm:$0xff] %v8409_v19  ;;  %v3208_v7 = vmul.f32 %v10055_v52, %v10054_v35  ;;  %v3209_v8 = vmul.f32 %v10056_v27, %v10054_v35  ;;  %v8423_v32 = vadd.f32 %v10057_v13, %v8238_v53  ;;  %v10059_v41 = vld [vmem:[#allocation115_spill] sm:$0xff]  ;;  %v10060_v56 = vld [vmem:[#allocation118_spill] sm:$0xff]  ;;  %v3342_v37 = vrot.slane %v3219_v44, 2  ;;  %v8435_v26 = vpop.permute.xlu1 %3885  ;;  %v8448_v44 = vpop.permute.xlu0 %3867 }
 0x3ef   : > { %10051 = vst [vmem:[#allocation89_spill] sm:$0xff] %v8411_v25  ;;  %10053 = vst [vmem:[#allocation90_spill] sm:$0xff] %v8415_v40  ;;  %v8426_v10 = vadd.f32 %v10059_v41, %v1869_v4  ;;  %v8429_v30 = vadd.f32 %v10060_v56, %v1872_v3  ;;  %v10062_v58 = vld [vmem:[#allocation78_spill] sm:$0xff]  ;;  %v3343_v45 = vrot.slane %v3220_v16, 2  ;;  %v3345_v52 = vrot.slane %v3221_v36, 2  ;;  %v8456_v13 = vld [vmem:[%s5772_s27 + $0x18] sm:$0xff] }
 0x3f0   : > { %10058 = vst [vmem:[#allocation91_spill] sm:$0xff] %v8423_v32  ;;  %v3207_v23 = vmul.f32 %v10062_v58, %v10054_v35  ;;  %v3226_v27 = vmul.f32 %v7707_v24, %v10063_v38  ;;  %10064 = vst [vmem:[#allocation92_spill] sm:$0xff] %v8435_v26  ;;  %v3227_v53 = vmul.f32 %v7714_v47, %v10063_v38  ;;  %v3323_v16 = vrot.slane %v3208_v7, 2  ;;  %v10071_v58 = vld [vmem:[#allocation130_spill] sm:$0xff]  ;;  %v5571_v26 = vld [vmem:[%s5772_s27 + $0x48] sm:$0xff] }
 0x3f1   : > { %10061 = vst [vmem:[#allocation93_spill] sm:$0xff] %v8429_v30  ;;  %v8440_v4 = vsel %vm3276_vm1, %v3318_v62, %v3320_v61  ;;  %v8443_v3 = vsel %vm3276_vm1, %v3333_v5, %v3335_v57  ;;  %v8446_v35 = vsel %vm3276_vm1, %v3317_v31, %v3318_v62  ;;  %10066 = vst [vmem:[#allocation27_spill] sm:$0xff] %v8448_v44  ;;  %v3325_v36 = vrot.slane %v3209_v8, 2  ;;  %v10068_v57 = vld [vmem:[#allocation5_spill] sm:$0xff]  ;;  %v10070_v62 = vld [vmem:[#allocation127_spill] sm:$0xff] }
 0x3f2   : > { %10065 = vst [vmem:[#allocation94_spill] sm:$0xff] %v8446_v35  ;;  %v3225_v24 = vmul.f32 %v7883_v42, %v10063_v38  ;;  %v8453_v47 = vsel %vm3276_vm1, %v3332_v18, %v3333_v5  ;;  %v3322_v61 = vrot.slane %v3207_v23, 2  ;;  %v3183_v41 = vmul.f32 %v8456_v13, %v10068_v57  ;;  %v10069_v31 = vld [vmem:[#allocation153_spill] sm:$0xff]  ;;  %v8469_v5 = vpop.permute.xlu1 %3889  ;;  %v8475_v23 = vld [vmem:[%s5772_s27 + $0x20] sm:$0xff]  ;;  %v8483_v25 = vpop.permute.xlu0 %3871  ;;  %v10110_v32 = vld [vmem:[#allocation124_spill] sm:$0xff] }
 0x3f3   : > { %10067 = vst [vmem:[#allocation28_spill] sm:$0xff] %v8453_v47  ;;  %v3211_v56 = vmul.f32 %v10070_v62, %v10069_v31  ;;  %v3212_v55 = vmul.f32 %v10071_v58, %v10069_v31  ;;  %v3353_v39 = vrot.slane %v3226_v27, 2  ;;  %v10072_v42 = vld [vmem:[#allocation129_spill] sm:$0xff]  ;;  %v8467_v7 = vsel %vm3276_vm1, %v3343_v45, %v3345_v52  ;;  %10074 = vst [vmem:[#allocation31_spill] sm:$0xff] %v8469_v5  ;;  %v5570_v27 = vld [vmem:[%s5772_s27 + $0x28] sm:$0x3] }
 0x3f4   : > { %v3210_v38 = vmul.f32 %v10072_v42, %v10069_v31  ;;  %10073 = vst [vmem:[#allocation32_spill] sm:$0xff] %v8467_v7  ;;  %v8472_v18 = vsel %vm3276_vm1, %v3342_v37, %v3343_v45  ;;  %v3355_v8 = vrot.slane %v3227_v53, 2  ;;  %v3184_v40 = vmul.f32 %v8475_v23, %v10068_v57  ;;  %v10076_v31 = vld [vmem:[#allocation122_spill] sm:$0xff]  ;;  %10078 = vst [vmem:[#allocation43_spill] sm:$0xff] %v8483_v25  ;;  %v10079_v37 = vld [vmem:[#allocation84_spill] sm:$0xff] }
 0x3f5   : > { %10075 = vst [vmem:[#allocation136_spill] sm:$0xff] %v8472_v18  ;;  %v3185_v58 = vmul.f32 %v5570_v27, %v10068_v57  ;;  %v3216_v52 = vmul.f32 %v10077_v6, %v10076_v31  ;;  %v3352_v5 = vrot.slane %v3225_v24, 2  ;;  %v3217_v45 = vmul.f32 %v10079_v37, %v10076_v31  ;;  %v10080_v53 = vld [vmem:[#allocation147_spill] sm:$0xff]  ;;  %v5572_v25 = vld [vmem:[%s5772_s27 + $0x50] sm:$0xff]  ;;  %v5573_v43 = vld [vmem:[%s5772_s27 + $0x58] sm:$0x3] }
 0x3f6   : > { %v3218_v19 = vmul.f32 %v10080_v53, %v10076_v31  ;;  %v8490_v1 = vsel %vm3276_vm1, %v3323_v16, %v3325_v36  ;;  %v3282_v33 = vrot.slane %v3183_v41, 2  ;;  %v3328_v44 = vrot.slane %v3211_v56, 2  ;;  %v8501_v53 = vpop.permute.xlu1 %3829  ;;  %v5581_v7 = vld [vmem:[%s5772_s27 + $0x38] sm:$0xff] }
 0x3f7   : > { %v3330_v18 = vrot.slane %v3212_v55, 2  ;;  %v8493_v57 = vsel %vm3276_vm1, %v3322_v61, %v3323_v16  ;;  %v3327_v27 = vrot.slane %v3210_v38, 2  ;;  %v3189_v24 = vmul.f32 %v5571_v26, %v10082_v28  ;;  %10083 = vst [vmem:[#allocation38_spill] sm:$0xff] %v8501_v53  ;;  %v8506_v16 = vpop.permute.xlu0 %3875  ;;  %v10086_v26 = vld [vmem:[#allocation154_spill] sm:$0xff] }
 0x3f8   : > { %10081 = vst [vmem:[#allocation37_spill] sm:$0xff] %v8493_v57  ;;  %v3190_v47 = vmul.f32 %v5572_v25, %v10082_v28  ;;  %v3191_v31 = vmul.f32 %v5573_v43, %v10082_v28  ;;  %v3283_v36 = vrot.slane %v3184_v40, 2  ;;  %v3285_v41 = vrot.slane %v3185_v58, 2  ;;  %10085 = vst [vmem:[#allocation61_spill] sm:$0xff] %v8506_v16  ;;  %v10087_v25 = vld [vmem:[#allocation119_spill] sm:$0xff]  ;;  %v5574_v28 = vld [vmem:[%s5772_s27 + $0x80] sm:$0xff] }
 0x3f9   : > { %v3337_v56 = vrot.slane %v3216_v52, 2  ;;  %v8504_v55 = vsel %vm3276_vm1, %v3353_v39, %v3355_v8  ;;  %v3338_v61 = vrot.slane %v3217_v45, 2  ;;  %v3340_v38 = vrot.slane %v3218_v19, 2  ;;  %v10088_v43 = vld [vmem:[#allocation6_spill] sm:$0xff]  ;;  %v10090_v40 = vld [vmem:[#allocation140_spill] sm:$0xff] }
 0x3fa   : > { %10084 = vst [vmem:[#allocation149_spill] sm:$0xff] %v8504_v55  ;;  %v3223_v57 = vmul.f32 %v7656_v59, %v10086_v26  ;;  %v3224_v46 = vmul.f32 %v10087_v25, %v10086_v26  ;;  %v8514_v53 = vmul.f32 %v5574_v28, %v10088_v43  ;;  %v3222_v58 = vmul.f32 %v10090_v40, %v10086_v26  ;;  %v8527_v25 = vpop.permute.xlu1 %3833  ;;  %v10094_v28 = vld [vmem:[#allocation126_spill] sm:$0xff] }
 0x3fb   : > { %v8519_v8 = vsel %vm3276_vm1, %v3328_v44, %v3330_v18  ;;  %v8522_v52 = vsel %vm3276_vm1, %v3352_v5, %v3353_v39  ;;  %v3292_v19 = vrot.slane %v3189_v24, 2  ;;  %v3293_v45 = vrot.slane %v3190_v47, 2  ;;  %10093 = vst [vmem:[#allocation70_spill] sm:$0xff] %v8527_v25  ;;  %v5575_v18 = vld [vmem:[%s5772_s27 + $0x88] sm:$0x3]  ;;  %v8538_v47 = vpop.permute.xlu0 %3879 }
 0x3fc   : > { %10089 = vst [vmem:[#allocation3_spill] sm:$0xff] %v8514_v53  ;;  %10091 = vst [vmem:[#allocation69_spill] sm:$0xff] %v8522_v52  ;;  %v3295_v16 = vrot.slane %v3191_v31, 2  ;;  %v8525_v55 = vsel %vm3276_vm1, %v3327_v27, %v3328_v44  ;;  %v8531_v30 = vmul.f32 %v10094_v28, %v10088_v43  ;;  %v3197_v26 = vmul.f32 %v5575_v18, %v10088_v43  ;;  %v5576_v18 = vld [vmem:[%s5772_s27 + $0xb0] sm:$0xff] }
 0x3fd   : > { %10092 = vst [vmem:[#allocation100_spill] sm:$0xff] %v8525_v55  ;;  %v8536_v39 = vsel %vm3276_vm1, %v3283_v36, %v3285_v41  ;;  %10097 = vst [vmem:[#allocation102_spill] sm:$0xff] %v8538_v47  ;;  %v8541_v44 = vsel %vm3276_vm1, %v3282_v33, %v3283_v36  ;;  %v3348_v5 = vrot.slane %v3223_v57, 2  ;;  %v3350_v27 = vrot.slane %v3224_v46, 2  ;;  %v10100_v41 = vld [vmem:[#allocation128_spill] sm:$0xff]  ;;  %v5578_v36 = vld [vmem:[%s5772_s27 + $0x8] sm:$0xff] }
 0x3fe   : > { %10095 = vst [vmem:[#allocation101_spill] sm:$0xff] %v8531_v30  ;;  %10096 = vst [vmem:[#allocation80_spill] sm:$0xff] %v8536_v39  ;;  %v8544_v24 = vsel %vm3276_vm1, %v3338_v61, %v3340_v38  ;;  %v8547_v31 = vsel %vm3276_vm1, %v3337_v56, %v3338_v61  ;;  %v3347_v28 = vrot.slane %v3222_v58, 2  ;;  %v8552_v30 = vmul.f32 %v5576_v18, %v10100_v41  ;;  %v5577_v47 = vld [vmem:[%s5772_s27 + $0xb8] sm:$0x3]  ;;  %v10102_v57 = vld [vmem:[#allocation155_spill] sm:$0xff]  ;;  %v8563_v43 = vpop.permute.xlu1 %3837 }
 0x3ff   : > { %10098 = vst [vmem:[#allocation141_spill] sm:$0xff] %v8541_v44  ;;  %10099 = vst [vmem:[#allocation77_spill] sm:$0xff] %v8547_v31  ;;  %v3203_v33 = vmul.f32 %v5577_v47, %v10100_v41  ;;  %v3181_v46 = vmul.f32 %v5578_v36, %v10102_v57  ;;  %v5579_v38 = vld [vmem:[%s5772_s27 + $0x10] sm:$0x3]  ;;  %v5580_v56 = vld [vmem:[%s5772_s27] sm:$0xff]  ;;  %v3305_v18 = vrot.slane %v3197_v26, 2  ;;  %v8566_v39 = vpop.permute.xlu0 %3883  ;;  %v8569_v47 = vsel %vm3276_vm1, %v3293_v45, %v3295_v16 }
 0x400   : > { %10101 = vst [vmem:[#allocation103_spill] sm:$0xff] %v8552_v30  ;;  %v3182_v44 = vmul.f32 %v5579_v38, %v10102_v57  ;;  %v10103_v61 = vld [vmem:[#allocation156_spill] sm:$0xff]  ;;  %10104 = vst [vmem:[#allocation106_spill] sm:$0xff] %v8563_v43  ;;  %v3180_v52 = vmul.f32 %v5580_v56, %v10102_v57  ;;  %v8572_v31 = vsel %vm3276_vm1, %v3292_v19, %v3293_v45 }
 0x401   : > { %v503_v25 = vmul.f32 %v5580_v56, %v10103_v61  ;;  %v504_v58 = vmul.f32 %v5578_v36, %v10103_v61  ;;  %10105 = vst [vmem:[#allocation107_spill] sm:$0xff] %v8566_v39  ;;  %10106 = vst [vmem:[#allocation110_spill] sm:$0xff] %v8569_v47  ;;  %v10108_v38 = vld [vmem:[#allocation144_spill] sm:$0xff]  ;;  %v3187_v36 = vmul.f32 %v5581_v7, %v10110_v32  ;;  %v5582_v61 = vld [vmem:[%s5772_s27 + $0x40] sm:$0x3]  ;;  %v3315_v56 = vrot.slane %v3203_v33, 2 }
 0x402   : > { %10107 = vst [vmem:[#allocation152_spill] sm:$0xff] %v8572_v31  ;;  %v8576_v55 = vmul.f32 %v10108_v38, %v10100_v41  ;;  %v3188_v26 = vmul.f32 %v5582_v61, %v10110_v32  ;;  %v8583_v57 = vsel %vm3276_vm1, %v3348_v5, %v3350_v27  ;;  %v5583_v19 = vld [vmem:[%s5772_s27 + $0x30] sm:$0xff]  ;;  %v8589_v41 = vsel %vm3276_vm1, %v3347_v28, %v3348_v5  ;;  %v10114_v39 = vld [vmem:[#allocation15_spill] sm:$0xff]  ;;  %v8593_v47 = vpop.permute.xlu1 %3841 }
 0x403   : > { %10111 = vst [vmem:[#allocation120_spill] sm:$0xff] %v8583_v57  ;;  %v3186_v45 = vmul.f32 %v5583_v19, %v10110_v32  ;;  %10112 = vst [vmem:[#allocation143_spill] sm:$0xff] %v8589_v41  ;;  %v3278_v38 = vrot.slane %v3181_v46, 2  ;;  %v10113_v31 = vld [vmem:[#allocation16_spill] sm:$0xff]  ;;  %v958_v43 = vadd.f32 %v10114_v39, %v504_v58  ;;  %v3277_v61 = vrot.slane %v3180_v52, 2  ;;  %v5584_v27 = vld [vmem:[%s5772_s27 + $0x68] sm:$0xff]  ;;  %v8601_v32 = vpop.permute.xlu0 %3887 }
 0x404   : > { %10109 = vst [vmem:[#allocation111_spill] sm:$0xff] %v8576_v55  ;;  %v3280_v55 = vrot.slane %v3182_v44, 2  ;;  %v957_v7 = vadd.f32 %v10113_v31, %v503_v25  ;;  %10115 = vst [vmem:[#allocation7_spill] sm:$0xff] %v8593_v47  ;;  %v10116_v57 = vld [vmem:[#allocation157_spill] sm:$0xff]  ;;  %v5585_v33 = vld [vmem:[%s5772_s27 + $0x70] sm:$0x3] }
 0x405   : > { %v8597_v35 = vmul.f32 %v5584_v27, %v10116_v57  ;;  %v3194_v16 = vmul.f32 %v5585_v33, %v10116_v57  ;;  %10118 = vst [vmem:[#allocation115_spill] sm:$0xff] %v8601_v32  ;;  %v10119_v5 = vrot.slane %v8514_v53, 2  ;;  %v3288_v25 = vrot.slane %v3187_v36, 2  ;;  %v10121_v39 = vld [vmem:[#allocation83_spill] sm:$0xff]  ;;  %v10123_v52 = vld [vmem:[#allocation158_spill] sm:$0xff]  ;;  %v10124_v33 = vld [vmem:[#allocation168_spill] sm:$0xff] }
 0x406   : > { %v3290_v31 = vrot.slane %v3188_v26, 2  ;;  %v8610_v28 = vmul.f32 %v10121_v39, %v10116_v57  ;;  %v506_v46 = vmul.f32 %v8475_v23, %v10123_v52  ;;  %v3287_v58 = vrot.slane %v3186_v45, 2  ;;  %v10127_v36 = vld [vmem:[#allocation46_spill] sm:$0xff]  ;;  %v10129_v47 = vld [vmem:[#allocation160_spill] sm:$0xff]  ;;  %v8629_v45 = vpop.permute.xlu1 %3845  ;;  %v10146_v41 = vld [vmem:[#allocation163_spill] sm:$0xff] }
 0x407   : > { %10117 = vst [vmem:[#allocation114_spill] sm:$0xff] %v8597_v35  ;;  %v8606_v44 = vsel %vm3276_vm1, %v10119_v5, %v3305_v18  ;;  %v505_v19 = vmul.f32 %v8456_v13, %v10123_v52  ;;  %v524_v32 = vmul.f32 %v10070_v62, %v10124_v33  ;;  %v10125_v53 = vrot.slane %v8552_v30, 2  ;;  %v10128_v5 = vld [vmem:[#allocation48_spill] sm:$0xff]  ;;  %10130 = vst [vmem:[#allocation5_spill] sm:$0xff] %v8629_v45  ;;  %v10131_v52 = vld [vmem:[#allocation165_spill] sm:$0xff] }
 0x408   : > { %10120 = vst [vmem:[#allocation118_spill] sm:$0xff] %v8606_v44  ;;  %10122 = vst [vmem:[#allocation78_spill] sm:$0xff] %v8610_v28  ;;  %v1379_v26 = vadd.f32 %v10127_v36, %v957_v7  ;;  %v1380_v57 = vadd.f32 %v10128_v5, %v958_v43  ;;  %v512_v44 = vmul.f32 %v5584_v27, %v10129_v47  ;;  %v3300_v62 = vrot.slane %v3194_v16, 2  ;;  %v10134_v7 = vld [vmem:[#allocation23_spill] sm:$0xff]  ;;  %v10136_v16 = vld [vmem:[#allocation24_spill] sm:$0xff] }
 0x409   : > { %v8621_v18 = vsel %vm3276_vm1, %v10125_v53, %v3315_v56  ;;  %v8627_v23 = vsel %vm3276_vm1, %v3278_v38, %v3280_v55  ;;  %v520_v30 = vmul.f32 %v8036_v63, %v10131_v52  ;;  %v8634_v53 = vpop.permute.xlu0 %3827  ;;  %v8637_v56 = vsel %vm3276_vm1, %v3277_v61, %v3278_v38  ;;  %v10137_v13 = vld [vmem:[#allocation159_spill] sm:$0xff]  ;;  %v10138_v63 = vld [vmem:[#allocation161_spill] sm:$0xff]  ;;  %v10144_v43 = vld [vmem:[#allocation54_spill] sm:$0xff] }
 0x40a   : > { %10126 = vst [vmem:[#allocation121_spill] sm:$0xff] %v8621_v18  ;;  %10132 = vst [vmem:[#allocation153_spill] sm:$0xff] %v8634_v53  ;;  %v960_v27 = vadd.f32 %v10134_v7, %v506_v46  ;;  %v511_v55 = vmul.f32 %v10121_v39, %v10129_v47  ;;  %v8644_v36 = vsel %vm3276_vm1, %v3288_v25, %v3290_v31  ;;  %v10140_v53 = vld [vmem:[#allocation35_spill] sm:$0xff]  ;;  %v5586_v61 = vld [vmem:[%s5772_s27 + $0x98] sm:$0xff] }
 0x40b   : > { %10133 = vst [vmem:[#allocation127_spill] sm:$0xff] %v8637_v56  ;;  %10135 = vst [vmem:[#allocation130_spill] sm:$0xff] %v8644_v36  ;;  %v959_v5 = vadd.f32 %v10136_v16, %v505_v19  ;;  %v8649_v45 = vmul.f32 %v10138_v63, %v10137_v13  ;;  %v978_v18 = vadd.f32 %v10140_v53, %v524_v32  ;;  %v10142_v7 = vld [vmem:[#allocation17_spill] sm:$0xff]  ;;  %v8662_v19 = vpop.permute.xlu1 %3849  ;;  %v5587_v16 = vld [vmem:[%s5772_s27 + $0xa0] sm:$0x3] }
 0x40c   : > { %v8653_v38 = vsel %vm3276_vm1, %v3287_v58, %v3288_v25  ;;  %v8657_v46 = vmul.f32 %v5586_v61, %v10137_v13  ;;  %v966_v47 = vadd.f32 %v10142_v7, %v512_v44  ;;  %v10143_v39 = vld [vmem:[#allocation49_spill] sm:$0xff]  ;;  %v1850_v28 = vadd.f32 %v10144_v43, %v1379_v26  ;;  %10145 = vst [vmem:[#allocation44_spill] sm:$0xff] %v8662_v19  ;;  %v10147_v53 = vld [vmem:[#allocation19_spill] sm:$0xff]  ;;  %v10150_v44 = vld [vmem:[#allocation50_spill] sm:$0xff] }
 0x40d   : > { %10139 = vst [vmem:[#allocation129_spill] sm:$0xff] %v8649_v45  ;;  %10141 = vst [vmem:[#allocation122_spill] sm:$0xff] %v8653_v38  ;;  %v1851_v31 = vadd.f32 %v10143_v39, %v1380_v57  ;;  %v3200_v56 = vmul.f32 %v5587_v16, %v10137_v13  ;;  %v516_v32 = vmul.f32 %v5586_v61, %v10146_v41  ;;  %v10148_v58 = vrot.slane %v8597_v35, 2  ;;  %v8673_v36 = vpop.permute.xlu0 %3831  ;;  %v10151_v7 = vld [vmem:[#allocation18_spill] sm:$0xff]  ;;  %v10152_v61 = vld [vmem:[#allocation47_spill] sm:$0xff] }
 0x40e   : > { %v974_v25 = vadd.f32 %v10147_v53, %v520_v30  ;;  %10149 = vst [vmem:[#allocation84_spill] sm:$0xff] %v8673_v36  ;;  %v1382_v57 = vadd.f32 %v10150_v44, %v960_v27  ;;  %v965_v26 = vadd.f32 %v10151_v7, %v511_v55  ;;  %v515_v43 = vmul.f32 %v10138_v63, %v10146_v41  ;;  %v10153_v16 = vld [vmem:[#allocation68_spill] sm:$0xff]  ;;  %v10155_v55 = vld [vmem:[#allocation171_spill] sm:$0xff]  ;;  %v10168_v19 = vld [vmem:[#allocation21_spill] sm:$0xff] }
 0x40f   : > { %v8671_v38 = vsel %vm3276_vm1, %v10148_v58, %v3300_v62  ;;  %v519_v13 = vmul.f32 %v8021_v11, %v10131_v52  ;;  %v1381_v39 = vadd.f32 %v10152_v61, %v959_v5  ;;  %v523_v62 = vmul.f32 %v10072_v42, %v10124_v33  ;;  %v10154_v27 = vld [vmem:[#allocation56_spill] sm:$0xff]  ;;  %v8692_v11 = vpop.permute.xlu1 %3853  ;;  %v10156_v5 = vld [vmem:[#allocation30_spill] sm:$0xff]  ;;  %v10158_v42 = vld [vmem:[#allocation97_spill] sm:$0xff] }
 0x410   : > { %v1400_v53 = vadd.f32 %v10153_v16, %v978_v18  ;;  %v1388_v44 = vadd.f32 %v10154_v27, %v966_v47  ;;  %v527_v7 = vmul.f32 %v10077_v6, %v10155_v55  ;;  %v528_v41 = vmul.f32 %v10079_v37, %v10155_v55  ;;  %v10157_v61 = vld [vmem:[#allocation64_spill] sm:$0xff]  ;;  %v10160_v16 = vld [vmem:[#allocation55_spill] sm:$0xff]  ;;  %v10161_v27 = vld [vmem:[#allocation29_spill] sm:$0xff] }
 0x411   : > { %v3310_v52 = vrot.slane %v3200_v56, 2  ;;  %v970_v63 = vadd.f32 %v10156_v5, %v516_v32  ;;  %v1396_v30 = vadd.f32 %v10157_v61, %v974_v25  ;;  %v8697_v33 = vadd.f32 %v10158_v42, %v1851_v31  ;;  %v8699_v18 = vpop.permute.xlu0 %3835  ;;  %v10162_v6 = vld [vmem:[#allocation20_spill] sm:$0xff]  ;;  %v10163_v35 = vld [vmem:[#allocation51_spill] sm:$0xff]  ;;  %v10164_v55 = vld [vmem:[#allocation33_spill] sm:$0xff] }
 0x412   : > { %10159 = vst [vmem:[#allocation147_spill] sm:$0xff] %v8699_v18  ;;  %v1387_v47 = vadd.f32 %v10160_v16, %v965_v26  ;;  %v969_v58 = vadd.f32 %v10161_v27, %v515_v43  ;;  %v973_v45 = vadd.f32 %v10162_v6, %v519_v13  ;;  %v1853_v37 = vadd.f32 %v10163_v35, %v1382_v57  ;;  %v10165_v32 = vld [vmem:[#allocation96_spill] sm:$0xff]  ;;  %v10166_v25 = vld [vmem:[#allocation57_spill] sm:$0xff]  ;;  %v10167_v61 = vld [vmem:[#allocation22_spill] sm:$0xff] }
 0x413   : > { %v977_v36 = vadd.f32 %v10164_v55, %v523_v62  ;;  %v1871_v56 = vadd.f32 %v8293_v14, %v1400_v53  ;;  %v8708_v5 = vadd.f32 %v10165_v32, %v1850_v28  ;;  %v1852_v31 = vadd.f32 %v10166_v25, %v1381_v39  ;;  %v10169_v26 = vld [vmem:[#allocation174_spill] sm:$0xff]  ;;  %v8716_v16 = vpop.permute.xlu1 %3857  ;;  %v10171_v14 = vld [vmem:[#allocation60_spill] sm:$0xff]  ;;  %v10175_v27 = vld [vmem:[#allocation67_spill] sm:$0xff] }
 0x414   : > { %v981_v42 = vadd.f32 %v10167_v61, %v527_v7  ;;  %v982_v18 = vadd.f32 %v10168_v19, %v528_v41  ;;  %v532_v43 = vmul.f32 %v7656_v59, %v10169_v26  ;;  %v1859_v13 = vadd.f32 %v8332_v0, %v1388_v44  ;;  %v10170_v35 = vld [vmem:[#allocation162_spill] sm:$0xff]  ;;  %v10173_v7 = vld [vmem:[#allocation59_spill] sm:$0xff]  ;;  %v10176_v6 = vld [vmem:[#allocation117_spill] sm:$0xff] }
 0x415   : > { %v2407_v57 = vadd.f32 %v10170_v35, %v8266_v15  ;;  %v1392_v62 = vadd.f32 %v10171_v14, %v970_v63  ;;  %v1867_v28 = vadd.f32 %v8279_v17, %v1396_v30  ;;  %v10172_v39 = vrot.slane %v8657_v46, 2  ;;  %v8727_v19 = vpop.permute.xlu0 %3839  ;;  %v10174_v41 = vld [vmem:[#allocation63_spill] sm:$0xff]  ;;  %v10179_v25 = vld [vmem:[#allocation72_spill] sm:$0xff] }
 0x416   : > { %v1391_v59 = vadd.f32 %v10173_v7, %v969_v58  ;;  %v1395_v0 = vadd.f32 %v10174_v41, %v973_v45  ;;  %v531_v44 = vmul.f32 %v10090_v40, %v10169_v26  ;;  %v1858_v15 = vadd.f32 %v8350_v29, %v1387_v47  ;;  %v10177_v30 = vld [vmem:[#allocation99_spill] sm:$0xff]  ;;  %v10183_v47 = vld [vmem:[#allocation113_spill] sm:$0xff]  ;;  %v10184_v26 = vld [vmem:[#allocation12_spill] sm:$0xff] }
 0x417   : > { %v8725_v53 = vsel %vm3276_vm1, %v10172_v39, %v3310_v52  ;;  %v1399_v63 = vadd.f32 %v10175_v27, %v977_v36  ;;  %v2405_v17 = vadd.f32 %v10176_v6, %v1871_v56  ;;  %v8737_v55 = vadd.f32 %v10177_v30, %v1853_v37  ;;  %v10178_v52 = vld [vmem:[#allocation98_spill] sm:$0xff]  ;;  %v10180_v58 = vld [vmem:[#allocation39_spill] sm:$0xff]  ;;  %v10182_v39 = vld [vmem:[#allocation105_spill] sm:$0xff]  ;;  %v4396_v29 = vpop.permute.xlu1 %4395 }
 0x418   : > { %v8740_v32 = vadd.f32 %v10178_v52, %v1852_v31  ;;  %v1404_v61 = vadd.f32 %v10179_v25, %v982_v18  ;;  %v986_v35 = vadd.f32 %v10180_v58, %v532_v43  ;;  %v10181_v45 = vld [vmem:[#allocation71_spill] sm:$0xff]  ;;  %v8746_v40 = vadd.f32 %v10182_v39, %v1859_v13  ;;  %v10185_v31 = vld [vmem:[#allocation36_spill] sm:$0xff] }
 0x419   : > { %v1403_v14 = vadd.f32 %v10181_v45, %v981_v42  ;;  %v2401_v36 = vadd.f32 %v10183_v47, %v1867_v28  ;;  %v2939_v56 = vadd.f32 %v10184_v26, %v2405_v17  ;;  %v1863_v37 = vadd.f32 %v8339_v34, %v1392_v62  ;;  %v8751_v7 = vpop.permute.xlu0 %3843  ;;  %v10186_v27 = vld [vmem:[#allocation104_spill] sm:$0xff]  ;;  %v10187_v13 = vld [vmem:[#allocation167_spill] sm:$0xff]  ;;  %v10192_v45 = vld [vmem:[#allocation109_spill] sm:$0xff] }
 0x41a   : > { %v985_v41 = vadd.f32 %v10185_v31, %v531_v44  ;;  %v1866_v18 = vadd.f32 %v8311_v20, %v1395_v0  ;;  %v8756_v43 = vadd.f32 %v10186_v27, %v1858_v15  ;;  %v1862_v42 = vadd.f32 %v8357_v21, %v1391_v59  ;;  %v10188_v30 = vld [vmem:[#allocation8_spill] sm:$0xff]  ;;  %v10190_v15 = vld [vmem:[#allocation10_spill] sm:$0xff]  ;;  %v10198_v27 = vld [vmem:[#allocation85_spill] sm:$0xff] }
 0x41b   : > { %v2411_v6 = vadd.f32 %v10187_v13, %v8269_v54  ;;  %v2935_v28 = vadd.f32 %v10188_v30, %v2401_v36  ;;  %v1870_v17 = vadd.f32 %v8325_v50, %v1399_v63  ;;  %v10189_v52 = vld [vmem:[#allocation76_spill] sm:$0xff]  ;;  %v1874_v62 = vadd.f32 %v8282_v60, %v1403_v14  ;;  %v4400_v25 = vpop.permute.xlu1 %4399  ;;  %v10191_v21 = vld [vmem:[#allocation14_spill] sm:$0xff]  ;;  %v10193_v63 = vld [vmem:[#allocation75_spill] sm:$0xff] }
 0x41c   : > { %v1408_v34 = vadd.f32 %v10189_v52, %v986_v35  ;;  %v1875_v44 = vadd.f32 %v8304_v22, %v1404_v61  ;;  %v5608_v20 = vmov 1983009808   ;;  %v2937_v58 = vadd.f32 %v10190_v15, %v8426_v10  ;;  %v10194_v60 = vld [vmem:[#allocation112_spill] sm:$0xff]  ;;  %v10196_v10 = vld [vmem:[#allocation173_spill] sm:$0xff] }
 0x41d   : > { %v4492_v0 = vunpack.c.l.s4 %v5608_v20  ;;  %v2941_v59 = vadd.f32 %v10191_v21, %v2407_v57  ;;  %v8770_v54 = vadd.f32 %v10192_v45, %v1863_v37  ;;  %v3410_v39 = vadd.f32 %v8519_v8, %v2939_v56  ;;  %v8773_v50 = vpop.permute.xlu0 %3847  ;;  %v10195_v22 = vld [vmem:[#allocation108_spill] sm:$0xff]  ;;  %v10199_v56 = vld [vmem:[#allocation9_spill] sm:$0xff] }
 0x41e   : > { %v1407_v35 = vadd.f32 %v10193_v63, %v985_v41  ;;  %v2400_v14 = vadd.f32 %v10194_v60, %v1866_v18  ;;  %v8778_v61 = vadd.f32 %v10195_v22, %v1862_v42  ;;  %v5609_v47 = vmov 1934713408   ;;  %v10197_v57 = vld [vmem:[#allocation116_spill] sm:$0xff]  ;;  %v10201_v20 = vld [vmem:[#allocation137_spill] sm:$0xff]  ;;  %v10204_v60 = vld [vmem:[#allocation34_spill] sm:$0xff] }
 0x41f   : > { %v4556_v36 = vunpack.c.l.s4 %v5609_v47  ;;  %v2415_v26 = vadd.f32 %v10196_v10, %v8272_v2  ;;  %v2404_v31 = vadd.f32 %v10197_v57, %v1870_v17  ;;  %v3406_v37 = vadd.f32 %v8440_v4, %v2935_v28  ;;  %v10200_v30 = vld [vmem:[#allocation164_spill] sm:$0xff]  ;;  %v4404_v42 = vpop.permute.xlu1 %4403  ;;  %v10202_v28 = vld [vmem:[#allocation25_spill] sm:$0xff]  ;;  %v10208_v10 = vld [vmem:[#allocation170_spill] sm:$0xff] }
 0x420   : > { %v3944_v8 = vadd.f32 %v10198_v27, %v3410_v39  ;;  %v2408_v13 = vadd.f32 %v10199_v56, %v1874_v62  ;;  %v2409_v41 = vadd.f32 %v10200_v30, %v1875_v44  ;;  %v1879_v18 = vadd.f32 %v8314_v9, %v1408_v34  ;;  %v10203_v62 = vld [vmem:[#allocation26_spill] sm:$0xff]  ;;  %v10205_v34 = vld [vmem:[#allocation132_spill] sm:$0xff] }
 0x421   : > { %v4493_v52 = vunpack.c.0.s8 %v4492_v0  ;;  %v3940_v15 = vadd.f32 %v10201_v20, %v3406_v37  ;;  %v3408_v21 = vadd.f32 %v8490_v1, %v2937_v58  ;;  %v3412_v2 = vadd.f32 %v8443_v3, %v2941_v59  ;;  %v8791_v17 = vpop.permute.xlu0 %3851  ;;  %v10206_v1 = vld [vmem:[#allocation11_spill] sm:$0xff]  ;;  %v10207_v58 = vld [vmem:[#allocation13_spill] sm:$0xff]  ;;  %v10214_v20 = vld [vmem:[#allocation32_spill] sm:$0xff] }
 0x422   : > { %v4478_v45 = vadd.f32 %v4404_v42, %v3944_v8  ;;  %v1878_v4 = vadd.f32 %v8301_v49, %v1407_v35  ;;  %v2943_v39 = vadd.f32 %v10202_v28, %v2409_v41  ;;  %v2934_v63 = vadd.f32 %v10203_v62, %v2400_v14  ;;  %v10209_v49 = vld [vmem:[#allocation2_spill] sm:$0xff] }
 0x423   : > { %v4557_v44 = vunpack.c.0.s8 %v4556_v36  ;;  %v2945_v9 = vadd.f32 %v10204_v60, %v2411_v6  ;;  %v3942_v0 = vadd.f32 %v10205_v34, %v3408_v21  ;;  %v3946_v22 = vadd.f32 %v8285_v48, %v3412_v2  ;;  %v4408_v37 = vpop.permute.xlu1 %4407  ;;  %v10210_v48 = vld [vmem:[#allocation134_spill] sm:$0xff]  ;;  %v10215_v2 = vld [vmem:[#allocation40_spill] sm:$0xff]  ;;  %v10218_v60 = vld [vmem:[#allocation93_spill] sm:$0xff] }
 0x424   : > { %v4474_v47 = vadd.f32 %v4396_v29, %v3940_v15  ;;  %v2410_v3 = vadd.f32 %v10206_v1, %v8288_v51  ;;  %v2412_v59 = vadd.f32 %v10207_v58, %v1878_v4  ;;  %v2413_v57 = vadd.f32 %v10208_v10, %v1879_v18  ;;  %v10211_v51 = vld [vmem:[#allocation94_spill] sm:$0xff]  ;;  %v10212_v18 = vld [vmem:[#allocation91_spill] sm:$0xff]  ;;  %v10216_v4 = vld [vmem:[#allocation45_spill] sm:$0xff] }
 0x425   : > { %v8804_v35 = vsub.s32 %v4493_v52, %v10209_v49  ;;  %v4476_v14 = vadd.f32 %v4400_v25, %v3942_v0  ;;  %v4480_v6 = vadd.f32 %v4408_v37, %v3946_v22  ;;  %v8806_v8 = vpop.permute.xlu0 %3855  ;;  %v2414_v29 = vadd.f32 %v10210_v48, %v8318_v12  ;;  %v10213_v52 = vld [vmem:[#allocation41_spill] sm:$0xff]  ;;  %v10217_v62 = vld [vmem:[#allocation42_spill] sm:$0xff] }
 0x426   : > { %v4897_v36 = vcombine.low %v4474_v47, %v4478_v45  ;;  %v4898_v27 = vcombine.high %v4474_v47, %v4478_v45  ;;  %v3414_v56 = vadd.f32 %v8544_v24, %v2943_v39  ;;  %v3405_v30 = vadd.f32 %v10211_v51, %v2934_v63  ;;  %v10219_v24 = vld [vmem:[#allocation131_spill] sm:$0xff]  ;;  %v10221_v47 = vld [vmem:[#allocation52_spill] sm:$0xff]  ;;  %v10222_v58 = vld [vmem:[#allocation58_spill] sm:$0xff] }
 0x427   : > { %v8813_v41 = vsub.s32 %v4557_v44, %v10209_v49  ;;  %v2936_v42 = vadd.f32 %v10213_v52, %v10212_v18  ;;  %v3416_v25 = vadd.f32 %v10214_v20, %v2945_v9  ;;  %v4913_v15 = vcombine.low %v4476_v14, %v4480_v6  ;;  %v4412_v63 = vpop.permute.xlu1 %4411  ;;  %v10226_v48 = vld [vmem:[#allocation66_spill] sm:$0xff] }
 0x428   : > { %v4914_v21 = vcombine.high %v4476_v14, %v4480_v6  ;;  %v2947_v45 = vadd.f32 %v10215_v2, %v2413_v57  ;;  %v2938_v28 = vadd.f32 %v10216_v4, %v2404_v31  ;;  %v2949_v12 = vadd.f32 %v10217_v62, %v2415_v26  ;;  %v10220_v31 = vld [vmem:[#allocation53_spill] sm:$0xff]  ;;  %v10223_v57 = vld [vmem:[#allocation62_spill] sm:$0xff]  ;;  %v10231_v4 = vld [vmem:[#allocation100_spill] sm:$0xff] }
 0x429   : > { %v2940_v39 = vadd.f32 %v10219_v24, %v10218_v60  ;;  %v8824_v44 = vrot.slane %v4897_v36, %v8804_v35  ;;  %v8827_v34 = vrot.slane %v4898_v27, %v8804_v35  ;;  %v8830_v9 = vrot.slane %v4913_v15, %v8804_v35  ;;  %v4394_v22 = vpop.permute.xlu0 %4393  ;;  %v10225_v6 = vld [vmem:[#allocation65_spill] sm:$0xff]  ;;  %v10229_v15 = vld [vmem:[#allocation87_spill] sm:$0xff] }
 0x42a   : > { %v8833_v0 = vrot.slane %v4914_v21, %v8804_v35  ;;  %v2919_v26 = vadd.f32 %v10220_v31, %v8697_v33  ;;  %v2942_v1 = vadd.f32 %v10221_v47, %v2408_v13  ;;  %v2921_v10 = vadd.f32 %v10222_v58, %v8737_v55  ;;  %v10224_v33 = vld [vmem:[#allocation166_spill] sm:$0xff]  ;;  %v10227_v55 = vld [vmem:[#allocation37_spill] sm:$0xff] }
 0x42b   : > { %v2944_v49 = vadd.f32 %v10223_v57, %v2410_v3  ;;  %v4961_v37 = vcombine.low %v8824_v44, %v8830_v9  ;;  %v4962_v14 = vcombine.high %v8824_v44, %v8830_v9  ;;  %v2923_v13 = vadd.f32 %v10225_v6, %v10224_v33  ;;  %v10228_v3 = vld [vmem:[#allocation120_spill] sm:$0xff]  ;;  %v4416_v20 = vpop.permute.xlu1 %4415  ;;  %v10230_v21 = vld [vmem:[#allocation73_spill] sm:$0xff]  ;;  %v10234_v47 = vld [vmem:[#allocation74_spill] sm:$0xff] }
 0x42c   : > { %v4977_v36 = vcombine.low %v8827_v34, %v8833_v0  ;;  %v4978_v27 = vcombine.high %v8827_v34, %v8833_v0  ;;  %v2946_v51 = vadd.f32 %v10226_v48, %v2412_v59  ;;  %v3407_v18 = vadd.f32 %v10227_v55, %v2936_v42  ;;  %v10232_v60 = vld [vmem:[#allocation149_spill] sm:$0xff]  ;;  %v10233_v44 = vld [vmem:[#allocation28_spill] sm:$0xff]  ;;  %v10235_v57 = vld [vmem:[#allocation79_spill] sm:$0xff] }
 0x42d   : > { %v3418_v52 = vadd.f32 %v10228_v3, %v2947_v45  ;;  %v2925_v2 = vadd.f32 %v10230_v21, %v10229_v15  ;;  %v3409_v62 = vadd.f32 %v10231_v4, %v2938_v28  ;;  %v3420_v24 = vadd.f32 %v10232_v60, %v2949_v12  ;;  %v4398_v31 = vpop.permute.xlu0 %4397  ;;  %v10236_v45 = vld [vmem:[#allocation77_spill] sm:$0xff]  ;;  %v10237_v6 = vld [vmem:[#allocation86_spill] sm:$0xff]  ;;  %v10238_v55 = vld [vmem:[#allocation92_spill] sm:$0xff] }
 0x42e   : > { %v3411_v9 = vadd.f32 %v10233_v44, %v2940_v39  ;;  %v2948_v58 = vadd.f32 %v10234_v47, %v2414_v29  ;;  %v2927_v59 = vadd.f32 %v10235_v57, %v8746_v40  ;;  %v8863_v42 = vadd.f32 %v8627_v23, %v2919_v26  ;;  %v10239_v3 = vld [vmem:[#allocation80_spill] sm:$0xff]  ;;  %v10241_v29 = vld [vmem:[#allocation133_spill] sm:$0xff]  ;;  %v10242_v40 = vld [vmem:[#allocation27_spill] sm:$0xff] }
 0x42f   : > { %v8866_v33 = vadd.f32 %v10236_v45, %v2942_v1  ;;  %v3948_v48 = vadd.f32 %v10237_v6, %v3414_v56  ;;  %v3952_v28 = vadd.f32 %v10238_v55, %v3418_v52  ;;  %v8871_v12 = vadd.f32 %v10239_v3, %v2921_v10  ;;  %v10240_v39 = vld [vmem:[#allocation136_spill] sm:$0xff]  ;;  %v10243_v23 = vld [vmem:[#allocation130_spill] sm:$0xff]  ;;  %v10244_v1 = vld [vmem:[#allocation143_spill] sm:$0xff]  ;;  %v4420_v56 = vpop.permute.xlu1 %4419 }
 0x430   : > { %v8874_v15 = vadd.f32 %v10240_v39, %v2944_v49  ;;  %v2918_v21 = vadd.f32 %v10241_v29, %v8708_v5  ;;  %v3943_v4 = vadd.f32 %v10242_v40, %v3409_v62  ;;  %v8880_v26 = vadd.f32 %v10243_v23, %v2923_v13  ;;  %v10245_v44 = vld [vmem:[#allocation88_spill] sm:$0xff]  ;;  %v10246_v52 = vld [vmem:[#allocation81_spill] sm:$0xff]  ;;  %v10247_v10 = vld [vmem:[#allocation110_spill] sm:$0xff] }
 0x431   : > { %v8883_v60 = vadd.f32 %v10244_v1, %v2946_v51  ;;  %v2929_v47 = vadd.f32 %v10246_v52, %v10245_v44  ;;  %v8888_v57 = vadd.f32 %v10247_v10, %v2925_v2  ;;  %v4482_v49 = vadd.f32 %v4412_v63, %v3948_v48  ;;  %v4402_v6 = vpop.permute.xlu0 %4401  ;;  %v10248_v55 = vld [vmem:[#allocation95_spill] sm:$0xff]  ;;  %v10249_v3 = vld [vmem:[#allocation69_spill] sm:$0xff]  ;;  %v10250_v39 = vld [vmem:[#allocation4_spill] sm:$0xff] }
 0x432   : > { %v4486_v45 = vadd.f32 %v4420_v56, %v3952_v28  ;;  %v3939_v5 = vadd.f32 %v10248_v55, %v3405_v30  ;;  %v8892_v62 = vadd.f32 %v10249_v3, %v2948_v58  ;;  %v8895_v13 = vadd.f32 %v8671_v38, %v2927_v59  ;;  %v10251_v40 = vld [vmem:[#allocation31_spill] sm:$0xff]  ;;  %v10252_v2 = vld [vmem:[#allocation89_spill] sm:$0xff]  ;;  %v10256_v59 = vld [vmem:[#allocation118_spill] sm:$0xff] }
 0x433   : > { %v4477_v51 = vadd.f32 %v4402_v6, %v3943_v4  ;;  %v3950_v29 = vadd.f32 %v10250_v39, %v3416_v25  ;;  %v3954_v23 = vadd.f32 %v10251_v40, %v3420_v24  ;;  %v3941_v52 = vadd.f32 %v10252_v2, %v3407_v18  ;;  %v10253_v63 = vld [vmem:[#allocation43_spill] sm:$0xff]  ;;  %v4424_v58 = vpop.permute.xlu1 %4423  ;;  %v10255_v10 = vld [vmem:[#allocation125_spill] sm:$0xff] }
 0x434   : > { %v4929_v1 = vcombine.low %v4482_v49, %v4486_v45  ;;  %v4930_v44 = vcombine.high %v4482_v49, %v4486_v45  ;;  %v3945_v48 = vadd.f32 %v10253_v63, %v3411_v9  ;;  %v10254_v28 = vld [vmem:[#allocation127_spill] sm:$0xff]  ;;  %v4473_v30 = vadd.f32 %v4394_v22, %v3939_v5  ;;  %v10258_v22 = vld [vmem:[#allocation138_spill] sm:$0xff] }
 0x435   : > { %v8902_v56 = vadd.f32 %v10254_v28, %v2918_v21  ;;  %v8906_v38 = vadd.f32 %v10255_v10, %v8740_v32  ;;  %v8909_v4 = vadd.f32 %v10256_v59, %v2929_v47  ;;  %v4484_v25 = vadd.f32 %v4416_v20, %v3950_v29  ;;  %v4406_v6 = vpop.permute.xlu0 %4405  ;;  %v10257_v9 = vld [vmem:[#allocation135_spill] sm:$0xff]  ;;  %v10259_v5 = vld [vmem:[#allocation82_spill] sm:$0xff] }
 0x436   : > { %v4488_v24 = vadd.f32 %v4424_v58, %v3954_v23  ;;  %v4475_v49 = vadd.f32 %v4398_v31, %v3941_v52  ;;  %v4625_v45 = vcombine.low %v4473_v30, %v4477_v51  ;;  %v4626_v18 = vcombine.high %v4473_v30, %v4477_v51 }
 0x437   : > { %v4479_v55 = vadd.f32 %v4406_v6, %v3945_v48  ;;  %v8913_v21 = vadd.f32 %v10257_v9, %v8770_v54  ;;  %v8917_v3 = vadd.f32 %v10259_v5, %v10258_v22  ;;  %v8920_v47 = vrot.slane %v4961_v37, %v8813_v41  ;;  %v4364_v51 = vpop.permute.xlu1 %4363  ;;  %v10260_v9 = vld [vmem:[#allocation38_spill] sm:$0xff]  ;;  %v10261_v5 = vld [vmem:[#allocation61_spill] sm:$0xff] }
 0x438   : > { %v4945_v32 = vcombine.low %v4484_v25, %v4488_v24  ;;  %v4946_v39 = vcombine.high %v4484_v25, %v4488_v24  ;;  %v8923_v20 = vrot.slane %v4962_v14, %v8813_v41  ;;  %v4937_v40 = vrot.slane %v4929_v1, %v8804_v35 }
 0x439   : > { %v4641_v31 = vcombine.low %v4475_v49, %v4479_v55  ;;  %v4642_v29 = vcombine.high %v4475_v49, %v4479_v55  ;;  %v4944_v54 = vrot.slane %v4930_v44, %v8804_v35  ;;  %v4410_v52 = vpop.permute.xlu0 %4409  ;;  %v8930_v63 = vrot.slane %v4625_v45, %v8804_v35 }
 0x43a   : > { %v4953_v23 = vrot.slane %v4945_v32, %v8804_v35  ;;  %v4960_v2 = vrot.slane %v4946_v39, %v8804_v35  ;;  %v8933_v37 = vrot.slane %v4626_v18, %v8804_v35  ;;  %v3924_v22 = vadd.f32 %v10260_v9, %v8863_v42  ;;  %v10263_v42 = vld [vmem:[#allocation107_spill] sm:$0xff]  ;;  %v10265_v9 = vld [vmem:[#allocation146_spill] sm:$0xff] }
 0x43b   : > { %v8936_v14 = vrot.slane %v4641_v31, %v8804_v35  ;;  %v8939_v48 = vrot.slane %v4642_v29, %v8804_v35  ;;  %v4368_v24 = vpop.permute.xlu1 %4367  ;;  %v3947_v32 = vadd.f32 %v10261_v5, %v8866_v33  ;;  %v8969_v39 = vrot.slane %v4977_v36, %v8813_v41  ;;  %v10262_v29 = vld [vmem:[#allocation106_spill] sm:$0xff] }
 0x43c   : > { %v4993_v1 = vcombine.low %v4937_v40, %v4953_v23  ;;  %v4994_v28 = vcombine.high %v4937_v40, %v4953_v23  ;;  %v5009_v44 = vcombine.low %v4944_v54, %v4960_v2  ;;  %v5010_v30 = vcombine.high %v4944_v54, %v4960_v2 }
 0x43d   : > { %v4689_v58 = vcombine.low %v8930_v63, %v8936_v14  ;;  %v4414_v55 = vpop.permute.xlu0 %4413  ;;  %v8975_v31 = vrot.slane %v4978_v27, %v8813_v41  ;;  %v3928_v40 = vadd.f32 %v10262_v29, %v8880_v26  ;;  %v3951_v54 = vadd.f32 %v10263_v42, %v8883_v60  ;;  %v10266_v29 = vld [vmem:[#allocation151_spill] sm:$0xff]  ;;  %v10267_v42 = vld [vmem:[#allocation150_spill] sm:$0xff] }
 0x43e   : > { %v8950_v6 = vrot.slane %v4993_v1, %v8813_v41  ;;  %v8953_v49 = vrot.slane %v4994_v28, %v8813_v41  ;;  %v8956_v45 = vrot.slane %v5009_v44, %v8813_v41  ;;  %v8959_v18 = vrot.slane %v5010_v30, %v8813_v41  ;;  %v10264_v30 = vld [vmem:[#allocation90_spill] sm:$0xff]  ;;  %v10271_v44 = vld [vmem:[#allocation115_spill] sm:$0xff] }
 0x43f   : > { %v4372_v36 = vpop.permute.xlu1 %4371  ;;  %v4458_v26 = vadd.f32 %v4364_v51, %v3924_v22  ;;  %v2933_v5 = vadd.f32 %v10265_v9, %v10264_v30  ;;  %v2924_v0 = vadd.f32 %v10267_v42, %v10266_v29  ;;  %v4481_v34 = vadd.f32 %v4410_v52, %v3947_v32  ;;  %v10268_v51 = vld [vmem:[#allocation70_spill] sm:$0xff]  ;;  %v10272_v52 = vld [vmem:[#allocation141_spill] sm:$0xff] }
 0x440   : > { %v5026_v33 = vcombine.high %v8920_v47, %v8950_v6  ;;  %v5027_v23 = vcombine.low %v8923_v20, %v8953_v49  ;;  %v4462_v60 = vadd.f32 %v4372_v36, %v3928_v40  ;;  %v3926_v22 = vadd.f32 %v10268_v51, %v8871_v12  ;;  %v10269_v40 = vld [vmem:[#allocation7_spill] sm:$0xff]  ;;  %v10270_v28 = vld [vmem:[#allocation102_spill] sm:$0xff] }
 0x441   : > { %v4418_v1 = vpop.permute.xlu0 %4417  ;;  %v3949_v25 = vadd.f32 %v10270_v28, %v8874_v15  ;;  %v3953_v59 = vadd.f32 %v10271_v44, %v8892_v62  ;;  %v9012_v32 = vadd.f32 %v10272_v52, %v8906_v38  ;;  %v3402_v12 = vadd.f32 %v8725_v53, %v8913_v21  ;;  %v10273_v15 = vld [vmem:[#allocation122_spill] sm:$0xff]  ;;  %v10274_v62 = vld [vmem:[#allocation121_spill] sm:$0xff]  ;;  %v10275_v28 = vld [vmem:[#allocation139_spill] sm:$0xff] }
 0x442   : > { %5093 = vrot.lane.b32.xlu1 %v5026_v33, %s5610_s13  ;;  %v4485_v27 = vadd.f32 %v4418_v1, %v3951_v54  ;;  %v3930_v33 = vadd.f32 %v10269_v40, %v8888_v57  ;;  %v4761_v36 = vcombine.low %v4458_v26, %v4462_v60  ;;  %v4762_v2 = vcombine.high %v4458_v26, %v4462_v60  ;;  %v10276_v44 = vld [vmem:[#allocation152_spill] sm:$0xff] }
 0x443   : > { %v4376_v10 = vpop.permute.xlu1 %4375  ;;  %v4460_v54 = vadd.f32 %v4368_v24, %v3926_v22  ;;  %v3393_v26 = vadd.f32 %v10273_v15, %v8917_v3  ;;  %v3404_v60 = vadd.f32 %v10274_v62, %v2933_v5  ;;  %v9022_v38 = vadd.f32 %v10275_v28, %v8756_v43  ;;  %v10279_v15 = vld [vmem:[#allocation153_spill] sm:$0xff] }
 0x444   : > { %v4657_v30 = vcombine.low %v4481_v34, %v4485_v27  ;;  %v4658_v9 = vcombine.high %v4481_v34, %v4485_v27  ;;  %v4464_v57 = vadd.f32 %v4376_v10, %v3930_v33  ;;  %v4483_v34 = vadd.f32 %v4414_v55, %v3949_v25  ;;  %v10277_v10 = vld [vmem:[#allocation169_spill] sm:$0xff] }
 0x445   : > { %v4422_v1 = vpop.permute.xlu0 %4421  ;;  %v3395_v29 = vadd.f32 %v10276_v44, %v2924_v0  ;;  %v9027_v24 = vadd.f32 %v10277_v10, %v8778_v61  ;;  %v9035_v43 = vrot.slane %v4762_v2, %v8804_v35  ;;  %v3923_v62 = vadd.f32 %v10279_v15, %v8902_v56 }
 0x446   : > { %5101 = vrot.lane.b32.xlu1 %v5027_v23, %s5611_s14  ;;  %v4487_v27 = vadd.f32 %v4422_v1, %v3953_v59  ;;  %v4777_v53 = vcombine.low %v4460_v54, %v4464_v57  ;;  %v4778_v21 = vcombine.high %v4460_v54, %v4464_v57  ;;  %v10278_v23 = vld [vmem:[#allocation5_spill] sm:$0xff]  ;;  %v9032_v59 = vrot.slane %v4761_v36, %v8804_v35 }
 0x447   : > { %v3932_v42 = vadd.f32 %v10278_v23, %v8895_v13  ;;  %v4380_v5 = vpop.permute.xlu1 %4379  ;;  %v4665_v0 = vrot.slane %v4657_v30, %v8804_v35  ;;  %v4672_v13 = vrot.slane %v4658_v9, %v8804_v35  ;;  %v10281_v44 = vcombine.low %v8933_v37, %v8939_v48 }
 0x448   : > { %v4673_v3 = vcombine.low %v4483_v34, %v4487_v27  ;;  %v4674_v51 = vcombine.high %v4483_v34, %v4487_v27  ;;  %v9038_v25 = vrot.slane %v4777_v53, %v8804_v35  ;;  %v9041_v55 = vrot.slane %v4778_v21, %v8804_v35 }
 0x449   : > { %v4362_v61 = vpop.permute.xlu0 %4361  ;;  %v9061_v34 = vrot.slane %v4689_v58, %v8813_v41  ;;  %v10280_v27 = vcombine.high %v8930_v63, %v8936_v14  ;;  %v9071_v53 = vrot.slane %v10281_v44, %v8813_v41  ;;  %v3936_v63 = vadd.f32 %v8692_v11, %v3402_v12  ;;  %v10282_v14 = vld [vmem:[#allocation147_spill] sm:$0xff] }
 0x44a   : > { %v4681_v22 = vrot.slane %v4673_v3, %v8804_v35  ;;  %v4688_v40 = vrot.slane %v4674_v51, %v8804_v35  ;;  %v4825_v33 = vcombine.low %v9032_v59, %v9038_v25  ;;  %v4826_v2 = vcombine.high %v9032_v59, %v9038_v25 }
 0x44b   : > { %v4841_v36 = vcombine.low %v9035_v43, %v9041_v55  ;;  %v4842_v52 = vcombine.high %v9035_v43, %v9041_v55  ;;  %v4384_v1 = vpop.permute.xlu1 %4383  ;;  %v4704_v28 = vrot.slane %v10280_v27, %v8813_v41  ;;  %v3927_v3 = vadd.f32 %v10282_v14, %v3393_v26  ;;  %v10284_v26 = vld [vmem:[#allocation101_spill] sm:$0xff]  ;;  %v10300_v55 = vld [vmem:[#allocation3_spill] sm:$0xff] }
 0x44c   : > { %v4721_v54 = vcombine.low %v4665_v0, %v4681_v22  ;;  %v4722_v30 = vcombine.high %v4665_v0, %v4681_v22  ;;  %v4737_v57 = vcombine.low %v4672_v13, %v4688_v40  ;;  %v4738_v9 = vcombine.high %v4672_v13, %v4688_v40 }
 0x44d   : > { %v4366_v21 = vpop.permute.xlu0 %4365  ;;  %v10283_v51 = vcombine.high %v8933_v37, %v8939_v48  ;;  %v4466_v13 = vadd.f32 %v4380_v5, %v3932_v42  ;;  %v3302_v42 = vrot.slane %v10284_v26, 2  ;;  %v4457_v5 = vadd.f32 %v4362_v61, %v3923_v62  ;;  %v10289_v48 = vld [vmem:[#allocation78_spill] sm:$0xff] }
 0x44e   : > { %v9074_v56 = vrot.slane %v4721_v54, %v8813_v41  ;;  %v4736_v10 = vrot.slane %v4722_v30, %v8813_v41  ;;  %v9078_v58 = vrot.slane %v4737_v57, %v8813_v41  ;;  %v9081_v23 = vrot.slane %v4738_v9, %v8813_v41 }
 0x44f   : > { %v9089_v0 = vrot.slane %v10283_v51, %v8813_v41  ;;  %v4388_v22 = vpop.permute.xlu1 %4387  ;;  %v10286_v51 = vld [vmem:[#allocation84_spill] sm:$0xff]  ;;  %v3929_v61 = vadd.f32 %v8727_v19, %v3395_v29  ;;  %v10290_v37 = vrot.slane %v10289_v48, 2 }
 0x450   : > { %v4754_v40 = vcombine.high %v9061_v34, %v9074_v56  ;;  %v4756_v54 = vcombine.high %v4704_v28, %v4736_v10  ;;  %v4755_v30 = vcombine.low %v4704_v28, %v4736_v10  ;;  %v4757_v57 = vcombine.low %v9071_v53, %v9078_v58  ;;  %v10285_v28 = vld [vmem:[#allocation44_spill] sm:$0xff] }
 0x451   : > { %v4470_v9 = vadd.f32 %v4388_v22, %v3936_v63  ;;  %v4370_v11 = vpop.permute.xlu0 %4369  ;;  %v4758_v12 = vcombine.high %v9071_v53, %v9078_v58  ;;  %v3934_v44 = vadd.f32 %v10285_v28, %v8909_v4  ;;  %v3938_v10 = vadd.f32 %v8716_v16, %v3404_v60  ;;  %v10292_v28 = vld [vmem:[#allocation129_spill] sm:$0xff]  ;;  %v10297_v48 = vld [vmem:[#allocation148_spill] sm:$0xff] }
 0x452   : > { %v4461_v15 = vadd.f32 %v4370_v11, %v3927_v3  ;;  %5037 = vrot.lane.b32.xlu0 %v4754_v40, %s5610_s13  ;;  %5053 = vrot.lane.b32.xlu1 %v4756_v54, %s5612_s15  ;;  %v3925_v22 = vadd.f32 %v10286_v51, %v9012_v32  ;;  %v10287_v11 = vld [vmem:[#allocation114_spill] sm:$0xff]  ;;  %v10291_v4 = vrot.slane %v8657_v46, 2  ;;  %v10293_v16 = vrot.slane %v10292_v28, 2  ;;  %v10294_v51 = vld [vmem:[#allocation111_spill] sm:$0xff]  ;;  %v10296_v46 = vld [vmem:[#allocation145_spill] sm:$0xff] }
 0x453   : > { %v4793_v63 = vcombine.low %v4466_v13, %v4470_v9  ;;  %v4794_v14 = vcombine.high %v4466_v13, %v4470_v9  ;;  %v4392_v40 = vpop.permute.xlu1 %4391  ;;  %v10288_v54 = vrot.slane %v10287_v11, 2  ;;  %v4468_v13 = vadd.f32 %v4384_v1, %v3934_v44 }
 0x454   : > { %v4489_v62 = vcombine.low %v4457_v5, %v4461_v15  ;;  %v4490_v3 = vcombine.high %v4457_v5, %v4461_v15  ;;  %v3309_v60 = vsel %vm3276_vm1, %v10293_v16, %v10291_v4  ;;  %v4472_v9 = vadd.f32 %v4392_v40, %v3938_v10 }
 0x455   : > { %v3299_v27 = vsel %vm3276_vm1, %v10290_v37, %v10288_v54  ;;  %v4374_v32 = vpop.permute.xlu0 %4373  ;;  %v3312_v19 = vrot.slane %v10294_v51, 2  ;;  %v4459_v5 = vadd.f32 %v4366_v21, %v3925_v22  ;;  %v10295_v37 = vcombine.high %v8923_v20, %v8953_v49  ;;  %v10298_v51 = vld [vmem:[#allocation172_spill] sm:$0xff] }
 0x456   : > { %v3397_v29 = vadd.f32 %v3299_v27, %v9022_v38  ;;  %v4463_v15 = vadd.f32 %v4374_v32, %v3929_v61  ;;  %5045 = vrot.lane.b32.xlu0 %v4755_v30, %s5611_s14  ;;  %v2928_v11 = vadd.f32 %v10297_v48, %v10296_v46  ;;  %v3401_v1 = vadd.f32 %v3309_v60, %v9027_v24 }
 0x457   : > { %5109 = vrot.lane.b32.xlu1 %v10295_v37, %s5612_s15  ;;  %v4809_v44 = vcombine.low %v4468_v13, %v4472_v9  ;;  %v4810_v10 = vcombine.high %v4468_v13, %v4472_v9  ;;  %v9136_v38 = vrot.slane %v4825_v33, %v8813_v41  ;;  %v9142_v21 = vrot.slane %v4826_v2, %v8813_v41 }
 0x458   : > { %v4505_v20 = vcombine.low %v4459_v5, %v4463_v15  ;;  %v4506_v49 = vcombine.high %v4459_v5, %v4463_v15  ;;  %v4801_v30 = vrot.slane %v4793_v63, %v8804_v35  ;;  %v4808_v24 = vrot.slane %v4794_v14, %v8804_v35  ;;  %v10299_v5 = vld [vmem:[#allocation142_spill] sm:$0xff] }
 0x459   : > { %v4817_v27 = vrot.slane %v4809_v44, %v8804_v35  ;;  %v4824_v22 = vrot.slane %v4810_v10, %v8804_v35  ;;  %v4378_v61 = vpop.permute.xlu0 %4377  ;;  %v4497_v33 = vrot.slane %v4489_v62, %v8804_v35  ;;  %v4504_v40 = vrot.slane %v4490_v3, %v8804_v35 }
 0x45a   : > { %v4513_v54 = vrot.slane %v4505_v20, %v8804_v35  ;;  %v4520_v59 = vrot.slane %v4506_v49, %v8804_v35  ;;  %v2932_v15 = vadd.f32 %v10299_v5, %v10298_v51  ;;  %v3931_v37 = vadd.f32 %v8751_v7, %v3397_v29  ;;  %v10302_v49 = vld [vmem:[#allocation103_spill] sm:$0xff] }
 0x45b   : > { %v4857_v25 = vcombine.low %v4801_v30, %v4817_v27  ;;  %v4858_v2 = vcombine.high %v4801_v30, %v4817_v27  ;;  %v4873_v4 = vcombine.low %v4808_v24, %v4824_v22  ;;  %v4874_v28 = vcombine.high %v4808_v24, %v4824_v22 }
 0x45c   : > { %v4553_v63 = vcombine.low %v4497_v33, %v4513_v54  ;;  %v4554_v16 = vcombine.high %v4497_v33, %v4513_v54  ;;  %v4569_v14 = vcombine.low %v4504_v40, %v4520_v59  ;;  %v4570_v60 = vcombine.high %v4504_v40, %v4520_v59 }
 0x45d   : > { %v9153_v13 = vrot.slane %v4857_v25, %v8813_v41  ;;  %v9156_v9 = vrot.slane %v4858_v2, %v8813_v41  ;;  %v9159_v62 = vrot.slane %v4873_v4, %v8813_v41  ;;  %v9162_v3 = vrot.slane %v4874_v28, %v8813_v41  ;;  %v4382_v32 = vpop.permute.xlu0 %4381 }
 0x45e   : > { %v9171_v46 = vrot.slane %v4841_v36, %v8813_v41  ;;  %v9177_v48 = vrot.slane %v4842_v52, %v8813_v41  ;;  %v3935_v44 = vadd.f32 %v8791_v17, %v3401_v1  ;;  %v10301_v52 = vrot.slane %v10300_v55, 2 }
 0x45f   : > { %v4890_v10 = vcombine.high %v9136_v38, %v9153_v13  ;;  %v4891_v7 = vcombine.low %v9142_v21, %v9156_v9  ;;  %v4892_v29 = vcombine.high %v9142_v21, %v9156_v9  ;;  %v10303_v21 = vrot.slane %v10302_v49, 2 }
 0x460   : > { %v4893_v36 = vcombine.low %v9171_v46, %v9159_v62  ;;  %v4894_v20 = vcombine.high %v9171_v46, %v9159_v62  ;;  %v4895_v43 = vcombine.low %v9177_v48, %v9162_v3  ;;  %v4896_v17 = vcombine.high %v9177_v48, %v9162_v3 }
 0x461   : > { %v3304_v1 = vsel %vm3276_vm1, %v3302_v42, %v10301_v52  ;;  %v3314_v30 = vsel %vm3276_vm1, %v3312_v19, %v10303_v21  ;;  %v4386_v24 = vpop.permute.xlu0 %4385  ;;  %v4889_v27 = vcombine.low %v9136_v38, %v9153_v13  ;;  %v4465_v40 = vadd.f32 %v4378_v61, %v3931_v37 }
 0x462   : > { %v3399_v22 = vadd.f32 %v3304_v1, %v2928_v11  ;;  %v3403_v33 = vadd.f32 %v3314_v30, %v2932_v15  ;;  %v4469_v54 = vadd.f32 %v4386_v24, %v3935_v44  ;;  %v4577_v55 = vrot.slane %v4569_v14, %v8813_v41 }
 0x463   : > { %v4584_v21 = vrot.slane %v4570_v60, %v8813_v41  ;;  %v10304_v60 = vcombine.low %v8969_v39, %v8956_v45  ;;  %v10306_v53 = vcombine.low %v9089_v0, %v9081_v23  ;;  %v10309_v58 = vcombine.high %v8975_v31, %v8959_v18 }
 0x464   : > { %v3933_v59 = vadd.f32 %v8773_v50, %v3399_v22  ;;  %v3937_v25 = vadd.f32 %v8806_v8, %v3403_v33  ;;  %v4521_v2 = vcombine.low %v4465_v40, %v4469_v54  ;;  %v4522_v26 = vcombine.high %v4465_v40, %v4469_v54 }
 0x465   : > { %v4390_v4 = vpop.permute.xlu0 %4389  ;;  %v9211_v8 = vrot.slane %v4553_v63, %v8813_v41 }
 0x466   : > { %v4467_v42 = vadd.f32 %v4382_v32, %v3933_v59  ;;  %v4471_v28 = vadd.f32 %v4390_v4, %v3937_v25  ;;  %v4529_v19 = vrot.slane %v4521_v2, %v8804_v35  ;;  %v4536_v5 = vrot.slane %v4522_v26, %v8804_v35 }
 0x467   : > { %v4568_v32 = vrot.slane %v4554_v16, %v8813_v41 }
 0x468   : > { %v4537_v9 = vcombine.low %v4467_v42, %v4471_v28  ;;  %v4538_v51 = vcombine.high %v4467_v42, %v4471_v28  ;;  %v10310_v28 = vcombine.low %v9061_v34, %v9074_v56 }
 0x46a   : > { %v4545_v11 = vrot.slane %v4537_v9, %v8804_v35  ;;  %v4552_v61 = vrot.slane %v4538_v51, %v8804_v35 }
 0x46c   : > { %v4585_v15 = vcombine.low %v4529_v19, %v4545_v11  ;;  %v4586_v37 = vcombine.high %v4529_v19, %v4545_v11  ;;  %v4601_v50 = vcombine.low %v4536_v5, %v4552_v61  ;;  %v4602_v44 = vcombine.high %v4536_v5, %v4552_v61 }
 0x46d   : > { %v10311_v11 = vcombine.low %v8920_v47, %v8950_v6 }
 0x46e   : > { %v9216_v52 = vrot.slane %v4585_v15, %v8813_v41  ;;  %v4600_v1 = vrot.slane %v4586_v37, %v8813_v41  ;;  %v4609_v49 = vrot.slane %v4601_v50, %v8813_v41  ;;  %v4616_v35 = vrot.slane %v4602_v44, %v8813_v41  ;;  %v5181_v41 = vld [vmem:[%s9348_s2 + $0x8] sm:$0xff] }
 0x470   : > { %v4618_v30 = vcombine.high %v9211_v8, %v9216_v52  ;;  %v4619_v63 = vcombine.low %v4568_v32, %v4600_v1  ;;  %v4620_v24 = vcombine.high %v4568_v32, %v4600_v1  ;;  %v4621_v22 = vcombine.low %v4577_v55, %v4609_v49 }
 0x471   : > { %v4622_v16 = vcombine.high %v4577_v55, %v4609_v49  ;;  %v4623_v33 = vcombine.low %v4584_v21, %v4616_v35  ;;  %v4624_v14 = vcombine.high %v4584_v21, %v4616_v35  ;;  %v4617_v40 = vcombine.low %v9211_v8, %v9216_v52 }
 0x472   : > { %5035 = vrot.lane.b32.xlu0 %v4618_v30, %s5610_s13  ;;  %5043 = vrot.lane.b32.xlu1 %v4619_v63, %s5611_s14 }
 0x476   : > { %5061 = vrot.lane.b32.xlu1 %v4757_v57, %s5613_s16  ;;  %5091 = vrot.lane.b32.xlu0 %v4890_v10, %s5610_s13  ;;  %v10305_v57 = vcombine.high %v8969_v39, %v8956_v45  ;;  %v5180_v10 = vld [vmem:[%s9348_s2] sm:$0xff]  ;;  %v10307_v45 = vcombine.low %v8975_v31, %v8959_v18  ;;  %v10308_v39 = vcombine.high %v9089_v0, %v9081_v23 }
 0x47a   : > { %5117 = vrot.lane.b32.xlu1 %v10304_v60, %s5613_s16  ;;  %5189 = vperm.xlu0 %5488, %v5181_v41  }
 0x47e   : > { %5069 = vrot.lane.b32.xlu1 %v4758_v12, %s5614_s21  ;;  %5099 = vrot.lane.b32.xlu0 %v4891_v7, %s5611_s14 }
 0x482   : > { %5125 = vrot.lane.b32.xlu1 %v10305_v57, %s5614_s21  ;;  %5051 = vrot.lane.b32.xlu0 %v4620_v24, %s5612_s15 }
 0x486   : > { %5059 = vrot.lane.b32.xlu1 %v4621_v22, %s5613_s16  ;;  %5107 = vrot.lane.b32.xlu0 %v4892_v29, %s5612_s15 }
 0x48a   : > { %5115 = vrot.lane.b32.xlu1 %v4893_v36, %s5613_s16  ;;  %5184 = vperm.xlu0 %5488, %v5180_v10  }
 0x48e   : > { %5067 = vrot.lane.b32.xlu1 %v4622_v16, %s5614_s21  ;;  %5077 = vrot.lane.b32.xlu0 %v10306_v53, %s5615_s24 }
 0x492   : > { %5123 = vrot.lane.b32.xlu1 %v4894_v20, %s5614_s21  ;;  %5133 = vrot.lane.b32.xlu0 %v10307_v45, %s5615_s24 }
 0x496   : > { %5075 = vrot.lane.b32.xlu1 %v4623_v33, %s5615_s24  ;;  %5085 = vrot.lane.b32.xlu0 %v10308_v39, %s5616_s25 }
 0x49a   : > { %5083 = vrot.lane.b32.xlu1 %v4624_v14, %s5616_s25  ;;  %5141 = vrot.lane.b32.xlu0 %v10309_v58, %s5616_s25 }
 0x49e   : > { %5131 = vrot.lane.b32.xlu0 %v4895_v43, %s5615_s24 }
 0x4a2   : > { %5139 = vrot.lane.b32.xlu0 %v4896_v17, %s5616_s25 }
 0x4b4   : > { %v5094_v12 = vpop.permute.xlu1 %5093 }
 0x4b5   : > { %v5167_v61 = vsel %vm5145_vm2, %v10311_v11, %v5094_v12 }
 0x4b8   : > { %v5102_v62 = vpop.permute.xlu1 %5101 }
 0x4b9   : > { %v5169_v56 = vsel %vm5148_vm3, %v5167_v61, %v5102_v62 }
 0x4c4   : > { %v5054_v46 = vpop.permute.xlu1 %5053  ;;  %v5038_v29 = vpop.permute.xlu0 %5037 }
 0x4c5   : > { %v5147_v9 = vsel %vm5145_vm2, %v10310_v28, %v5038_v29 }
 0x4c8   : > { %v5046_v0 = vpop.permute.xlu0 %5045 }
 0x4c9   : > { %v5110_v7 = vpop.permute.xlu1 %5109  ;;  %v5150_v51 = vsel %vm5148_vm3, %v5147_v9, %v5046_v0 }
 0x4ca   : > { %v5153_v34 = vsel %vm5151_vm4, %v5150_v51, %v5054_v46  ;;  %v5171_v44 = vsel %vm5151_vm4, %v5169_v56, %v5110_v7 }
 0x4e4   : > { %v5044_v23 = vpop.permute.xlu1 %5043  ;;  %v5036_v20 = vpop.permute.xlu0 %5035 }
 0x4e5   : > { %v5146_v15 = vsel %vm5145_vm2, %v4617_v40, %v5036_v20 }
 0x4e6   : > { %v5149_v47 = vsel %vm5148_vm3, %v5146_v15, %v5044_v23 }
 0x4e8   : > { %v5062_v36 = vpop.permute.xlu1 %5061  ;;  %v5092_v31 = vpop.permute.xlu0 %5091 }
 0x4e9   : > { %v5156_v37 = vsel %vm5154_vm5, %v5153_v34, %v5062_v36  ;;  %v5166_v52 = vsel %vm5145_vm2, %v4889_v27, %v5092_v31 }
 0x4ec   : > { %v5118_v54 = vpop.permute.xlu1 %5117 }
 0x4ed   : > { %v5173_v6 = vsel %vm5154_vm5, %v5171_v44, %v5118_v54  ;;  %v5231_v44 = vld [vmem:[%s9349_s3 + $0x10] sm:$0xff] }
 0x4f0   : > { %v5070_v18 = vpop.permute.xlu1 %5069 }
 0x4f1   : > { %v5159_v32 = vsel %vm5157_vm6, %v5156_v37, %v5070_v18 }
 0x4f4   : > { %v5126_v59 = vpop.permute.xlu1 %5125 }
 0x4f5   : > { %v5190_v25 = vpop.permute.xlu0 %5189  ;;  %v5175_v1 = vsel %vm5157_vm6, %v5173_v6, %v5126_v59 }
 0x4f8   : > { %v5060_v43 = vpop.permute.xlu1 %5059 }
 0x4f9   : > { %v5100_v2 = vpop.permute.xlu0 %5099 }
 0x4fa   : > { %v5168_v21 = vsel %vm5148_vm3, %v5166_v52, %v5100_v2 }
 0x4fc   : > { %v5116_v4 = vpop.permute.xlu1 %5115 }
 0x4fd   : > { %v5052_v26 = vpop.permute.xlu0 %5051 }
 0x4fe   : > { %v5152_v49 = vsel %vm5151_vm4, %v5149_v47, %v5052_v26  ;;  %v5233_v26 = vld [vmem:[%s9350_s4] sm:$0xff]  ;;  %v5232_v47 = vld [vmem:[%s9349_s3 + $0x18] sm:$0xff] }
 0x4ff   : > { %v5155_v16 = vsel %vm5154_vm5, %v5152_v49, %v5060_v43 }
 0x500   : > { %v5068_v17 = vpop.permute.xlu1 %5067 }
 0x501   : > { %v5108_v3 = vpop.permute.xlu0 %5107  ;;  %v5158_v41 = vsel %vm5157_vm6, %v5155_v16, %v5068_v17  ;;  %v5235_v17 = vld [vmem:[%s9350_s4 + $0x10] sm:$0xff] }
 0x502   : > { %v5170_v24 = vsel %vm5151_vm4, %v5168_v21, %v5108_v3  ;;  %v5617_v3 = vmov 0.0  }
 0x503   : > { %v5172_v27 = vsel %vm5154_vm5, %v5170_v24, %v5116_v4  ;;  %v5236_v4 = vld [vmem:[%s9350_s4 + $0x18] sm:$0xff]  ;;  %5333 = vmatprep.mubr.f32.mxu0 %v5617_v3  ;;  %5345 = vmatprep.mubr.f32.mxu1 %v5617_v3 }
 0x504   : > { %v5124_v19 = vpop.permute.xlu1 %5123 }
 0x505   : > { %v5185_v48 = vpop.permute.xlu0 %5184  ;;  %v5174_v57 = vsel %vm5157_vm6, %v5172_v27, %v5124_v19 }
 0x508   : > { %v5076_v55 = vpop.permute.xlu1 %5075 }
 0x509   : > { %v5078_v42 = vpop.permute.xlu0 %5077  ;;  %v5161_v60 = vsel %vm5160_vm7, %v5158_v41, %v5076_v55 }
 0x50a   : > { %v5162_v8 = vsel %vm5160_vm7, %v5159_v32, %v5078_v42  ;;  %v5230_v32 = vld [vmem:[%s9349_s3 + $0x8] sm:$0xff] }
 0x50c   : > { %v5084_v33 = vpop.permute.xlu1 %5083 }
 0x50d   : > { %v5134_v5 = vpop.permute.xlu0 %5133  ;;  %v5164_v10 = vsel %vm5163_vm8, %v5161_v60, %v5084_v33 }
 0x50e   : > { %v5177_v30 = vsel %vm5160_vm7, %v5175_v1, %v5134_v5  ;;  %v5192_v58 = vadd.f32 %v5185_v48, %v5164_v10 }
 0x511   : > { %v5086_v50 = vpop.permute.xlu0 %5085 }
 0x512   : > { %v5165_v35 = vsel %vm5163_vm8, %v5162_v8, %v5086_v50  ;;  %v5229_v50 = vld [vmem:[%s9349_s3] sm:$0xff] }
 0x513   : > { %v5194_v38 = vadd.f32 %v5190_v25, %v5165_v35 }
 0x515   : > { %v5142_v63 = vpop.permute.xlu0 %5141 }
 0x516   : > { %v5179_v22 = vsel %vm5163_vm8, %v5177_v30, %v5142_v63 }
 0x517   : > { %v5195_v13 = vadd.f32 %v5190_v25, %v5179_v22 }
 0x519   : > { %v5132_v14 = vpop.permute.xlu0 %5131  ;;  %v5199_v40 = vadd.f32 %v5195_v13, %v5194_v38 }
 0x51a   : > { %v5176_v53 = vsel %vm5160_vm7, %v5174_v57, %v5132_v14 }
 0x51b   : > { %5200 = vadd.xlane.f32.xlu1 %v5199_v40 }
 0x51d   : > { %v5140_v45 = vpop.permute.xlu0 %5139 }
 0x51e   : > { %v5178_v39 = vsel %vm5163_vm8, %v5176_v53, %v5140_v45 }
 0x51f   : > { %v5193_v12 = vadd.f32 %v5185_v48, %v5178_v39  ;;  %v5234_v48 = vld [vmem:[%s9350_s4 + $0x8] sm:$0xff] }
 0x521   : > { %v5196_v62 = vadd.f32 %v5193_v12, %v5192_v58 }
 0x523   : > { %5197 = vadd.xlane.f32.xlu0 %v5196_v62 }
 0x5a4   : > { %v5201_v46 = vpop.xlane.xlu1 %5200 }
 0x5a5   : > { %v5204_v7 = vmul.f32 0.00390625, %v5201_v46 }
 0x5a7   : > { %v5207_v29 = vsub.f32 %v5194_v38, %v5204_v7  ;;  %v5208_v23 = vsub.f32 %v5195_v13, %v5204_v7 }
 0x5a9   : > { %v5211_v0 = vmul.f32 %v5207_v29, %v5207_v29  ;;  %v5212_v36 = vmul.f32 %v5208_v23, %v5208_v23 }
 0x5ab   : > { %v5216_v20 = vadd.f32 %v5212_v36, %v5211_v0 }
 0x5ac   : > { %v5198_v54 = vpop.xlane.xlu0 %5197 }
 0x5ad   : > { %v5203_v18 = vmul.f32 0.00390625, %v5198_v54  ;;  %5217 = vadd.xlane.f32.xlu0 %v5216_v20 }
 0x5af   : > { %v5205_v31 = vsub.f32 %v5192_v58, %v5203_v18  ;;  %v5206_v59 = vsub.f32 %v5193_v12, %v5203_v18 }
 0x5b1   : > { %v5209_v25 = vmul.f32 %v5205_v31, %v5205_v31  ;;  %v5210_v2 = vmul.f32 %v5206_v59, %v5206_v59 }
 0x5b3   : > { %v5213_v43 = vadd.f32 %v5210_v2, %v5209_v25 }
 0x5b5   : > { %5214 = vadd.xlane.f32.xlu1 %v5213_v43 }
 0x5c3   : > { %5239 = vperm.xlu0 %5488, %v5233_v26  }
 0x5c6   : > { %5244 = vperm.xlu1 %5489, %v5234_v48  }
 0x5c7   : > { %5254 = vperm.xlu0 %5488, %v5236_v4  }
 0x5ca   : > { %5249 = vperm.xlu1 %5489, %v5235_v17  }
 0x636   : > { %v5218_v42 = vpop.xlane.xlu0 %5217 }
 0x637   : > { %v5220_v28 = vmul.f32 0.00390625, %v5218_v42 }
 0x639   : > { %v5222_v9 = vadd.f32 1e-05, %v5220_v28 }
 0x63b   : > { %5496 = vrsqrt.f32 %v5222_v9 }
 0x63e   : > { %v5215_v51 = vpop.xlane.xlu1 %5214  ;;  %v5240_v55 = vpop.permute.xlu0 %5239 }
 0x63f   : > { %v5219_v19 = vmul.f32 0.00390625, %v5215_v51 }
 0x641   : > { %v5221_v5 = vadd.f32 1e-05, %v5219_v19 }
 0x642   : > { %v5245_v6 = vpop.permute.xlu1 %5244  ;;  %v5255_v63 = vpop.permute.xlu0 %5254 }
 0x643   : > { %5498 = vrsqrt.f32 %v5221_v5 }
 0x646   : > { %v5250_v8 = vpop.permute.xlu1 %5249 }
 0x648   : > { %v5497_v11 = vpop.eup %5496 }
 0x649   : > { %v5228_v61 = vmul.f32 %v5497_v11, %v5208_v23  ;;  %v5227_v15 = vmul.f32 %v5497_v11, %v5207_v29 }
 0x64b   : > { %5297 = vmatprep.subr.mxu0 %v5228_v61  ;;  %5436 = vmatprep.subr.mxu1 %v5228_v61 }
 0x64c   : > { %5298 = vmatpush1.msra.mxu0 %v5227_v15  ;;  %5438 = vmatpush1.msra.mxu1 %v5227_v15 }
 0x650   : > { %v5499_v34 = vpop.eup %5498 }
 0x651   : > { %v5226_v56 = vmul.f32 %v5499_v34, %v5206_v59  ;;  %v5225_v37 = vmul.f32 %v5499_v34, %v5205_v31 }
 0x653   : > { %5299 = vmatprep.subr.mxu0 %v5226_v56  ;;  %5437 = vmatprep.subr.mxu1 %v5226_v56 }
 0x654   : > { %5300 = vmatpush1.msra.mxu0 %v5225_v37  ;;  %5439 = vmatpush1.msra.mxu1 %v5225_v37 }
 0x655   : > { %5429 = vmatmul.mubr.msk.f32.vlgmr.msra.gmra.mxu0 %vm5145_vm2, %v5229_v50  ;;  %5431 = vmatmul.mubr.msk.f32.vlgmr.msra.gmra.mxu1 %vm5145_vm2, %v5231_v44 }
 0x656   : > { %5339 = vmatprep.mubr.f32.mxu0 %v5617_v3  ;;  %5351 = vmatprep.mubr.f32.mxu1 %v5617_v3 }
 0x659   : > { %5430 = vmatmul.mubr.msk.f32.gmra.mxu0 %vm5145_vm2, %v5230_v32  ;;  %5432 = vmatmul.mubr.msk.f32.gmra.mxu1 %vm5145_vm2, %v5232_v47 }
 0x715   : > { %v5335_v52 = vpop.f32.mrf.mxu0  ;;  %v5347_v1 = vpop.f32.mrf.mxu1 }
 0x716   : > { %v5336_v49 = vadd.f32 %v5335_v52, %v5240_v55  ;;  %v5348_v35 = vadd.f32 %v5347_v1, %v5250_v8 }
 0x717   : > { %v5337_v21 = vpop.f32.mrf.mxu0  ;;  %v5349_v30 = vpop.f32.mrf.mxu1 }
 0x718   : > { %5358 = vst [vmem:[%s224_s22] sm:$0xff] %v5336_v49  ;;  %5362 = vst [vmem:[%s224_s22 + $0x20] sm:$0xff] %v5348_v35  ;;  %v5338_v24 = vadd.f32 %v5337_v21, %v5240_v55  ;;  %v5350_v22 = vadd.f32 %v5349_v30, %v5250_v8 }
 0x719   : > { %v5341_v16 = vpop.f32.mrf.mxu0  ;;  %v5353_v38 = vpop.f32.mrf.mxu1 }
 0x71a   : > { %5359 = vst [vmem:[%s224_s22 + $0x8] sm:$0xff] %v5338_v24  ;;  %5363 = vst [vmem:[%s224_s22 + $0x28] sm:$0xff] %v5350_v22  ;;  %v5342_v13 = vadd.f32 %v5341_v16, %v5245_v6  ;;  %v5354_v27 = vadd.f32 %v5353_v38, %v5255_v63 }
 0x71b   : > { %v5343_v33 = vpop.f32.mrf.mxu0  ;;  %v5355_v14 = vpop.f32.mrf.mxu1 }
 0x71c   : > { %5360 = vst [vmem:[%s224_s22 + $0x10] sm:$0xff] %v5342_v13  ;;  %5364 = vst [vmem:[%s224_s22 + $0x30] sm:$0xff] %v5354_v27  ;;  %v5344_v40 = vadd.f32 %v5343_v33, %v5245_v6  ;;  %v5356_v41 = vadd.f32 %v5355_v14, %v5255_v63 }
 0x71e   : > { %5361 = vst [vmem:[%s224_s22 + $0x18] sm:$0xff] %v5344_v40  ;;  %5365 = vst [vmem:[%s224_s22 + $0x38] sm:$0xff] %v5356_v41 }
 0x71f PF: > { %s15_s18 = sadd.s32 1, %s5594_s18  }
 0x720   : > { %p12_p4 = scmp.ge.s32.totalorder %s15_s18, 4  }
 0x722   :  { %14 = sbr.rel (!%p12_p4) target bundleno = 1 (0x1), region = 70 }

</bundles_post_ra>
